<compile_context>
chip_gen: v7x
topology: tpu7x:2x2x1
jax: 0.10.0
libtpu: 0.0.40
codegen_flags: <defaults>
</compile_context>

<pallas_src>
import functools

import jax
import jax.numpy as jnp
from jax.experimental import pallas as pl
from jax.experimental.pallas import tpu as pltpu


# ---------------------------------------------------------------------------
# Fused 5-layer kernel: processes NB batch elements per grid step.
# ---------------------------------------------------------------------------
def _fused_discriminator_kernel(x_ref, *refs, layer_cfg, nb, mxu_dtype):
    n_layers = len(layer_cfg)
    b_refs = refs[:n_layers]                   # concat banded weights (4*W*Cin, Wo*Coutp)
    bias_refs = refs[n_layers:2 * n_layers]    # (1, Wo*Coutp) f32
    o_ref = refs[2 * n_layers]                 # (nb*Hl, Wl*Coutp_last)
    slab_a = refs[2 * n_layers + 1]            # VMEM ping scratch (f32)
    slab_b = refs[2 * n_layers + 2]            # VMEM pong scratch (f32)

    src = x_ref                                # layer 0 reads the input block directly
    for li, (H, W, Cin, Cout, Coutp, apply_act) in enumerate(layer_cfg):
        Ho, Wo = H // 2, W // 2
        M = nb * Ho                            # batched output rows of this layer
        Kin = W * Cin                          # input lane width  (multiple of 128)
        Kout = Wo * Coutp                      # output lane width (multiple of 128)

        # -- gather the 4 kernel-row taps (input row 2*ho + kh - 1) ----------
        # kh=1 / kh=2: plain stride-2 sublane loads (even / odd rows).  H = 2*Ho,
        # so the global stride-2 pattern stays image-aligned across the stacked batch.
        xe = src[pl.ds(0, M, 2), :Kin]         # rows 2*r      -> tap kh = 1
        xo = src[pl.ds(1, M, 2), :Kin]         # rows 2*r + 1  -> tap kh = 2
        # kh=0 / kh=3: same rows shifted by one output row (XLU roll) plus a
        # constant per-image boundary mask (top/bottom zero-padding in H and
        # image boundaries in the stacked slab).
        if Ho > 1:
            rr = jax.lax.broadcasted_iota(jnp.int32, (M, 1), 0)
            ho_in = rr & (Ho - 1)              # row index inside the image (Ho = 2^k)
            x0 = jnp.where(ho_in != 0, pltpu.roll(xo, shift=1, axis=0), 0.0)
            x3 = jnp.where(ho_in != Ho - 1, pltpu.roll(xe, shift=M - 1, axis=0), 0.0)
        else:
            # Ho == 1: taps kh=0 and kh=3 are entirely zero padding.
            x0 = jnp.zeros_like(xe)
            x3 = jnp.zeros_like(xe)

        # -- one K = 4*W*Cin matmul per layer (kh taps folded into K) --------
        xall = jnp.concatenate(
            [x0.astype(mxu_dtype), xe.astype(mxu_dtype),
             xo.astype(mxu_dtype), x3.astype(mxu_dtype)], axis=-1)   # (M, 4*Kin)
        acc = jnp.dot(xall, b_refs[li][...], preferred_element_type=jnp.float32)
        acc = acc + bias_refs[li][...]          # f32 bias row, broadcast over rows
        if apply_act:
            acc = jnp.where(acc >= 0, acc, 0.2 * acc)               # LeakyReLU(0.2)

        if li + 1 < n_layers:
            dst = slab_a if li % 2 == 0 else slab_b                 # ping-pong
            dst[:M, :Kout] = acc               # inter-layer slab stays in VMEM (f32)
            src = dst
        else:
            o_ref[...] = acc.astype(o_ref.dtype)                    # (nb, 128) full-tile store


# ---------------------------------------------------------------------------
# One-time parameter preparation: PyTorch (Cout, Cin, 4, 4) conv weights ->
# per-layer concatenated banded matrices (4*W*Cin, Wo*Coutp) + bias rows.
# ---------------------------------------------------------------------------
def prepare_discriminator(params, input_hw, compute_dtype=jnp.float32):
    H, W = input_hw
    assert (H & (H - 1)) == 0 and (W & (W - 1)) == 0, "spatial dims must be powers of two"
    n_layers = len(params)
    b_cats, bias_rows, layer_cfg = [], [], []
    for li, (w, b) in enumerate(params):
        Cout, Cin, KH, KW = w.shape
        assert KH == 4 and KW == 4
        assert H >= 2 and W >= 2 and H % 2 == 0 and W % 2 == 0
        Ho, Wo = H // 2, W // 2
        is_last = li == n_layers - 1
        Coutp = int(-(-Cout // 128) * 128) if is_last else Cout
        # Lane-dense layout requirement (explicit, per review): every layer's
        # activation slab must be a multiple of 128 lanes wide.
        assert (W * Cin) % 128 == 0, (W, Cin)
        assert (Wo * Coutp) % 128 == 0, (Wo, Coutp)

        w_idx = jnp.arange(W)
        wo_idx = jnp.arange(Wo)
        per_kh = []
        for kh in range(4):
            blk = jnp.zeros((W, Cin, Wo, Coutp), jnp.float32)
            for kw in range(4):
                # B[kh][(w, ci), (wo, co)] = weight[co, ci, kh, kw] iff w == 2*wo + kw - 1
                # (folds the 4 kw taps, the W stride and the W zero-padding).
                ind = (w_idx[:, None] == (2 * wo_idx[None, :] + kw - 1)).astype(jnp.float32)
                wmat = w[:, :, kh, kw].astype(jnp.float32).T        # (Cin, Cout)
                if Coutp != Cout:
                    wmat = jnp.pad(wmat, ((0, 0), (0, Coutp - Cout)))
                blk = blk + ind[:, None, :, None] * wmat[None, :, None, :]
            per_kh.append(blk.reshape(W * Cin, Wo * Coutp))
        # fold the 4 kh taps into ONE (4*W*Cin, Wo*Coutp) contraction
        b_cats.append(jnp.concatenate(per_kh, axis=0).astype(compute_dtype))

        bvec = b.astype(jnp.float32)
        if Coutp != Cout:
            bvec = jnp.pad(bvec, (0, Coutp - Cout))
        bias_rows.append(jnp.tile(bvec, (Wo,)).reshape(1, Wo * Coutp))

        layer_cfg.append((H, W, Cin, Cout, Coutp, not is_last))
        H, W = Ho, Wo

    return {
        "Bcat": b_cats,
        "bias_rows": bias_rows,
        "layer_cfg": tuple(layer_cfg),
        "compute_dtype": compute_dtype,
        "out_hw": (H, W),
    }


# ---------------------------------------------------------------------------
# Forward pass (NCHW in / NCHW out, like the PyTorch module).
# ---------------------------------------------------------------------------
def predict_discriminator_forward(x_nchw, prep, nb=8):
    b_cats, bias_rows = prep["Bcat"], prep["bias_rows"]
    layer_cfg = prep["layer_cfg"]
    cdt = prep["compute_dtype"]
    n_layers = len(layer_cfg)
    N, C, H, W = x_nchw.shape
    H0, W0, C0 = layer_cfg[0][0], layer_cfg[0][1], layer_cfg[0][2]
    assert (H, W, C) == (H0, W0, C0)
    assert nb % 8 == 0, "nb must be a multiple of 8 (full-sublane output stores)"

    Hl, Wl = prep["out_hw"]
    Cout_last, Coutp_last = layer_cfg[-1][3], layer_cfg[-1][4]

    # Pad the batch so the grid tiles evenly in blocks of nb images.
    n_pad = pl.cdiv(N, nb) * nb
    # NCHW -> lane-dense (N*H, W*C) slab.
    # TODO(synk): accept NHWC inputs / fuse into the producer to skip this extra
    # HBM round trip for large spatial inputs.
    x_slab = jnp.transpose(x_nchw, (0, 2, 3, 1)).reshape(N, H, W * C)
    if n_pad != N:
        x_slab = jnp.pad(x_slab, ((0, n_pad - N), (0, 0), (0, 0)))
    x_slab = x_slab.reshape(n_pad * H, W * C).astype(jnp.float32)

    kernel = functools.partial(_fused_discriminator_kernel,
                               layer_cfg=layer_cfg, nb=nb, mxu_dtype=cdt)

    in_specs = [pl.BlockSpec((nb * H, W * C), lambda g: (g, 0))]
    for bc in b_cats:
        in_specs.append(pl.BlockSpec(bc.shape, lambda g: (0, 0)))
    for br in bias_rows:
        in_specs.append(pl.BlockSpec(br.shape, lambda g: (0, 0)))

    # Ping-pong inter-layer VMEM slabs, sized to the largest layer output they hold.
    def _out_rows(li):
        return nb * (layer_cfg[li][0] // 2)

    def _out_cols(li):
        return (layer_cfg[li][1] // 2) * layer_cfg[li][4]

    a_layers = [li for li in range(n_layers - 1) if li % 2 == 0]
    b_layers = [li for li in range(n_layers - 1) if li % 2 == 1]
    slab_a_shape = (max(map(_out_rows, a_layers)), max(map(_out_cols, a_layers))) \
        if a_layers else (8, 128)
    slab_b_shape = (max(map(_out_rows, b_layers)), max(map(_out_cols, b_layers))) \
        if b_layers else (8, 128)

    out = pl.pallas_call(
        kernel,
        out_shape=jax.ShapeDtypeStruct((n_pad * Hl, Wl * Coutp_last), jnp.float32),
        grid=(n_pad // nb,),
        in_specs=in_specs,
        out_specs=pl.BlockSpec((nb * Hl, Wl * Coutp_last), lambda g: (g, 0)),
        scratch_shapes=[
            pltpu.VMEM(slab_a_shape, jnp.float32),
            pltpu.VMEM(slab_b_shape, jnp.float32),
        ],
        compiler_params=pltpu.CompilerParams(
            dimension_semantics=("parallel",)),
    )(x_slab, *b_cats, *bias_rows)

    # un-flatten lanes (Wl, Coutp), drop zero-padded output channels, -> NCHW
    out = out.reshape(n_pad, Hl, Wl, Coutp_last)[:N, :, :, :Cout_last]
    return jnp.transpose(out, (0, 3, 1, 2))


# ---------------------------------------------------------------------------
# Parameter init + pure-JAX (XLA conv) reference for correctness.
# ---------------------------------------------------------------------------
def init_params(key, num_classes, ndf):
    layer_dims = [
        (num_classes, ndf),
        (ndf, ndf * 2),
        (ndf * 2, ndf * 4),
        (ndf * 4, ndf * 8),
        (ndf * 8, 1),
    ]
    params = []
    for cin, cout in layer_dims:
        key, kw, kb = jax.random.split(key, 3)
        w = 0.05 * jax.random.normal(kw, (cout, cin, 4, 4), dtype=jnp.float32)
        b = 0.05 * jax.random.normal(kb, (cout,), dtype=jnp.float32)
        params.append((w, b))
    return params


def _ref_forward(x_nchw, params):
    x = x_nchw
    n_layers = len(params)
    for i, (w, b) in enumerate(params):
        x = jax.lax.conv_general_dilated(
            x, w, window_strides=(2, 2), padding=((1, 1), (1, 1)),
            dimension_numbers=("NCHW", "OIHW", "NCHW"),
        )
        x = x + b.reshape(1, -1, 1, 1)
        if i < n_layers - 1:
            x = jnp.where(x >= 0, x, 0.2 * x)
    return x


if __name__ == "__main__":
    key = jax.random.PRNGKey(0)
    num_classes, ndf = 4, 8          # small synthetic config (W*Cin == 128 per layer)
    N, H, W = 16, 32, 32             # 32 -> 16 -> 8 -> 4 -> 2 -> 1 spatial; grid=(2,)

    key, kx = jax.random.split(key)
    x = jax.random.normal(kx, (N, num_classes, H, W), dtype=jnp.float32)
    params = init_params(key, num_classes, ndf)
    ref = jax.block_until_ready(_ref_forward(x, params))

    # f32 MXU path: tight check against the XLA conv reference.
    prep_f32 = prepare_discriminator(params, (H, W), compute_dtype=jnp.float32)
    out = jax.block_until_ready(predict_discriminator_forward(x, prep_f32, nb=8))
    assert out.shape == ref.shape == (N, 1, 1, 1), (out.shape, ref.shape)
    assert jnp.allclose(out, ref, rtol=2e-4, atol=2e-4), "f32 mismatch vs XLA reference"

    # bf16 MXU operands + f32 accumulation & f32 inter-layer slabs
    # (recommended fast path on v6e/v7x): loose check.
    prep_bf16 = prepare_discriminator(params, (H, W), compute_dtype=jnp.bfloat16)
    out_bf16 = jax.block_until_ready(predict_discriminator_forward(x, prep_bf16, nb=8))
    assert out_bf16.shape == ref.shape
    assert jnp.allclose(out_bf16, ref, rtol=5e-2, atol=5e-2), "bf16 mismatch vs reference"

    print("KERNEL_OK")
</pallas_src>

<mosaic_0001>
module attributes {stable_mosaic.version = 11 : i64} {
  func.func @_fused_discriminator_kernel(%arg0: i32, %arg1: memref<256x128xf32, #tpu.memory_space<vmem>>, %arg2: memref<512x128xf32, #tpu.memory_space<vmem>>, %arg3: memref<512x128xf32, #tpu.memory_space<vmem>>, %arg4: memref<512x128xf32, #tpu.memory_space<vmem>>, %arg5: memref<512x128xf32, #tpu.memory_space<vmem>>, %arg6: memref<512x128xf32, #tpu.memory_space<vmem>>, %arg7: memref<1x128xf32, #tpu.memory_space<vmem>>, %arg8: memref<1x128xf32, #tpu.memory_space<vmem>>, %arg9: memref<1x128xf32, #tpu.memory_space<vmem>>, %arg10: memref<1x128xf32, #tpu.memory_space<vmem>>, %arg11: memref<1x128xf32, #tpu.memory_space<vmem>>, %arg12: memref<8x128xf32, #tpu.memory_space<vmem>>, %arg13: memref<128x128xf32, #tpu.memory_space<vmem>>, %arg14: memref<64x128xf32, #tpu.memory_space<vmem>>) attributes {dimension_semantics = [#tpu.dimension_semantics<parallel>], iteration_bounds = array<i64: 2>, scalar_prefetch = 0 : i64, scratch_operands = 2 : i64, tpu.core_type = #tpu.core_type<tc>, window_params = [{transform_indices = @transform_0, window_bounds = array<i64: 256, 128>}, {pipeline_mode = #tpu.pipeline_mode<synchronous>, transform_indices = @transform_1, window_bounds = array<i64: 512, 128>}, {pipeline_mode = #tpu.pipeline_mode<synchronous>, transform_indices = @transform_2, window_bounds = array<i64: 512, 128>}, {pipeline_mode = #tpu.pipeline_mode<synchronous>, transform_indices = @transform_3, window_bounds = array<i64: 512, 128>}, {pipeline_mode = #tpu.pipeline_mode<synchronous>, transform_indices = @transform_4, window_bounds = array<i64: 512, 128>}, {pipeline_mode = #tpu.pipeline_mode<synchronous>, transform_indices = @transform_5, window_bounds = array<i64: 512, 128>}, {pipeline_mode = #tpu.pipeline_mode<synchronous>, transform_indices = @transform_6, window_bounds = array<i64: 1, 128>}, {pipeline_mode = #tpu.pipeline_mode<synchronous>, transform_indices = @transform_7, window_bounds = array<i64: 1, 128>}, {pipeline_mode = #tpu.pipeline_mode<synchronous>, transform_indices = @transform_8, window_bounds = array<i64: 1, 128>}, {pipeline_mode = #tpu.pipeline_mode<synchronous>, transform_indices = @transform_9, window_bounds = array<i64: 1, 128>}, {pipeline_mode = #tpu.pipeline_mode<synchronous>, transform_indices = @transform_10, window_bounds = array<i64: 1, 128>}, {transform_indices = @transform_11, window_bounds = array<i64: 8, 128>}]} {
    %c0 = arith.constant 0 : index
    %c0_0 = arith.constant 0 : index
    %0 = tpu.strided_load %arg1[%c0, %c0_0] {strides = array<i32: 2, 1>} : memref<256x128xf32, #tpu.memory_space<vmem>>, vector<128x128xf32>
    %c1 = arith.constant 1 : index
    %c0_1 = arith.constant 0 : index
    %1 = tpu.strided_load %arg1[%c1, %c0_1] {strides = array<i32: 2, 1>} : memref<256x128xf32, #tpu.memory_space<vmem>>, vector<128x128xf32>
    %2 = tpu.iota {dimensions = array<i32: 0>} : vector<128x1xi32>
    %c15_i32 = arith.constant 15 : i32
    %3 = vector.broadcast %c15_i32 : i32 to vector<128x1xi32>
    %4 = arith.andi %2, %3 : vector<128x1xi32>
    %c0_i32 = arith.constant 0 : i32
    %5 = vector.broadcast %c0_i32 : i32 to vector<128x1xi32>
    %6 = arith.cmpi ne, %4, %5 : vector<128x1xi32>
    %c1_i32 = arith.constant 1 : i32
    %7 = tpu.dynamic_rotate %1 by %c1_i32 dim 0 : vector<128x128xf32>, i32 -> vector<128x128xf32>
    %cst = arith.constant 0.000000e+00 : f32
    %8 = vector.shape_cast %6 : vector<128x1xi1> to vector<128x1xi1>
    %9 = vector.broadcast %8 : vector<128x1xi1> to vector<128x128xi1>
    %10 = vector.broadcast %cst : f32 to vector<128x128xf32>
    %11 = arith.select %9, %7, %10 : vector<128x128xi1>, vector<128x128xf32>
    %c15_i32_2 = arith.constant 15 : i32
    %12 = vector.broadcast %c15_i32_2 : i32 to vector<128x1xi32>
    %13 = arith.cmpi ne, %4, %12 : vector<128x1xi32>
    %c127_i32 = arith.constant 127 : i32
    %14 = tpu.dynamic_rotate %0 by %c127_i32 dim 0 : vector<128x128xf32>, i32 -> vector<128x128xf32>
    %cst_3 = arith.constant 0.000000e+00 : f32
    %15 = vector.shape_cast %13 : vector<128x1xi1> to vector<128x1xi1>
    %16 = vector.broadcast %15 : vector<128x1xi1> to vector<128x128xi1>
    %17 = vector.broadcast %cst_3 : f32 to vector<128x128xf32>
    %18 = arith.select %16, %14, %17 : vector<128x128xi1>, vector<128x128xf32>
    %19 = tpu.concatenate %11, %0, %1, %18 in 1 : vector<128x128xf32>, vector<128x128xf32>, vector<128x128xf32>, vector<128x128xf32> -> vector<128x512xf32>
    %c0_4 = arith.constant 0 : index
    %c0_5 = arith.constant 0 : index
    %20 = vector.load %arg2[%c0_4, %c0_5] : memref<512x128xf32, #tpu.memory_space<vmem>>, vector<512x128xf32>
    %cst_6 = arith.constant dense<0.000000e+00> : vector<128x128xf32>
    %21 = tpu.matmul %19, %20, %cst_6 {dimension_numbers = #tpu.dot_dimension_numbers<[1], [0], [0], [1], [0, 0, 1, 1], [], []>} : vector<128x512xf32>, vector<512x128xf32>, vector<128x128xf32> -> vector<128x128xf32>
    %c0_7 = arith.constant 0 : index
    %c0_8 = arith.constant 0 : index
    %22 = vector.load %arg7[%c0_7, %c0_8] : memref<1x128xf32, #tpu.memory_space<vmem>>, vector<1x128xf32>
    %23 = vector.broadcast %22 : vector<1x128xf32> to vector<128x128xf32>
    %24 = arith.addf %21, %23 : vector<128x128xf32>
    %cst_9 = arith.constant 0.000000e+00 : f32
    %25 = vector.broadcast %cst_9 : f32 to vector<128x128xf32>
    %26 = arith.cmpf oge, %24, %25 : vector<128x128xf32>
    %cst_10 = arith.constant 2.000000e-01 : f32
    %27 = vector.broadcast %cst_10 : f32 to vector<128x128xf32>
    %28 = arith.mulf %27, %24 : vector<128x128xf32>
    %29 = arith.select %26, %24, %28 : vector<128x128xi1>, vector<128x128xf32>
    %c0_11 = arith.constant 0 : index
    %c0_12 = arith.constant 0 : index
    %30 = vector.load %arg13[%c0_11, %c0_12] : memref<128x128xf32, #tpu.memory_space<vmem>>, vector<128x128xf32>
    tpu.vector_store %arg13[%c0_11, %c0_12], %29 {strides = array<i32>} : memref<128x128xf32, #tpu.memory_space<vmem>>, vector<128x128xf32>,
    %c0_13 = arith.constant 0 : index
    %c0_14 = arith.constant 0 : index
    %31 = tpu.strided_load %arg13[%c0_13, %c0_14] {strides = array<i32: 2, 1>} : memref<128x128xf32, #tpu.memory_space<vmem>>, vector<64x128xf32>
    %c1_15 = arith.constant 1 : index
    %c0_16 = arith.constant 0 : index
    %32 = tpu.strided_load %arg13[%c1_15, %c0_16] {strides = array<i32: 2, 1>} : memref<128x128xf32, #tpu.memory_space<vmem>>, vector<64x128xf32>
    %33 = tpu.iota {dimensions = array<i32: 0>} : vector<64x1xi32>
    %c7_i32 = arith.constant 7 : i32
    %34 = vector.broadcast %c7_i32 : i32 to vector<64x1xi32>
    %35 = arith.andi %33, %34 : vector<64x1xi32>
    %c0_i32_17 = arith.constant 0 : i32
    %36 = vector.broadcast %c0_i32_17 : i32 to vector<64x1xi32>
    %37 = arith.cmpi ne, %35, %36 : vector<64x1xi32>
    %c1_i32_18 = arith.constant 1 : i32
    %38 = tpu.dynamic_rotate %32 by %c1_i32_18 dim 0 : vector<64x128xf32>, i32 -> vector<64x128xf32>
    %cst_19 = arith.constant 0.000000e+00 : f32
    %39 = vector.shape_cast %37 : vector<64x1xi1> to vector<64x1xi1>
    %40 = vector.broadcast %39 : vector<64x1xi1> to vector<64x128xi1>
    %41 = vector.broadcast %cst_19 : f32 to vector<64x128xf32>
    %42 = arith.select %40, %38, %41 : vector<64x128xi1>, vector<64x128xf32>
    %c7_i32_20 = arith.constant 7 : i32
    %43 = vector.broadcast %c7_i32_20 : i32 to vector<64x1xi32>
    %44 = arith.cmpi ne, %35, %43 : vector<64x1xi32>
    %c63_i32 = arith.constant 63 : i32
    %45 = tpu.dynamic_rotate %31 by %c63_i32 dim 0 : vector<64x128xf32>, i32 -> vector<64x128xf32>
    %cst_21 = arith.constant 0.000000e+00 : f32
    %46 = vector.shape_cast %44 : vector<64x1xi1> to vector<64x1xi1>
    %47 = vector.broadcast %46 : vector<64x1xi1> to vector<64x128xi1>
    %48 = vector.broadcast %cst_21 : f32 to vector<64x128xf32>
    %49 = arith.select %47, %45, %48 : vector<64x128xi1>, vector<64x128xf32>
    %50 = tpu.concatenate %42, %31, %32, %49 in 1 : vector<64x128xf32>, vector<64x128xf32>, vector<64x128xf32>, vector<64x128xf32> -> vector<64x512xf32>
    %c0_22 = arith.constant 0 : index
    %c0_23 = arith.constant 0 : index
    %51 = vector.load %arg3[%c0_22, %c0_23] : memref<512x128xf32, #tpu.memory_space<vmem>>, vector<512x128xf32>
    %cst_24 = arith.constant dense<0.000000e+00> : vector<64x128xf32>
    %52 = tpu.matmul %50, %51, %cst_24 {dimension_numbers = #tpu.dot_dimension_numbers<[1], [0], [0], [1], [0, 0, 1, 1], [], []>} : vector<64x512xf32>, vector<512x128xf32>, vector<64x128xf32> -> vector<64x128xf32>
    %c0_25 = arith.constant 0 : index
    %c0_26 = arith.constant 0 : index
    %53 = vector.load %arg8[%c0_25, %c0_26] : memref<1x128xf32, #tpu.memory_space<vmem>>, vector<1x128xf32>
    %54 = vector.broadcast %53 : vector<1x128xf32> to vector<64x128xf32>
    %55 = arith.addf %52, %54 : vector<64x128xf32>
    %cst_27 = arith.constant 0.000000e+00 : f32
    %56 = vector.broadcast %cst_27 : f32 to vector<64x128xf32>
    %57 = arith.cmpf oge, %55, %56 : vector<64x128xf32>
    %cst_28 = arith.constant 2.000000e-01 : f32
    %58 = vector.broadcast %cst_28 : f32 to vector<64x128xf32>
    %59 = arith.mulf %58, %55 : vector<64x128xf32>
    %60 = arith.select %57, %55, %59 : vector<64x128xi1>, vector<64x128xf32>
    %c0_29 = arith.constant 0 : index
    %c0_30 = arith.constant 0 : index
    %61 = vector.load %arg14[%c0_29, %c0_30] : memref<64x128xf32, #tpu.memory_space<vmem>>, vector<64x128xf32>
    tpu.vector_store %arg14[%c0_29, %c0_30], %60 {strides = array<i32>} : memref<64x128xf32, #tpu.memory_space<vmem>>, vector<64x128xf32>,
    %c0_31 = arith.constant 0 : index
    %c0_32 = arith.constant 0 : index
    %62 = tpu.strided_load %arg14[%c0_31, %c0_32] {strides = array<i32: 2, 1>} : memref<64x128xf32, #tpu.memory_space<vmem>>, vector<32x128xf32>
    %c1_33 = arith.constant 1 : index
    %c0_34 = arith.constant 0 : index
    %63 = tpu.strided_load %arg14[%c1_33, %c0_34] {strides = array<i32: 2, 1>} : memref<64x128xf32, #tpu.memory_space<vmem>>, vector<32x128xf32>
    %64 = tpu.iota {dimensions = array<i32: 0>} : vector<32x1xi32>
    %c3_i32 = arith.constant 3 : i32
    %65 = vector.broadcast %c3_i32 : i32 to vector<32x1xi32>
    %66 = arith.andi %64, %65 : vector<32x1xi32>
    %c0_i32_35 = arith.constant 0 : i32
    %67 = vector.broadcast %c0_i32_35 : i32 to vector<32x1xi32>
    %68 = arith.cmpi ne, %66, %67 : vector<32x1xi32>
    %c1_i32_36 = arith.constant 1 : i32
    %69 = tpu.dynamic_rotate %63 by %c1_i32_36 dim 0 : vector<32x128xf32>, i32 -> vector<32x128xf32>
    %cst_37 = arith.constant 0.000000e+00 : f32
    %70 = vector.shape_cast %68 : vector<32x1xi1> to vector<32x1xi1>
    %71 = vector.broadcast %70 : vector<32x1xi1> to vector<32x128xi1>
    %72 = vector.broadcast %cst_37 : f32 to vector<32x128xf32>
    %73 = arith.select %71, %69, %72 : vector<32x128xi1>, vector<32x128xf32>
    %c3_i32_38 = arith.constant 3 : i32
    %74 = vector.broadcast %c3_i32_38 : i32 to vector<32x1xi32>
    %75 = arith.cmpi ne, %66, %74 : vector<32x1xi32>
    %c31_i32 = arith.constant 31 : i32
    %76 = tpu.dynamic_rotate %62 by %c31_i32 dim 0 : vector<32x128xf32>, i32 -> vector<32x128xf32>
    %cst_39 = arith.constant 0.000000e+00 : f32
    %77 = vector.shape_cast %75 : vector<32x1xi1> to vector<32x1xi1>
    %78 = vector.broadcast %77 : vector<32x1xi1> to vector<32x128xi1>
    %79 = vector.broadcast %cst_39 : f32 to vector<32x128xf32>
    %80 = arith.select %78, %76, %79 : vector<32x128xi1>, vector<32x128xf32>
    %81 = tpu.concatenate %73, %62, %63, %80 in 1 : vector<32x128xf32>, vector<32x128xf32>, vector<32x128xf32>, vector<32x128xf32> -> vector<32x512xf32>
    %c0_40 = arith.constant 0 : index
    %c0_41 = arith.constant 0 : index
    %82 = vector.load %arg4[%c0_40, %c0_41] : memref<512x128xf32, #tpu.memory_space<vmem>>, vector<512x128xf32>
    %cst_42 = arith.constant dense<0.000000e+00> : vector<32x128xf32>
    %83 = tpu.matmul %81, %82, %cst_42 {dimension_numbers = #tpu.dot_dimension_numbers<[1], [0], [0], [1], [0, 0, 1, 1], [], []>} : vector<32x512xf32>, vector<512x128xf32>, vector<32x128xf32> -> vector<32x128xf32>
    %c0_43 = arith.constant 0 : index
    %c0_44 = arith.constant 0 : index
    %84 = vector.load %arg9[%c0_43, %c0_44] : memref<1x128xf32, #tpu.memory_space<vmem>>, vector<1x128xf32>
    %85 = vector.broadcast %84 : vector<1x128xf32> to vector<32x128xf32>
    %86 = arith.addf %83, %85 : vector<32x128xf32>
    %cst_45 = arith.constant 0.000000e+00 : f32
    %87 = vector.broadcast %cst_45 : f32 to vector<32x128xf32>
    %88 = arith.cmpf oge, %86, %87 : vector<32x128xf32>
    %cst_46 = arith.constant 2.000000e-01 : f32
    %89 = vector.broadcast %cst_46 : f32 to vector<32x128xf32>
    %90 = arith.mulf %89, %86 : vector<32x128xf32>
    %91 = arith.select %88, %86, %90 : vector<32x128xi1>, vector<32x128xf32>
    %c0_47 = arith.constant 0 : index
    %c0_48 = arith.constant 0 : index
    %92 = vector.load %arg13[%c0_47, %c0_48] : memref<128x128xf32, #tpu.memory_space<vmem>>, vector<32x128xf32>
    tpu.vector_store %arg13[%c0_47, %c0_48], %91 {strides = array<i32>} : memref<128x128xf32, #tpu.memory_space<vmem>>, vector<32x128xf32>,
    %c0_49 = arith.constant 0 : index
    %c0_50 = arith.constant 0 : index
    %93 = tpu.strided_load %arg13[%c0_49, %c0_50] {strides = array<i32: 2, 1>} : memref<128x128xf32, #tpu.memory_space<vmem>>, vector<16x128xf32>
    %c1_51 = arith.constant 1 : index
    %c0_52 = arith.constant 0 : index
    %94 = tpu.strided_load %arg13[%c1_51, %c0_52] {strides = array<i32: 2, 1>} : memref<128x128xf32, #tpu.memory_space<vmem>>, vector<16x128xf32>
    %95 = tpu.iota {dimensions = array<i32: 0>} : vector<16x1xi32>
    %c1_i32_53 = arith.constant 1 : i32
    %96 = vector.broadcast %c1_i32_53 : i32 to vector<16x1xi32>
    %97 = arith.andi %95, %96 : vector<16x1xi32>
    %c0_i32_54 = arith.constant 0 : i32
    %98 = vector.broadcast %c0_i32_54 : i32 to vector<16x1xi32>
    %99 = arith.cmpi ne, %97, %98 : vector<16x1xi32>
    %c1_i32_55 = arith.constant 1 : i32
    %100 = tpu.dynamic_rotate %94 by %c1_i32_55 dim 0 : vector<16x128xf32>, i32 -> vector<16x128xf32>
    %cst_56 = arith.constant 0.000000e+00 : f32
    %101 = vector.shape_cast %99 : vector<16x1xi1> to vector<16x1xi1>
    %102 = vector.broadcast %101 : vector<16x1xi1> to vector<16x128xi1>
    %103 = vector.broadcast %cst_56 : f32 to vector<16x128xf32>
    %104 = arith.select %102, %100, %103 : vector<16x128xi1>, vector<16x128xf32>
    %c1_i32_57 = arith.constant 1 : i32
    %105 = vector.broadcast %c1_i32_57 : i32 to vector<16x1xi32>
    %106 = arith.cmpi ne, %97, %105 : vector<16x1xi32>
    %c15_i32_58 = arith.constant 15 : i32
    %107 = tpu.dynamic_rotate %93 by %c15_i32_58 dim 0 : vector<16x128xf32>, i32 -> vector<16x128xf32>
    %cst_59 = arith.constant 0.000000e+00 : f32
    %108 = vector.shape_cast %106 : vector<16x1xi1> to vector<16x1xi1>
    %109 = vector.broadcast %108 : vector<16x1xi1> to vector<16x128xi1>
    %110 = vector.broadcast %cst_59 : f32 to vector<16x128xf32>
    %111 = arith.select %109, %107, %110 : vector<16x128xi1>, vector<16x128xf32>
    %112 = tpu.concatenate %104, %93, %94, %111 in 1 : vector<16x128xf32>, vector<16x128xf32>, vector<16x128xf32>, vector<16x128xf32> -> vector<16x512xf32>
    %c0_60 = arith.constant 0 : index
    %c0_61 = arith.constant 0 : index
    %113 = vector.load %arg5[%c0_60, %c0_61] : memref<512x128xf32, #tpu.memory_space<vmem>>, vector<512x128xf32>
    %cst_62 = arith.constant dense<0.000000e+00> : vector<16x128xf32>
    %114 = tpu.matmul %112, %113, %cst_62 {dimension_numbers = #tpu.dot_dimension_numbers<[1], [0], [0], [1], [0, 0, 1, 1], [], []>} : vector<16x512xf32>, vector<512x128xf32>, vector<16x128xf32> -> vector<16x128xf32>
    %c0_63 = arith.constant 0 : index
    %c0_64 = arith.constant 0 : index
    %115 = vector.load %arg10[%c0_63, %c0_64] : memref<1x128xf32, #tpu.memory_space<vmem>>, vector<1x128xf32>
    %116 = vector.broadcast %115 : vector<1x128xf32> to vector<16x128xf32>
    %117 = arith.addf %114, %116 : vector<16x128xf32>
    %cst_65 = arith.constant 0.000000e+00 : f32
    %118 = vector.broadcast %cst_65 : f32 to vector<16x128xf32>
    %119 = arith.cmpf oge, %117, %118 : vector<16x128xf32>
    %cst_66 = arith.constant 2.000000e-01 : f32
    %120 = vector.broadcast %cst_66 : f32 to vector<16x128xf32>
    %121 = arith.mulf %120, %117 : vector<16x128xf32>
    %122 = arith.select %119, %117, %121 : vector<16x128xi1>, vector<16x128xf32>
    %c0_67 = arith.constant 0 : index
    %c0_68 = arith.constant 0 : index
    %123 = vector.load %arg14[%c0_67, %c0_68] : memref<64x128xf32, #tpu.memory_space<vmem>>, vector<16x128xf32>
    tpu.vector_store %arg14[%c0_67, %c0_68], %122 {strides = array<i32>} : memref<64x128xf32, #tpu.memory_space<vmem>>, vector<16x128xf32>,
    %c0_69 = arith.constant 0 : index
    %c0_70 = arith.constant 0 : index
    %124 = tpu.strided_load %arg14[%c0_69, %c0_70] {strides = array<i32: 2, 1>} : memref<64x128xf32, #tpu.memory_space<vmem>>, vector<8x128xf32>
    %c1_71 = arith.constant 1 : index
    %c0_72 = arith.constant 0 : index
    %125 = tpu.strided_load %arg14[%c1_71, %c0_72] {strides = array<i32: 2, 1>} : memref<64x128xf32, #tpu.memory_space<vmem>>, vector<8x128xf32>
    %cst_73 = arith.constant 0.000000e+00 : f32
    %126 = vector.broadcast %cst_73 : f32 to vector<8x128xf32>
    %cst_74 = arith.constant 0.000000e+00 : f32
    %127 = vector.broadcast %cst_74 : f32 to vector<8x128xf32>
    %128 = tpu.concatenate %126, %124, %125, %127 in 1 : vector<8x128xf32>, vector<8x128xf32>, vector<8x128xf32>, vector<8x128xf32> -> vector<8x512xf32>
    %c0_75 = arith.constant 0 : index
    %c0_76 = arith.constant 0 : index
    %129 = vector.load %arg6[%c0_75, %c0_76] : memref<512x128xf32, #tpu.memory_space<vmem>>, vector<512x128xf32>
    %cst_77 = arith.constant dense<0.000000e+00> : vector<8x128xf32>
    %130 = tpu.matmul %128, %129, %cst_77 {dimension_numbers = #tpu.dot_dimension_numbers<[1], [0], [0], [1], [0, 0, 1, 1], [], []>} : vector<8x512xf32>, vector<512x128xf32>, vector<8x128xf32> -> vector<8x128xf32>
    %c0_78 = arith.constant 0 : index
    %c0_79 = arith.constant 0 : index
    %131 = vector.load %arg11[%c0_78, %c0_79] : memref<1x128xf32, #tpu.memory_space<vmem>>, vector<1x128xf32>
    %132 = vector.broadcast %131 : vector<1x128xf32> to vector<8x128xf32>
    %133 = arith.addf %130, %132 : vector<8x128xf32>
    %c0_80 = arith.constant 0 : index
    %c0_81 = arith.constant 0 : index
    %134 = vector.load %arg12[%c0_80, %c0_81] : memref<8x128xf32, #tpu.memory_space<vmem>>, vector<8x128xf32>
    tpu.vector_store %arg12[%c0_80, %c0_81], %133 {strides = array<i32>} : memref<8x128xf32, #tpu.memory_space<vmem>>, vector<8x128xf32>,
    return
  }
  func.func @transform_0(%arg0: i32) -> (i32, i32) {
    %c0_i32 = arith.constant 0 : i32
    %c0_i32_0 = arith.constant 0 : i32
    return %arg0, %c0_i32 : i32, i32
  }
  func.func @transform_1(%arg0: i32) -> (i32, i32) {
    %c0_i32 = arith.constant 0 : i32
    %c0_i32_0 = arith.constant 0 : i32
    %c0_i32_1 = arith.constant 0 : i32
    return %c0_i32, %c0_i32_0 : i32, i32
  }
  func.func @transform_2(%arg0: i32) -> (i32, i32) {
    %c0_i32 = arith.constant 0 : i32
    %c0_i32_0 = arith.constant 0 : i32
    %c0_i32_1 = arith.constant 0 : i32
    return %c0_i32, %c0_i32_0 : i32, i32
  }
  func.func @transform_3(%arg0: i32) -> (i32, i32) {
    %c0_i32 = arith.constant 0 : i32
    %c0_i32_0 = arith.constant 0 : i32
    %c0_i32_1 = arith.constant 0 : i32
    return %c0_i32, %c0_i32_0 : i32, i32
  }
  func.func @transform_4(%arg0: i32) -> (i32, i32) {
    %c0_i32 = arith.constant 0 : i32
    %c0_i32_0 = arith.constant 0 : i32
    %c0_i32_1 = arith.constant 0 : i32
    return %c0_i32, %c0_i32_0 : i32, i32
  }
  func.func @transform_5(%arg0: i32) -> (i32, i32) {
    %c0_i32 = arith.constant 0 : i32
    %c0_i32_0 = arith.constant 0 : i32
    %c0_i32_1 = arith.constant 0 : i32
    return %c0_i32, %c0_i32_0 : i32, i32
  }
  func.func @transform_6(%arg0: i32) -> (i32, i32) {
    %c0_i32 = arith.constant 0 : i32
    %c0_i32_0 = arith.constant 0 : i32
    %c0_i32_1 = arith.constant 0 : i32
    return %c0_i32, %c0_i32_0 : i32, i32
  }
  func.func @transform_7(%arg0: i32) -> (i32, i32) {
    %c0_i32 = arith.constant 0 : i32
    %c0_i32_0 = arith.constant 0 : i32
    %c0_i32_1 = arith.constant 0 : i32
    return %c0_i32, %c0_i32_0 : i32, i32
  }
  func.func @transform_8(%arg0: i32) -> (i32, i32) {
    %c0_i32 = arith.constant 0 : i32
    %c0_i32_0 = arith.constant 0 : i32
    %c0_i32_1 = arith.constant 0 : i32
    return %c0_i32, %c0_i32_0 : i32, i32
  }
  func.func @transform_9(%arg0: i32) -> (i32, i32) {
    %c0_i32 = arith.constant 0 : i32
    %c0_i32_0 = arith.constant 0 : i32
    %c0_i32_1 = arith.constant 0 : i32
    return %c0_i32, %c0_i32_0 : i32, i32
  }
  func.func @transform_10(%arg0: i32) -> (i32, i32) {
    %c0_i32 = arith.constant 0 : i32
    %c0_i32_0 = arith.constant 0 : i32
    %c0_i32_1 = arith.constant 0 : i32
    return %c0_i32, %c0_i32_0 : i32, i32
  }
  func.func @transform_11(%arg0: i32) -> (i32, i32) {
    %c0_i32 = arith.constant 0 : i32
    %c0_i32_0 = arith.constant 0 : i32
    return %arg0, %c0_i32 : i32, i32
  }
}

</mosaic_0001>

<bundles_post_ra>
// kernel: tpu_custom_call.1
= control target key start
LH: loop header
LB: loop body
LE: loop exit
PB: predicated region body
PF: predicated region fallthrough
CT: control target
= control target key end

     0   :  { %s4600_s0 = inlined_call_operand.hbm [shape: f32[512,128], index: 0, kind: input, shape index: {}]   ;;  %s4601_s1 = inlined_call_operand.hbm [shape: f32[512,128], index: 1, kind: input, shape index: {}]   ;;  %s4602_s2 = inlined_call_operand.hbm [shape: f32[512,128], index: 2, kind: input, shape index: {}]   ;;  %s4603_s3 = inlined_call_operand.hbm [shape: f32[512,128], index: 3, kind: input, shape index: {}]   ;;  %s4604_s4 = inlined_call_operand.hbm [shape: f32[512,128], index: 4, kind: input, shape index: {}]   ;;  %s4605_s5 = inlined_call_operand.hbm [shape: f32[512,128], index: 5, kind: input, shape index: {}]   ;;  %s4606_s6 = inlined_call_operand.vmem [shape: f32[1,128], index: 6, kind: input, shape index: {}]   ;;  %s4607_s7 = inlined_call_operand.vmem [shape: f32[1,128], index: 7, kind: input, shape index: {}]   ;;  %s4608_s8 = inlined_call_operand.vmem [shape: f32[1,128], index: 8, kind: input, shape index: {}]   ;;  %s4609_s9 = inlined_call_operand.vmem [shape: f32[1,128], index: 9, kind: input, shape index: {}]   ;;  %s4610_s10 = inlined_call_operand.vmem [shape: f32[1,128], index: 10, kind: input, shape index: {}]   ;;  %s4611_s11 = inlined_call_operand.hbm [shape: f32[16,128], index: 11, kind: output, shape index: {}]  }
   0x1   :  { %4617 = sst [smem:[#allocation21_spill]] %s4601_s1 }
   0x2   :  { %4618 = sst [smem:[#allocation22_spill]] %s4609_s9 }
   0x3   :  { %4619 = sst [smem:[#allocation23_spill]] %s4610_s10 }
   0x4   :  { %4620 = sst [smem:[#allocation24_spill]] %s4611_s11 }
   0x5   :  { %16 = vsyncpa [#allocation5], 0 }
   0x6   :  { %18 = vsyncpa [#allocation5 + $0x1], 0 }
   0x7   :  { %19 = vsyncpa [#allocation8], 0 }
   0x8   :  { %20 = vsyncpa [#allocation11], 0 }
   0x9   :  { %21 = vsyncpa [#allocation14], 0 }
   0xa   :  { %22 = vsyncpa [#allocation6], 0 }
   0xb   :  { %24 = vsyncpa [#allocation6 + $0x1], 0  ;;  %s3922_s17 = smov 0   ;;  %s3924_s18 = smov 0  }
   0xc   :  { %s3926_s19 = smov 0   ;;  %s3928_s20 = smov 0  }
   0xd LB: > { %s3852_s21 = smov [#allocation7]   ;;  %s3943_s23 = sadd.s32 4294967295, %s3850_s20   ;;  %s3850_s20 = sphi %s3928_s20, %s4653_s20   ;;  %s3846_s19 = sphi %s3926_s19, %s4652_s19   ;;  %s3842_s18 = sphi %s3924_s18, %s4651_s18   ;;  %s3838_s17 = sphi %s3922_s17, %s4650_s17  }
   0xe   : > { %s309_s22 = sshll.u32 %s3852_s21, 4  ;;  %p2573_p0 = scmp.ge.s32.totalorder %s3850_s20, 1  ;;  %s3948_s22 = int_to_ptr.vmem [resolvable:$true] %s309_s22 }
   0xf   : > { %p4613_p1 = scmp.eq.s32.totalorder %s3943_s23, 0  ;;  %p297_p2 = scmp.lt.s32.totalorder %s3850_s20, 3 }
  0x10   : > { %s3853_s25 = smov [#allocation10]   ;;  %s3854_s28 = smov [#allocation9]  }
  0x11   : > { %p3950_p3 = pnand %p2573_p0, %p297_p2  ;;  %s335_s26 = sshll.u32 %s3853_s25, 4  ;;  %s3963_s26 = int_to_ptr.vmem [resolvable:$true] %s335_s26 }
  0x12   : > { %s322_s29 = sshll.u32 %s3854_s28, 4  ;;  %s4623_s1 = sld [smem:[#allocation21_spill]]  ;;  %s3965_s29 = int_to_ptr.vmem [resolvable:$true] %s322_s29 }
  0x13   : > { %s4621_s24 = scalar_select %p3950_p3, 1, 0 }
  0x14   : > { %p3526_p5 = pneg %p3950_p3 }
  0x16   : > { %p3959_p6 = pnand %p3526_p5, %p4613_p1 }
  0x18   : > { %s3602_s13 = scalar_lea.hbm %s4623_s1, 8192  ;;  %p3975_p8 = pneg %p3959_p6 }
  0x19   : > { %p3603_p7 = scmp.ne.s32.totalorder %s4623_s1, %s3602_s13  ;;  %p3609_p11 = scmp.lt.u32.totalorder %s3602_s13, %s4623_s1 }
  0x1b   : > { %p3605_p9 = pnand %p3975_p8, %p3603_p7 }
  0x1d   : > { %p3606_p10 = pneg %p3605_p9 }
  0x1f   : > { %p3611_p12 = pnand %p3609_p11, %p3606_p10 }
  0x21   : > { %3614 = shalt.err (!%p3611_p12)
}
  0x22   : > { %s3615_s28 = scalar_lea.vmem %s3948_s22, 8192  ;;  %p3623_p5 = scmp.lt.s32.totalorder %s3948_s22, %s3948_s22 }
  0x23   : > { %p3616_p13 = scmp.ne.s32.totalorder %s3948_s22, %s3615_s28  ;;  %p3624_p4 = scmp.lt.s32.totalorder %s3615_s28, %s3615_s28 }
  0x25   : > { %p3618_p0 = pnand %p3616_p13, %p3975_p8  ;;  %p3625_p7 = por %p3624_p4, %p3623_p5 }
  0x27   : > { %p3619_p2 = pneg %p3618_p0 }
  0x29   : > { %p3626_p9 = pnand %p3625_p7, %p3619_p2 }
  0x2b   : > { %3629 = shalt.err (!%p3626_p9)
}
  0x2c   : > { %s4615_s30 = smov 128   ;;  %s3856_s12 = smov 8  }
  0x2d   : > { %3529 = dma.hbm_to_vmem [thread:$0]  (!%p3959_p6), %s4623_s1, 8192, %s3948_s22, [#allocation8], %s4615_s30, %s4615_s30, %s3856_s12  }
  0x2e   : > { %s3630_s25 = scalar_lea.hbm %s4603_s3, 8192 }
  0x2f   : > { %p3631_p4 = scmp.ne.s32.totalorder %s4603_s3, %s3630_s25  ;;  %p3637_p12 = scmp.lt.u32.totalorder %s3630_s25, %s4603_s3 }
  0x31   : > { %p3633_p10 = pnand %p3631_p4, %p3975_p8 }
  0x33   : > { %p3634_p11 = pneg %p3633_p10 }
  0x35   : > { %p3639_p13 = pnand %p3637_p12, %p3634_p11 }
  0x37   : > { %3642 = shalt.err (!%p3639_p13)
}
  0x38   : > { %s3643_s22 = scalar_lea.vmem %s3963_s26, 8192  ;;  %p3651_p7 = scmp.lt.s32.totalorder %s3963_s26, %s3963_s26 }
  0x39   : > { %p3644_p0 = scmp.ne.s32.totalorder %s3963_s26, %s3643_s22  ;;  %p3652_p9 = scmp.lt.s32.totalorder %s3643_s22, %s3643_s22 }
  0x3b   : > { %p3646_p2 = pnand %p3644_p0, %p3975_p8  ;;  %p3653_p4 = por %p3652_p9, %p3651_p7 }
  0x3d   : > { %p3647_p5 = pneg %p3646_p2 }
  0x3f   : > { %p3654_p10 = pnand %p3653_p4, %p3647_p5 }
  0x41   : > { %3657 = shalt.err (!%p3654_p10)
}
  0x42   : > { %3535 = dma.hbm_to_vmem [thread:$0]  (!%p3959_p6), %s4603_s3, 8192, %s3963_s26, [#allocation11], %s4615_s30, %s4615_s30, %s3856_s12  }
  0x43   : > { %s3658_s14 = scalar_lea.hbm %s4602_s2, 8192 }
  0x44   : > { %p3659_p11 = scmp.ne.s32.totalorder %s4602_s2, %s3658_s14  ;;  %p3665_p0 = scmp.lt.u32.totalorder %s3658_s14, %s4602_s2 }
  0x46   : > { %p3661_p12 = pnand %p3659_p11, %p3975_p8 }
  0x48   : > { %p3662_p13 = pneg %p3661_p12 }
  0x4a   : > { %p3667_p2 = pnand %p3665_p0, %p3662_p13 }
  0x4c   : > { %3670 = shalt.err (!%p3667_p2)
}
  0x4d   : > { %s3671_s26 = scalar_lea.vmem %s3965_s29, 8192  ;;  %p3679_p4 = scmp.lt.s32.totalorder %s3965_s29, %s3965_s29 }
  0x4e   : > { %p3672_p5 = scmp.ne.s32.totalorder %s3965_s29, %s3671_s26  ;;  %p3680_p10 = scmp.lt.s32.totalorder %s3671_s26, %s3671_s26 }
  0x50   : > { %p3674_p7 = pnand %p3672_p5, %p3975_p8  ;;  %p3681_p11 = por %p3680_p10, %p3679_p4 }
  0x52   : > { %p3675_p9 = pneg %p3674_p7 }
  0x54   : > { %p3682_p12 = pnand %p3681_p11, %p3675_p9 }
  0x56   : > { %3685 = shalt.err (!%p3682_p12)
}
  0x57   : > { %3532 = dma.hbm_to_vmem [thread:$0]  (!%p3959_p6), %s4602_s2, 8192, %s3965_s29, [#allocation8], %s4615_s30, %s4615_s30, %s3856_s12  }
  0x58   : > { %s3857_s10 = smov [#allocation12]   ;;  %s3858_s13 = smov [#allocation13]  }
  0x59   : > { %s348_s11 = sshll.u32 %s3857_s10, 4  ;;  %s361_s14 = sshll.u32 %s3858_s13, 4  ;;  %s349_s11 = int_to_ptr.vmem [resolvable:$true] %s348_s11  ;;  %s362_s14 = int_to_ptr.vmem [resolvable:$true] %s361_s14 }
  0x5a   : > { %s3686_s25 = scalar_lea.hbm %s4604_s4, 8192 }
  0x5b   : > { %p3687_p13 = scmp.ne.s32.totalorder %s4604_s4, %s3686_s25  ;;  %p3693_p5 = scmp.lt.u32.totalorder %s3686_s25, %s4604_s4 }
  0x5d   : > { %p3689_p0 = pnand %p3687_p13, %p3975_p8 }
  0x5f   : > { %p3690_p2 = pneg %p3689_p0 }
  0x61   : > { %p3695_p7 = pnand %p3693_p5, %p3690_p2 }
  0x63   : > { %3698 = shalt.err (!%p3695_p7)
}
  0x64   : > { %s3699_s29 = scalar_lea.vmem %s349_s11, 8192  ;;  %p3707_p11 = scmp.lt.s32.totalorder %s349_s11, %s349_s11 }
  0x65   : > { %p3700_p9 = scmp.ne.s32.totalorder %s349_s11, %s3699_s29  ;;  %p3708_p12 = scmp.lt.s32.totalorder %s3699_s29, %s3699_s29 }
  0x67   : > { %p3702_p4 = pnand %p3700_p9, %p3975_p8  ;;  %p3709_p1 = por %p3708_p12, %p3707_p11 }
  0x69   : > { %p3703_p10 = pneg %p3702_p4 }
  0x6b   : > { %p3710_p3 = pnand %p3709_p1, %p3703_p10 }
  0x6d   : > { %3713 = shalt.err (!%p3710_p3)
}
  0x6e   : > { %3538 = dma.hbm_to_vmem [thread:$0]  (!%p3959_p6), %s4604_s4, 8192, %s349_s11, [#allocation11], %s4615_s30, %s4615_s30, %s3856_s12  }
  0x6f   : > { %s3714_s15 = scalar_lea.hbm %s4605_s5, 8192 }
  0x70   : > { %p3715_p1 = scmp.ne.s32.totalorder %s4605_s5, %s3714_s15  ;;  %p3721_p0 = scmp.lt.u32.totalorder %s3714_s15, %s4605_s5 }
  0x72   : > { %p3717_p3 = pnand %p3715_p1, %p3975_p8 }
  0x74   : > { %p3718_p13 = pneg %p3717_p3 }
  0x76   : > { %p3723_p2 = pnand %p3721_p0, %p3718_p13 }
  0x78   : > { %3726 = shalt.err (!%p3723_p2)
}
  0x79   : > { %s3727_s22 = scalar_lea.vmem %s362_s14, 8192  ;;  %p3735_p4 = scmp.lt.s32.totalorder %s362_s14, %s362_s14 }
  0x7a   : > { %p3728_p5 = scmp.ne.s32.totalorder %s362_s14, %s3727_s22  ;;  %p3736_p10 = scmp.lt.s32.totalorder %s3727_s22, %s3727_s22 }
  0x7c   : > { %p3730_p7 = pnand %p3728_p5, %p3975_p8  ;;  %p3737_p11 = por %p3736_p10, %p3735_p4 }
  0x7e   : > { %p3731_p9 = pneg %p3730_p7 }
  0x80   : > { %p3738_p12 = pnand %p3737_p11, %p3731_p9 }
  0x82   : > { %3741 = shalt.err (!%p3738_p12)
}
  0x83   : > { %3541 = dma.hbm_to_vmem [thread:$0]  (!%p3959_p6), %s4605_s5, 8192, %s362_s14, [#allocation14], %s4615_s30, %s4615_s30, %s3856_s12  }
  0x84   : > { %s2572_s27 = sadd.s32 4294967294, %s3850_s20   ;;  %s4095_s16 = sadd.s32 1, %s3850_s20  }
  0x85   : > { %s37_s1 = sadd.s32 1, %s3846_s19  ;;  %s34_s9 = ssub.s32 %s3850_s20, %s4095_s16 }
  0x86   : > { %p44_p8 = scmp.ne.s32.totalorder %s3846_s19, %s3842_s18  ;;  %p35_p1 = scmp.eq.s32.totalorder %s34_s9, 0 }
  0x87   : > { %p45_p3 = scmp.eq.s32.totalorder %s3850_s20, 0  ;;  %p50_p13 = scmp.ne.s32.totalorder %s3842_s18, %s3838_s17 }
  0x88   : > { %p284_p0 = scmp.eq.s32.totalorder %s3943_s23, 1  ;;  %p4625_p5 = scmp.eq.s32.totalorder %s3943_s23, 0 }
  0x89   : > { %s4107_s10 = scalar_select %p35_p1, %s3846_s19, %s37_s1  }
  0x8a   : > { %p46_p2 = por %p45_p3, %p44_p8  ;;  %p4111_p7 = por %p4625_p5, %p50_p13 }
  0x8b   : > { %p4115_p6 = por %p284_p0, %p44_p8  ;;  %p290_p9 = scmp.eq.s32.totalorder %s2572_s27, 1 }
  0x8c   : > { %p3555_p4 = scmp.lt.s32.totalorder %s3850_s20, 2  ;;  %s390_s15 = sand.u32 1, %s3846_s19  }
  0x8d   : > { %s4627_s14 = scalar_select %p4115_p6, 1, 0 }
  0x8e   : > { %p4121_p10 = por %p290_p9, %p50_p13  ;;  %s2580_s25 = sshll.u32 %s390_s15, 8 }
  0x8f   : > { %s2675_s28 = sshll.u32 %s3850_s20, 12  ;;  %s394_s29 = scalar_lea.vmem [#allocation4], %s2580_s25 }
  0x90   : > { %s4628_s21 = scalar_select %p4121_p10, 1, 0 }
  0x91   : > { %s4129_s11 = scalar_lea.hbm %s4600_s0, %s2675_s28  ;;  %s401_s1 = sshll.u32 %s394_s29, 4  ;;  %s4135_s1 = int_to_ptr.vmem [resolvable:$true] %s401_s1 }
  0x92   : > { %p4131_p11 = pnand %p3555_p4, %p46_p2  ;;  %s4137_s9 = scalar_lea.sflag [#allocation5], %s390_s15 }
  0x93   : > { %s3742_s30 = scalar_lea.hbm %s4129_s11, 4096  ;;  %s3747_s26 = scalar_lea.hbm %s4600_s0, 8192 }
  0x94   : > { %p3743_p12 = scmp.ne.s32.totalorder %s4129_s11, %s3742_s30  ;;  %p3744_p8 = pneg %p4131_p11 }
  0x95   : > { %p3748_p13 = scmp.lt.u32.totalorder %s4129_s11, %s4600_s0  ;;  %p3749_p0 = scmp.lt.u32.totalorder %s3747_s26, %s3742_s30 }
  0x96   : > { %p3745_p1 = pnand %p3744_p8, %p3743_p12  ;;  %p3751_p5 = scmp.lt.u32.totalorder %s3742_s30, %s4129_s11 }
  0x97   : > { %p3750_p2 = por %p3749_p0, %p3748_p13 }
  0x98   : > { %p3746_p3 = pneg %p3745_p1 }
  0x99   : > { %p3752_p9 = por %p3751_p5, %p3750_p2 }
  0x9b   : > { %p3753_p4 = pnand %p3752_p9, %p3746_p3 }
  0x9d   : > { %3756 = shalt.err (!%p3753_p4)
}
  0x9e   : > { %s3757_s15 = scalar_lea.vmem %s4135_s1, 4096  ;;  %s3859_s25 = smov [#allocation4]  }
  0x9f   : > { %p3758_p12 = scmp.ne.s32.totalorder %s4135_s1, %s3757_s15  ;;  %s3762_s28 = sshll.u32 %s3859_s25, 4  ;;  %s3763_s28 = int_to_ptr.vmem [resolvable:$false] %s3762_s28 }
  0xa0   : > { %s3764_s22 = scalar_lea.vmem %s3763_s28, 8192  ;;  %p3765_p6 = scmp.lt.s32.totalorder %s4135_s1, %s3763_s28 }
  0xa1   : > { %p3760_p1 = pnand %p3758_p12, %p3744_p8  ;;  %p3766_p13 = scmp.lt.s32.totalorder %s3764_s22, %s3757_s15 }
  0xa3   : > { %p3761_p10 = pneg %p3760_p1  ;;  %p3767_p0 = por %p3766_p13, %p3765_p6 }
  0xa5   : > { %p3768_p2 = pnand %p3767_p0, %p3761_p10 }
  0xa7   : > { %3771 = shalt.err (!%p3768_p2)
}
  0xa8   : > { %s4630_s30 = smov 128   ;;  %p4631_p8 = scmp.ne.s32.totalorder %s4621_s24, 0 }
  0xa9   : > { %3545 = dma.hbm_to_vmem [thread:$0]  (!%p4131_p11), %s4129_s11, 4096, %s4135_s1, %s4137_s9, %s4630_s30, %s4630_s30, %s3856_s12  }
  0xaa   : > { %413 = sbr.rel (%p4631_p8) target bundleno = 1490 (0x5d2), region = 64  ;;  %s4171_s26 = sand.u32 (!%p4631_p8), 1, %s3842_s18  }
  0xab   : > { %s2584_s29 = sshll.u32 (!%p4631_p8), %s4171_s26, 8  ;;  %s416_s15 = scalar_lea.sflag (!%p4631_p8), [#allocation5], %s4171_s26 }
  0xac   : > { %s4175_s25 = scalar_lea.vmem (!%p4631_p8), [#allocation4], %s2584_s29 }
  0xb1   : > { %3817 = dma.done.wait (%p4111_p7), %s416_s15, 4096  }
  0xb2   : > { %3819 = vsyncadd (%p4111_p7), %s416_s15, 4294963200  ;;  %p4632_p6 = scmp.eq.s32.totalorder %s3943_s23, 0 }
  0xb4   : > { %3821 = dma.done.wait (%p4632_p6), [#allocation8], 16384   ;;  %p4633_p10 = pmov %p4632_p6 }
  0xb5   : > { %p4634_p11 = pmov %p4632_p6 }
  0xb6   : > { %3823 = vsyncadd (%p4633_p10), [#allocation8], 4294950912 }
  0xb7   : > { %3825 = dma.done.wait (%p4634_p11), [#allocation11], 16384   ;;  %p4635_p3 = pmov %p4632_p6 }
  0xb9   : > { %3827 = vsyncadd (%p4635_p3), [#allocation11], 4294950912  ;;  %p4636_p5 = pmov %p4635_p3 }
  0xba   : > { %p4637_p9 = pmov %p4635_p3 }
  0xbb   : > { %3829 = dma.done.wait (%p4636_p5), [#allocation14], 8192  }
  0xbc   : > { %3831 = vsyncadd (%p4637_p9), [#allocation14], 4294959104  ;;  %v785_v0 = vld [vmem:[#allocation7 + $0x80] sm:$0xff]  ;;  %v786_v1 = vld [vmem:[#allocation7 + $0x88] sm:$0xff]  ;;  %v542_v60 = vlaneseq  ;;  %s4644_s22 = sld [smem:[#allocation22_spill]]  ;;  %s2590_s30 = sshll.u32 %s4171_s26, 3 }
  0xbd   : > { %v769_v2 = vld [vmem:[#allocation7] sm:$0xff]  ;;  %v3182_v3 = vpack.c.bf16 %v786_v1, %v785_v0  ;;  %v770_v4 = vld [vmem:[#allocation7 + $0x8] sm:$0xff]  ;;  %v787_v11 = vld [vmem:[#allocation7 + $0x90] sm:$0xff]  ;;  %s2672_s24 = sshll.u32 %s3943_s23, 7  ;;  %s477_s12 = scalar_lea.vmem [#allocation15], %s2590_s30 }
  0xbe   : > { %v817_v5 = vld [vmem:[#allocation7 + $0x180] sm:$0xff]  ;;  %v818_v6 = vld [vmem:[#allocation7 + $0x188] sm:$0xff]  ;;  %v3184_v7 = vpack.c.bf16 %v770_v4, %v769_v2  ;;  %v788_v13 = vld [vmem:[#allocation7 + $0x98] sm:$0xff]  ;;  %s2454_s13 = sshll.u32 %s477_s12, 4  ;;  %s4646_s27 = sld [smem:[#allocation24_spill]]  ;;  %s4558_s13 = int_to_ptr.vmem [resolvable:$true] %s2454_s13 }
  0xbf   : > { %v3214_v8 = vpack.c.bf16 %v818_v6, %v817_v5  ;;  %v801_v9 = vld [vmem:[#allocation7 + $0x100] sm:$0xff]  ;;  %v802_v10 = vld [vmem:[#allocation7 + $0x108] sm:$0xff]  ;;  %3183 = vmatprep.subr.bf16.mxu0 %v3182_v3  ;;  %v771_v14 = vld [vmem:[#allocation7 + $0x10] sm:$0xff]  ;;  %v3186_v16 = vpack.c.bf16 %v788_v13, %v787_v11  ;;  %s2441_s28 = scalar_lea.sflag [#allocation6], %s4171_s26  ;;  %p4647_p4 = scmp.ne.s32.totalorder %s4627_s14, 0 }
  0xc0   : > { %v3216_v12 = vpack.c.bf16 %v802_v10, %v801_v9  ;;  %v772_v15 = vld [vmem:[#allocation7 + $0x18] sm:$0xff]  ;;  %3185 = vmatpush3.bf16.msra.mxu0 %v3184_v7  ;;  %v819_v18 = vld [vmem:[#allocation7 + $0x190] sm:$0xff]  ;;  %v789_v23 = vld [vmem:[#allocation7 + $0xa0] sm:$0xff]  ;;  %v4193_v9 = vshrl.u32 %v542_v60, 7  ;;  %s3861_s23 = smov [#allocation15]  }
  0xc1   : > { %3215 = vmatprep.subr.bf16.mxu1 %v3214_v8  ;;  %v3188_v17 = vpack.c.bf16 %v772_v15, %v771_v14  ;;  %v820_v19 = vld [vmem:[#allocation7 + $0x198] sm:$0xff]  ;;  %v803_v20 = vld [vmem:[#allocation7 + $0x110] sm:$0xff]  ;;  %v790_v24 = vld [vmem:[#allocation7 + $0xa8] sm:$0xff]  ;;  %3187 = vmatprep.subr.bf16.mxu0 %v3186_v16  ;;  %s3776_s30 = sshll.u32 %s3861_s23, 4  ;;  %s3777_s30 = int_to_ptr.vmem [resolvable:$false] %s3776_s30 }
  0xc2   : > { %3217 = vmatpush3.bf16.msra.mxu1 %v3216_v12  ;;  %v3218_v21 = vpack.c.bf16 %v820_v19, %v819_v18  ;;  %v804_v22 = vld [vmem:[#allocation7 + $0x118] sm:$0xff]  ;;  %v3190_v26 = vpack.c.bf16 %v790_v24, %v789_v23  ;;  %v773_v27 = vld [vmem:[#allocation7 + $0x20] sm:$0xff]  ;;  %v774_v28 = vld [vmem:[#allocation7 + $0x28] sm:$0xff]  ;;  %vm704_vm0 = vcmp.lt.s32.totalorder %v4193_v9, 7  ;;  %vm607_vm1 = vcmp.lt.s32.totalorder %v4193_v9, 1  ;;  %s3778_s29 = scalar_lea.vmem %s3777_s30, 256  ;;  %p3779_p13 = scmp.lt.s32.totalorder %s4558_s13, %s3777_s30 }
  0xc3   : > { %v3220_v25 = vpack.c.bf16 %v804_v22, %v803_v20  ;;  %v821_v29 = vld [vmem:[#allocation7 + $0x1a0] sm:$0xff]  ;;  %v822_v30 = vld [vmem:[#allocation7 + $0x1a8] sm:$0xff]  ;;  %v3192_v33 = vpack.c.bf16 %v774_v28, %v773_v27  ;;  %v791_v35 = vld [vmem:[#allocation7 + $0xb0] sm:$0xff] }
  0xc4   : > { %3219 = vmatprep.subr.bf16.mxu1 %v3218_v21  ;;  %v805_v31 = vld [vmem:[#allocation7 + $0x120] sm:$0xff]  ;;  %v806_v32 = vld [vmem:[#allocation7 + $0x128] sm:$0xff]  ;;  %3189 = vmatpush3.bf16.msra.mxu0 %v3188_v17  ;;  %v3222_v34 = vpack.c.bf16 %v822_v30, %v821_v29  ;;  %v792_v36 = vld [vmem:[#allocation7 + $0xb8] sm:$0xff]  ;;  %s4556_s9 = scalar_lea.hbm %s4646_s27, %s2672_s24 }
  0xc5   : > { %v775_v37 = vld [vmem:[#allocation7 + $0x30] sm:$0xff]  ;;  %3191 = vmatprep.subr.bf16.mxu0 %v3190_v26  ;;  %v3224_v38 = vpack.c.bf16 %v806_v32, %v805_v31  ;;  %v3194_v39 = vpack.c.bf16 %v792_v36, %v791_v35  ;;  %v776_v40 = vld [vmem:[#allocation7 + $0x38] sm:$0xff]  ;;  %v793_v46 = vld [vmem:[#allocation7 + $0xc0] sm:$0xff] }
  0xc6   : > { %3221 = vmatpush3.bf16.msra.mxu1 %v3220_v25  ;;  %v823_v41 = vld [vmem:[#allocation7 + $0x1b0] sm:$0xff]  ;;  %v824_v42 = vld [vmem:[#allocation7 + $0x1b8] sm:$0xff]  ;;  %v794_v47 = vld [vmem:[#allocation7 + $0xc8] sm:$0xff]  ;;  %v3196_v48 = vpack.c.bf16 %v776_v40, %v775_v37 }
  0xc7   : > { %3223 = vmatprep.subr.bf16.mxu1 %v3222_v34  ;;  %v3226_v43 = vpack.c.bf16 %v824_v42, %v823_v41  ;;  %v807_v44 = vld [vmem:[#allocation7 + $0x130] sm:$0xff]  ;;  %v808_v45 = vld [vmem:[#allocation7 + $0x138] sm:$0xff]  ;;  %v825_v49 = vld [vmem:[#allocation7 + $0x1c0] sm:$0xff]  ;;  %v3198_v52 = vpack.c.bf16 %v794_v47, %v793_v46  ;;  %v559_v42 = vand.u32 15, %v4193_v9 }
  0xc8   : > { %3193 = vmatpush3.bf16.msra.mxu0 %v3192_v33  ;;  %v826_v50 = vld [vmem:[#allocation7 + $0x1c8] sm:$0xff]  ;;  %v3228_v51 = vpack.c.bf16 %v808_v45, %v807_v44  ;;  %v777_v53 = vld [vmem:[#allocation7 + $0x40] sm:$0xff]  ;;  %v795_v58 = vld [vmem:[#allocation7 + $0xd0] sm:$0xff] }
  0xc9   : > { %3195 = vmatprep.subr.bf16.mxu0 %v3194_v39  ;;  %v778_v54 = vld [vmem:[#allocation7 + $0x48] sm:$0xff]  ;;  %v809_v55 = vld [vmem:[#allocation7 + $0x140] sm:$0xff]  ;;  %v3230_v56 = vpack.c.bf16 %v826_v50, %v825_v49  ;;  %v796_v59 = vld [vmem:[#allocation7 + $0xd8] sm:$0xff]  ;;  %v4211_v39 = vadd.s32 8, %v4193_v9  ;;  %vm575_vm2 = vcmp.ne.s32.totalorder %v559_v42, 0 }
  0xca   : > { %3225 = vmatpush3.bf16.msra.mxu1 %v3224_v38  ;;  %v810_v57 = vld [vmem:[#allocation7 + $0x148] sm:$0xff]  ;;  %v827_v61 = vld [vmem:[#allocation7 + $0x1d0] sm:$0xff]  ;;  %v828_v62 = vld [vmem:[#allocation7 + $0x1d8] sm:$0xff]  ;;  %v3200_v63 = vpack.c.bf16 %v778_v54, %v777_v53  ;;  %v3202_v1 = vpack.c.bf16 %v796_v59, %v795_v58 }
  0xcb   : > { %3227 = vmatprep.subr.bf16.mxu1 %v3226_v43  ;;  %v3232_v0 = vpack.c.bf16 %v810_v57, %v809_v55  ;;  %v779_v2 = vld [vmem:[#allocation7 + $0x50] sm:$0xff]  ;;  %v780_v3 = vld [vmem:[#allocation7 + $0x58] sm:$0xff]  ;;  %v3234_v5 = vpack.c.bf16 %v828_v62, %v827_v61  ;;  %v797_v7 = vld [vmem:[#allocation7 + $0xe0] sm:$0xff]  ;;  %v560_v47 = vand.u32 15, %v4211_v39 }
  0xcc   : > { %3197 = vmatpush3.bf16.msra.mxu0 %v3196_v48  ;;  %v811_v4 = vld [vmem:[#allocation7 + $0x150] sm:$0xff]  ;;  %v812_v6 = vld [vmem:[#allocation7 + $0x158] sm:$0xff]  ;;  %v798_v8 = vld [vmem:[#allocation7 + $0xe8] sm:$0xff]  ;;  %v3204_v12 = vpack.c.bf16 %v780_v3, %v779_v2 }
  0xcd   : > { %3199 = vmatprep.subr.bf16.mxu0 %v3198_v52  ;;  %v829_v10 = vld [vmem:[#allocation7 + $0x1e0] sm:$0xff]  ;;  %v830_v11 = vld [vmem:[#allocation7 + $0x1e8] sm:$0xff]  ;;  %v3236_v15 = vpack.c.bf16 %v812_v6, %v811_v4  ;;  %v3206_v16 = vpack.c.bf16 %v798_v8, %v797_v7  ;;  %v799_v21 = vld [vmem:[#allocation7 + $0xf0] sm:$0xff]  ;;  %v4225_v52 = vadd.s32 16, %v4193_v9  ;;  %vm673_vm3 = vcmp.ne.s32.totalorder %v560_v47, 15 }
  0xce   : > { %3229 = vmatpush3.bf16.msra.mxu1 %v3228_v51  ;;  %v781_v13 = vld [vmem:[#allocation7 + $0x60] sm:$0xff]  ;;  %v782_v14 = vld [vmem:[#allocation7 + $0x68] sm:$0xff]  ;;  %v3238_v20 = vpack.c.bf16 %v830_v11, %v829_v10  ;;  %v800_v22 = vld [vmem:[#allocation7 + $0xf8] sm:$0xff]  ;;  %v4245_v4 = vadd.s32 32, %v4193_v9  ;;  %v4251_v8 = vadd.s32 40, %v4193_v9 }
  0xcf   : > { %3231 = vmatprep.subr.bf16.mxu1 %v3230_v56  ;;  %v813_v17 = vld [vmem:[#allocation7 + $0x160] sm:$0xff]  ;;  %v814_v18 = vld [vmem:[#allocation7 + $0x168] sm:$0xff]  ;;  %v2591_v24 = vld [vmem:[%s4175_s25 + $0x10] ss:$2 sm:$0xff]  ;;  %v3208_v28 = vpack.c.bf16 %v782_v14, %v781_v13  ;;  %v3210_v31 = vpack.c.bf16 %v800_v22, %v799_v21  ;;  %v4231_v56 = vadd.s32 24, %v4193_v9  ;;  %v561_v59 = vand.u32 15, %v4225_v52 }
  0xd0   : > { %3201 = vmatpush3.bf16.msra.mxu0 %v3200_v63  ;;  %v4196_v19 = vld [vmem:[%s4175_s25] ss:$2 sm:$0xff]  ;;  %v831_v25 = vld [vmem:[#allocation7 + $0x1f0] sm:$0xff]  ;;  %v832_v26 = vld [vmem:[#allocation7 + $0x1f8] sm:$0xff]  ;;  %v689_v27 = vrot.slane %v2591_v24, 1  ;;  %v3240_v30 = vpack.c.bf16 %v814_v18, %v813_v17  ;;  %v4265_v22 = vadd.s32 48, %v4193_v9 }
  0xd1   : > { %3203 = vmatprep.subr.bf16.mxu0 %v3202_v1  ;;  %v688_v23 = vrot.slane %v4196_v19, 1  ;;  %904 = vmatprep.mubr.f32.mxu0 %v4196_v19  ;;  %v783_v29 = vld [vmem:[#allocation7 + $0x70] sm:$0xff]  ;;  %v784_v32 = vld [vmem:[#allocation7 + $0x78] sm:$0xff]  ;;  %v2606_v33 = vld [vmem:[%s4175_s25 + $0x1] ss:$2 sm:$0xff]  ;;  %v3242_v36 = vpack.c.bf16 %v832_v26, %v831_v25  ;;  %v562_v63 = vand.u32 15, %v4231_v56 }
  0xd2   : > { %3233 = vmatpush3.bf16.msra.mxu1 %v3232_v0  ;;  %v4204_v34 = vld [vmem:[%s4175_s25 + $0xf1] ss:$2 sm:$0xff]  ;;  %v2592_v40 = vld [vmem:[%s4175_s25 + $0x20] ss:$2 sm:$0xff]  ;;  %v3212_v41 = vpack.c.bf16 %v784_v32, %v783_v29  ;;  %v591_v43 = vrot.slane %v2606_v33, 7  ;;  %vm577_vm4 = vcmp.ne.s32.totalorder %v561_v59, 0 }
  0xd3   : > { %3235 = vmatprep.subr.bf16.mxu1 %v3234_v5  ;;  %v719_v35 = vsel %vm704_vm0, %v688_v23, %v689_v27  ;;  %v815_v37 = vld [vmem:[#allocation7 + $0x170] sm:$0xff]  ;;  %v816_v38 = vld [vmem:[#allocation7 + $0x178] sm:$0xff]  ;;  %v606_v44 = vrot.slane %v4204_v34, 7  ;;  %v690_v48 = vrot.slane %v2592_v40, 1  ;;  %v2608_v53 = vld [vmem:[%s4175_s25 + $0x21] ss:$2 sm:$0xff] }
  0xd4   : > { %3205 = vmatpush3.bf16.msra.mxu0 %v3204_v12  ;;  %1049 = vmatprep.mubr.f32.mxu1 %v719_v35  ;;  %v3244_v45 = vpack.c.bf16 %v816_v38, %v815_v37  ;;  %v2607_v46 = vld [vmem:[%s4175_s25 + $0x11] ss:$2 sm:$0xff]  ;;  %v2593_v49 = vld [vmem:[%s4175_s25 + $0x30] ss:$2 sm:$0xff]  ;;  %v2594_v57 = vld [vmem:[%s4175_s25 + $0x40] ss:$2 sm:$0xff] }
  0xd5   : > { %3207 = vmatprep.subr.bf16.mxu0 %v3206_v16  ;;  %v623_v50 = vsel %vm607_vm1, %v606_v44, %v591_v43  ;;  %v592_v51 = vrot.slane %v2607_v46, 7  ;;  %v718_v54 = vsel %vm704_vm0, %v689_v27, %v690_v48  ;;  %v691_v55 = vrot.slane %v2593_v49, 1  ;;  %v2609_v61 = vld [vmem:[%s4175_s25 + $0x31] ss:$2 sm:$0xff]  ;;  %v2595_v1 = vld [vmem:[%s4175_s25 + $0x50] ss:$2 sm:$0xff] }
  0xd6   : > { %3237 = vmatpush3.bf16.msra.mxu1 %v3236_v15  ;;  %v593_v60 = vrot.slane %v2608_v53, 7  ;;  %v692_v0 = vrot.slane %v2594_v57, 1  ;;  %v594_v3 = vrot.slane %v2609_v61, 7  ;;  %v2610_v5 = vld [vmem:[%s4175_s25 + $0x41] ss:$2 sm:$0xff]  ;;  %vm675_vm5 = vcmp.ne.s32.totalorder %v562_v63, 15 }
  0xd7   : > { %3239 = vmatprep.subr.bf16.mxu1 %v3238_v20  ;;  %v622_v58 = vsel %vm607_vm1, %v591_v43, %v592_v51  ;;  %v717_v62 = vsel %vm704_vm0, %v690_v48, %v691_v55  ;;  %v693_v7 = vrot.slane %v2595_v1, 1  ;;  %v2596_v10 = vld [vmem:[%s4175_s25 + $0x60] ss:$2 sm:$0xff]  ;;  %v563_v12 = vand.u32 15, %v4245_v4  ;;  %v2611_v14 = vld [vmem:[%s4175_s25 + $0x51] ss:$2 sm:$0xff] }
  0xd8   : > { %3209 = vmatpush3.bf16.msra.mxu0 %v3208_v28  ;;  %v621_v2 = vsel %vm607_vm1, %v592_v51, %v593_v60  ;;  %v716_v6 = vsel %vm704_vm0, %v691_v55, %v692_v0  ;;  %v620_v11 = vsel %vm607_vm1, %v593_v60, %v594_v3  ;;  %v595_v13 = vrot.slane %v2610_v5, 7  ;;  %v2597_v18 = vld [vmem:[%s4175_s25 + $0x70] ss:$2 sm:$0xff]  ;;  %v2598_v28 = vld [vmem:[%s4175_s25 + $0x80] ss:$2 sm:$0xff] }
  0xd9   : > { %3211 = vmatprep.subr.bf16.mxu0 %v3210_v31  ;;  %v715_v15 = vsel %vm704_vm0, %v692_v0, %v693_v7  ;;  %v564_v16 = vand.u32 15, %v4251_v8  ;;  %v694_v17 = vrot.slane %v2596_v10, 1  ;;  %vm579_vm6 = vcmp.ne.s32.totalorder %v563_v12, 0  ;;  %v2613_v32 = vld [vmem:[%s4175_s25 + $0x71] ss:$2 sm:$0xff]  ;;  %v1362_v19 = vld [vmem:[#allocation9 + $0x108] sm:$0xff] }
  0xda   : > { %3241 = vmatpush3.bf16.msra.mxu1 %v3240_v30  ;;  %v619_v20 = vsel %vm607_vm1, %v594_v3, %v595_v13  ;;  %v596_v21 = vrot.slane %v2611_v14, 7  ;;  %v695_v26 = vrot.slane %v2597_v18, 1  ;;  %v4271_v27 = vadd.s32 56, %v4193_v9  ;;  %v2599_v37 = vld [vmem:[%s4175_s25 + $0x90] ss:$2 sm:$0xff] }
  0xdb   : > { %3243 = vmatprep.subr.bf16.mxu1 %v3242_v36  ;;  %vm677_vm7 = vcmp.ne.s32.totalorder %v564_v16, 15  ;;  %v714_v25 = vsel %vm704_vm0, %v693_v7, %v694_v17  ;;  %v565_v30 = vand.u32 15, %v4265_v22  ;;  %v696_v36 = vrot.slane %v2598_v28, 1  ;;  %v2614_v42 = vld [vmem:[%s4175_s25 + $0x81] ss:$2 sm:$0xff] }
  0xdc   : > { %3213 = vmatpush3.bf16.msra.mxu0 %v3212_v41  ;;  %v618_v29 = vsel %vm607_vm1, %v595_v13, %v596_v21  ;;  %v566_v35 = vand.u32 15, %v4271_v27  ;;  %v551_v41 = vadd.s32 64, %v4193_v9  ;;  %v2600_v47 = vld [vmem:[%s4175_s25 + $0xa0] ss:$2 sm:$0xff]  ;;  %v2615_v51 = vld [vmem:[%s4175_s25 + $0x91] ss:$2 sm:$0xff] }
  0xdd   : > { %vm581_vm8 = vcmp.ne.s32.totalorder %v565_v30, 0  ;;  %v712_v43 = vsel %vm704_vm0, %v695_v26, %v696_v36  ;;  %v698_v55 = vrot.slane %v2600_v47, 1  ;;  %v600_v59 = vrot.slane %v2615_v51, 7  ;;  %v2603_v12 = vld [vmem:[%s4175_s25 + $0xd0] ss:$2 sm:$0xff] }
  0xde   : > { %3245 = vmatpush3.bf16.msra.mxu1 %v3244_v45  ;;  %vm679_vm9 = vcmp.ne.s32.totalorder %v566_v35, 15  ;;  %v697_v45 = vrot.slane %v2599_v37, 1  ;;  %v553_v60 = vadd.s32 80, %v4193_v9  ;;  %v554_v0 = vadd.s32 88, %v4193_v9  ;;  %v2618_v16 = vld [vmem:[%s4175_s25 + $0xc1] ss:$2 sm:$0xff] }
  0xdf   : > { %2623 = vmatmul.mubr.msk.f32.vlgmr.msra.gmra.mrb[0].mxu0 %vm575_vm2, %v623_v50  ;;  %v599_v50 = vrot.slane %v2614_v42, 7 }
  0xe0   : > { %909 = vmatprep.mubr.f32.mxu0 %v2591_v24  ;;  %v2612_v24 = vld [vmem:[%s4175_s25 + $0x61] ss:$2 sm:$0xff]  ;;  %v569_v3 = vand.u32 15, %v553_v60  ;;  %v1363_v60 = vld [vmem:[#allocation9 + $0x110] sm:$0xff] }
  0xe1   : > { %1050 = vmatmul.mubr.f32.vlgmr.msra.gmra.mrb[0].mxu1 %v2606_v33  ;;  %v597_v31 = vrot.slane %v2612_v24, 7  ;;  %v713_v33 = vsel %vm704_vm0, %v694_v17, %v695_v26  ;;  %v603_v26 = vrot.slane %v2618_v16, 7 }
  0xe2   : > { %2631 = vmatprep.mubr.msk.f32.mxu1 %vm673_vm3, %v718_v54  ;;  %vm585_vm12 = vcmp.ne.s32.totalorder %v569_v3, 0  ;;  %v1383_v3 = vld [vmem:[#allocation9 + $0x1b0] sm:$0xff] }
  0xe3   : > { %910 = vmatmul.mubr.f32.gmra.mrb[2].mxu0 %v622_v58  ;;  %v617_v38 = vsel %vm607_vm1, %v596_v21, %v597_v31  ;;  %v2604_v21 = vld [vmem:[%s4175_s25 + $0xe0] ss:$2 sm:$0xff] }
  0xe4   : > { %914 = vmatprep.mubr.f32.mxu0 %v2592_v40  ;;  %v598_v40 = vrot.slane %v2613_v32, 7 }
  0xe5   : > { %1055 = vmatmul.mubr.f32.gmra.mrb[2].mxu1 %v2607_v46  ;;  %v552_v46 = vadd.s32 72, %v4193_v9 }
  0xe6   : > { %1059 = vmatprep.mubr.f32.mxu1 %v717_v62  ;;  %v616_v48 = vsel %vm607_vm1, %v597_v31, %v598_v40  ;;  %v615_v58 = vsel %vm607_vm1, %v598_v40, %v599_v50  ;;  %v710_v62 = vsel %vm704_vm0, %v697_v45, %v698_v55  ;;  %v702_v31 = vrot.slane %v2604_v21, 1 }
  0xe7   : > { %2624 = vmatmul.mubr.msk.f32.gmra.mrb[4].mxu0 %vm577_vm4, %v621_v2  ;;  %v568_v54 = vand.u32 15, %v552_v46  ;;  %v614_v2 = vsel %vm607_vm1, %v599_v50, %v600_v59 }
  0xe8   : > { %919 = vmatprep.mubr.f32.mxu0 %v2593_v49  ;;  %v567_v49 = vand.u32 15, %v551_v41  ;;  %v558_v41 = vadd.s32 120, %v4193_v9 }
  0xe9   : > { %1060 = vmatmul.mubr.f32.gmra.mrb[4].mxu1 %v2608_v53  ;;  %v711_v53 = vsel %vm704_vm0, %v696_v36, %v697_v45  ;;  %vm681_vm11 = vcmp.ne.s32.totalorder %v568_v54, 15  ;;  %v557_v36 = vadd.s32 112, %v4193_v9 }
  0xea   : > { %2632 = vmatprep.mubr.msk.f32.mxu1 %vm675_vm5, %v716_v6  ;;  %vm583_vm10 = vcmp.ne.s32.totalorder %v567_v49, 0  ;;  %v2617_v6 = vld [vmem:[%s4175_s25 + $0xb1] ss:$2 sm:$0xff] }
  0xeb   : > { %920 = vmatmul.mubr.f32.gmra.mrb[6].mxu0 %v620_v11 }
  0xec   : > { %924 = vmatprep.mubr.f32.mxu0 %v2594_v57  ;;  %v2601_v57 = vld [vmem:[%s4175_s25 + $0xb0] ss:$2 sm:$0xff] }
  0xed   : > { %1065 = vmatmul.mubr.f32.gmra.mrb[6].mxu1 %v2609_v61  ;;  %v2616_v61 = vld [vmem:[%s4175_s25 + $0xa1] ss:$2 sm:$0xff]  ;;  %v699_v63 = vrot.slane %v2601_v57, 1 }
  0xee   : > { %1069 = vmatprep.mubr.f32.mxu1 %v715_v15  ;;  %v555_v15 = vadd.s32 96, %v4193_v9 }
  0xef   : > { %2625 = vmatmul.mubr.msk.f32.gmra.mrb[8].mxu0 %vm579_vm6, %v619_v20  ;;  %v709_v7 = vsel %vm704_vm0, %v698_v55, %v699_v63  ;;  %v556_v20 = vadd.s32 104, %v4193_v9  ;;  %v1361_v55 = vld [vmem:[#allocation9 + $0x100] sm:$0xff] }
  0xf0   : > { %929 = vmatprep.mubr.f32.mxu0 %v2595_v1  ;;  %v2602_v1 = vld [vmem:[%s4175_s25 + $0xc0] ss:$2 sm:$0xff] }
  0xf1   : > { %1070 = vmatmul.mubr.f32.gmra.mrb[8].mxu1 %v2610_v5  ;;  %v601_v5 = vrot.slane %v2616_v61, 7  ;;  %v700_v11 = vrot.slane %v2602_v1, 1  ;;  %v572_v30 = vand.u32 15, %v556_v20  ;;  %v1388_v20 = vld [vmem:[#allocation9 + $0x1d8] sm:$0xff] }
  0xf2   : > { %2633 = vmatprep.mubr.msk.f32.mxu1 %vm677_vm7, %v714_v25  ;;  %v571_v25 = vand.u32 15, %v555_v15  ;;  %v1369_v15 = vld [vmem:[#allocation9 + $0x140] sm:$0xff] }
  0xf3   : > { %930 = vmatmul.mubr.f32.gmra.mrb[10].mxu0 %v618_v29  ;;  %v613_v13 = vsel %vm607_vm1, %v600_v59, %v601_v5  ;;  %v708_v17 = vsel %vm704_vm0, %v699_v63, %v700_v11  ;;  %vm685_vm15 = vcmp.ne.s32.totalorder %v572_v30, 15  ;;  %v1382_v63 = vld [vmem:[#allocation9 + $0x1a8] sm:$0xff] }
  0xf4   : > { %934 = vmatprep.mubr.f32.mxu0 %v2596_v10  ;;  %v570_v10 = vand.u32 15, %v554_v0  ;;  %vm587_vm14 = vcmp.ne.s32.totalorder %v571_v25, 0  ;;  %v1372_v25 = vld [vmem:[#allocation9 + $0x158] sm:$0xff] }
  0xf5   : > { %1075 = vmatmul.mubr.f32.gmra.mrb[10].mxu1 %v2611_v14  ;;  %v602_v14 = vrot.slane %v2617_v6, 7 }
  0xf6   : > { %1079 = vmatprep.mubr.f32.mxu1 %v713_v33  ;;  %vm683_vm13 = vcmp.ne.s32.totalorder %v570_v10, 15  ;;  %v1368_v10 = vld [vmem:[#allocation9 + $0x138] sm:$0xff] }
  0xf7   : > { %2626 = vmatmul.mubr.msk.f32.gmra.mrb[12].mxu0 %vm581_vm8, %v617_v38  ;;  %v611_v33 = vsel %vm607_vm1, %v602_v14, %v603_v26 }
  0xf8   : > { %939 = vmatprep.mubr.f32.mxu0 %v2597_v18  ;;  %v701_v18 = vrot.slane %v2603_v12, 1 }
  0xf9   : > { %1080 = vmatmul.mubr.f32.gmra.mrb[12].mxu1 %v2612_v24  ;;  %v612_v24 = vsel %vm607_vm1, %v601_v5, %v602_v14  ;;  %v1384_v5 = vld [vmem:[#allocation9 + $0x1b8] sm:$0xff] }
  0xfa   : > { %2634 = vmatprep.mubr.msk.f32.mxu1 %vm679_vm9, %v712_v43  ;;  %v707_v29 = vsel %vm704_vm0, %v700_v11, %v701_v18  ;;  %v706_v38 = vsel %vm704_vm0, %v701_v18, %v702_v31  ;;  %v573_v43 = vand.u32 15, %v557_v36  ;;  %v1387_v18 = vld [vmem:[#allocation9 + $0x1d0] sm:$0xff]  ;;  %v1374_v36 = vld [vmem:[#allocation9 + $0x168] sm:$0xff] }
  0xfb   : > { %940 = vmatmul.mubr.f32.gmra.mrb[14].mxu0 %v616_v48 }
  0xfc   : > { %944 = vmatprep.mubr.f32.mxu0 %v2598_v28  ;;  %v2619_v28 = vld [vmem:[%s4175_s25 + $0xd1] ss:$2 sm:$0xff]  ;;  %vm589_vm2 = vcmp.ne.s32.totalorder %v573_v43, 0 }
  0xfd   : > { %1085 = vmatmul.mubr.f32.gmra.mrb[14].mxu1 %v2613_v32  ;;  %v2605_v32 = vld [vmem:[%s4175_s25 + $0xf0] ss:$2 sm:$0xff]  ;;  %v604_v35 = vrot.slane %v2619_v28, 7 }
  0xfe   : > { %1089 = vmatprep.mubr.f32.mxu1 %v711_v53  ;;  %v703_v40 = vrot.slane %v2605_v32, 1  ;;  %v1378_v53 = vld [vmem:[#allocation9 + $0x188] sm:$0xff]  ;;  %v1392_v43 = vld [vmem:[#allocation9 + $0x1f8] sm:$0xff] }
  0xff   : > { %2627 = vmatmul.mubr.msk.f32.gmra.mrb[16].mxu0 %vm583_vm10, %v615_v58  ;;  %v1380_v58 = vld [vmem:[#allocation9 + $0x198] sm:$0xff] }
 0x100   : > { %949 = vmatprep.mubr.f32.mxu0 %v2599_v37  ;;  %v2620_v37 = vld [vmem:[%s4175_s25 + $0xe1] ss:$2 sm:$0xff]  ;;  %v705_v46 = vsel %vm704_vm0, %v702_v31, %v703_v40  ;;  %v720_v49 = vsel %vm704_vm0, %v703_v40, %v688_v23  ;;  %v1379_v23 = vld [vmem:[#allocation9 + $0x190] sm:$0xff]  ;;  %s4645_s25 = sld [smem:[#allocation23_spill]] }
 0x101   : > { %1090 = vmatmul.mubr.f32.gmra.mrb[16].mxu1 %v2614_v42  ;;  %v610_v42 = vsel %vm607_vm1, %v603_v26, %v604_v35  ;;  %v605_v45 = vrot.slane %v2620_v37, 7  ;;  %v3282_v59 = vpack.c.bf16 %v1380_v58, %v1379_v23  ;;  %v1389_v31 = vld [vmem:[#allocation9 + $0x1e0] sm:$0xff]  ;;  %v1330_v40 = vld [vmem:[#allocation9 + $0x8] sm:$0xff] }
 0x102   : > { %2635 = vmatprep.mubr.msk.f32.mxu1 %vm681_vm11, %v710_v62  ;;  %v1333_v58 = vld [vmem:[#allocation9 + $0x20] sm:$0xff] }
 0x103   : > { %950 = vmatmul.mubr.f32.gmra.mrb[18].mxu0 %v614_v2  ;;  %v609_v48 = vsel %vm607_vm1, %v604_v35, %v605_v45  ;;  %v608_v50 = vsel %vm607_vm1, %v605_v45, %v606_v44  ;;  %v1381_v44 = vld [vmem:[#allocation9 + $0x1a0] sm:$0xff] }
 0x104   : > { %954 = vmatprep.mubr.f32.mxu0 %v2600_v47  ;;  %v574_v47 = vand.u32 15, %v558_v41  ;;  %v3286_v0 = vpack.c.bf16 %v1382_v63, %v1381_v44  ;;  %v1373_v35 = vld [vmem:[#allocation9 + $0x160] sm:$0xff]  ;;  %v1335_v63 = vld [vmem:[#allocation9 + $0x30] sm:$0xff] }
 0x105   : > { %1095 = vmatmul.mubr.f32.gmra.mrb[18].mxu1 %v2615_v51  ;;  %v1377_v51 = vld [vmem:[#allocation9 + $0x180] sm:$0xff] }
 0x106   : > { %1099 = vmatprep.mubr.f32.mxu1 %v709_v7  ;;  %vm687_vm3 = vcmp.ne.s32.totalorder %v574_v47, 15  ;;  %v3278_v54 = vpack.c.bf16 %v1378_v53, %v1377_v51  ;;  %v1367_v7 = vld [vmem:[#allocation9 + $0x130] sm:$0xff]  ;;  %v1376_v47 = vld [vmem:[#allocation9 + $0x178] sm:$0xff] }
 0x107   : > { %2628 = vmatmul.mubr.msk.f32.gmra.mrb[20].mxu0 %vm585_vm12, %v613_v13  ;;  %v3292_v11 = vpack.c.bf16 %v1368_v10, %v1367_v7  ;;  %v1386_v13 = vld [vmem:[#allocation9 + $0x1c8] sm:$0xff]  ;;  %v1331_v53 = vld [vmem:[#allocation9 + $0x10] sm:$0xff] }
 0x108   : > { %959 = vmatprep.mubr.f32.mxu0 %v2601_v57  ;;  %v3280_v57 = vpack.c.bf16 %v1362_v19, %v1361_v55  ;;  %3279 = vmatprep.subr.bf16.mxu1 %v3278_v54  ;;  %v1332_v54 = vld [vmem:[#allocation9 + $0x18] sm:$0xff]  ;;  %v1349_v19 = vld [vmem:[#allocation9 + $0xa0] sm:$0xff]  ;;  %v1355_v10 = vld [vmem:[#allocation9 + $0xd0] sm:$0xff] }
 0x109   : > { %1100 = vmatmul.mubr.f32.gmra.mrb[20].mxu1 %v2616_v61  ;;  %v1364_v61 = vld [vmem:[#allocation9 + $0x118] sm:$0xff]  ;;  %v3252_v55 = vpack.c.bf16 %v1332_v54, %v1331_v53 }
 0x10a   : > { %2636 = vmatprep.mubr.msk.f32.mxu1 %vm683_vm13, %v708_v17  ;;  %3281 = vmatpush3.bf16.msra.mxu1 %v3280_v57  ;;  %v3284_v62 = vpack.c.bf16 %v1364_v61, %v1363_v60  ;;  %v1350_v57 = vld [vmem:[#allocation9 + $0xa8] sm:$0xff]  ;;  %v1351_v61 = vld [vmem:[#allocation9 + $0xb0] sm:$0xff] }
 0x10b   : > { %960 = vmatmul.mubr.f32.gmra.mrb[22].mxu0 %v612_v24  ;;  %3283 = vmatprep.subr.bf16.mxu1 %v3282_v59  ;;  %v1371_v24 = vld [vmem:[#allocation9 + $0x150] sm:$0xff]  ;;  %v3254_v23 = vpack.c.bf16 %v1350_v57, %v1349_v19  ;;  %v1334_v59 = vld [vmem:[#allocation9 + $0x28] sm:$0xff] }
 0x10c   : > { %964 = vmatprep.mubr.f32.mxu0 %v2602_v1  ;;  %v1366_v1 = vld [vmem:[#allocation9 + $0x128] sm:$0xff]  ;;  %v3300_v26 = vpack.c.bf16 %v1372_v25, %v1371_v24  ;;  %v3256_v60 = vpack.c.bf16 %v1334_v59, %v1333_v58  ;;  %v1359_v24 = vld [vmem:[#allocation9 + $0xf0] sm:$0xff]  ;;  %v1360_v25 = vld [vmem:[#allocation9 + $0xf8] sm:$0xff] }
 0x10d   : > { %1105 = vmatmul.mubr.f32.gmra.mrb[22].mxu1 %v2617_v6  ;;  %v3290_v6 = vpack.c.bf16 %v1384_v5, %v1383_v3  ;;  %v1337_v5 = vld [vmem:[#allocation9 + $0x40] sm:$0xff] }
 0x10e   : > { %1109 = vmatprep.mubr.f32.mxu1 %v707_v29  ;;  %3285 = vmatpush3.bf16.msra.mxu1 %v3284_v62  ;;  %v1346_v29 = vld [vmem:[#allocation9 + $0x88] sm:$0xff]  ;;  %v1352_v62 = vld [vmem:[#allocation9 + $0xb8] sm:$0xff] }
 0x10f   : > { %2629 = vmatmul.mubr.msk.f32.gmra.mrb[24].mxu0 %vm587_vm14, %v611_v33  ;;  %3287 = vmatprep.subr.bf16.mxu1 %v3286_v0  ;;  %v3258_v44 = vpack.c.bf16 %v1352_v62, %v1351_v61  ;;  %v1336_v0 = vld [vmem:[#allocation9 + $0x38] sm:$0xff] }
 0x110   : > { %969 = vmatprep.mubr.f32.mxu0 %v2603_v12  ;;  %v1385_v12 = vld [vmem:[#allocation9 + $0x1c0] sm:$0xff] }
 0x111   : > { %1110 = vmatmul.mubr.f32.gmra.mrb[24].mxu1 %v2618_v16  ;;  %v3294_v14 = vpack.c.bf16 %v1386_v13, %v1385_v12  ;;  %v1370_v16 = vld [vmem:[#allocation9 + $0x148] sm:$0xff]  ;;  %v1339_v13 = vld [vmem:[#allocation9 + $0x50] sm:$0xff] }
 0x112   : > { %2637 = vmatprep.mubr.msk.f32.mxu1 %vm685_vm15, %v706_v38  ;;  %v3296_v17 = vpack.c.bf16 %v1370_v16, %v1369_v15  ;;  %v1329_v38 = vld [vmem:[#allocation9] sm:$0xff] }
 0x113   : > { %970 = vmatmul.mubr.f32.gmra.mrb[26].mxu0 %v610_v42  ;;  %v3248_v41 = vpack.c.bf16 %v1330_v40, %v1329_v38  ;;  %v1391_v42 = vld [vmem:[#allocation9 + $0x1f0] sm:$0xff]  ;;  %v1357_v16 = vld [vmem:[#allocation9 + $0xe0] sm:$0xff] }
 0x114   : > { %974 = vmatprep.mubr.f32.mxu0 %v2604_v21  ;;  %v3298_v21 = vpack.c.bf16 %v1388_v20, %v1387_v18  ;;  %v3306_v45 = vpack.c.bf16 %v1392_v43, %v1391_v42  ;;  %v1341_v18 = vld [vmem:[#allocation9 + $0x60] sm:$0xff] }
 0x115   : > { %1115 = vmatmul.mubr.f32.gmra.mrb[26].mxu1 %v2619_v28  ;;  %v1345_v28 = vld [vmem:[#allocation9 + $0x80] sm:$0xff] }
 0x116   : > { %1119 = vmatprep.mubr.f32.mxu1 %v705_v46  ;;  %v3246_v30 = vpack.c.bf16 %v1346_v29, %v1345_v28  ;;  %v1375_v46 = vld [vmem:[#allocation9 + $0x170] sm:$0xff]  ;;  %v3274_v28 = vpack.c.bf16 %v1360_v25, %v1359_v24 }
 0x117   : > { %2630 = vmatmul.mubr.msk.f32.gmra.mrb[28].mxu0 %vm589_vm2, %v609_v48  ;;  %v3308_v48 = vpack.c.bf16 %v1376_v47, %v1375_v46  ;;  %v1343_v29 = vld [vmem:[#allocation9 + $0x70] sm:$0xff] }
 0x118   : > { %979 = vmatprep.mubr.f32.mxu0 %v2605_v32  ;;  %v1390_v32 = vld [vmem:[#allocation9 + $0x1e8] sm:$0xff]  ;;  %3247 = vmatprep.subr.bf16.mxu0 %v3246_v30  ;;  %v1344_v30 = vld [vmem:[#allocation9 + $0x78] sm:$0xff] }
 0x119   : > { %1120 = vmatmul.mubr.f32.gmra.mrb[28].mxu1 %v2620_v37  ;;  %v3302_v33 = vpack.c.bf16 %v1390_v32, %v1389_v31  ;;  %v3304_v37 = vpack.c.bf16 %v1374_v36, %v1373_v35  ;;  %3249 = vmatpush3.bf16.msra.mxu0 %v3248_v41  ;;  %v3276_v31 = vpack.c.bf16 %v1344_v30, %v1343_v29 }
 0x11a   : > { %2638 = vmatprep.mubr.msk.f32.mxu1 %vm687_vm3, %v720_v49  ;;  %v1347_v49 = vld [vmem:[#allocation9 + $0x90] sm:$0xff] }
 0x11b   : > { %980 = vmatmul.mubr.f32.gmra.mrb[30].mxu0 %v608_v50  ;;  %v1348_v50 = vld [vmem:[#allocation9 + $0x98] sm:$0xff] }
 0x11c   : > { %v3250_v51 = vpack.c.bf16 %v1348_v50, %v1347_v49 }
 0x11d   : > { %1125 = vmatmul.mubr.f32.gmra.mrb[30].mxu1 %v4204_v34  ;;  %v1365_v34 = vld [vmem:[#allocation9 + $0x120] sm:$0xff] }
 0x11e   : > { %v3288_v2 = vpack.c.bf16 %v1366_v1, %v1365_v34  ;;  %3251 = vmatprep.subr.bf16.mxu0 %v3250_v51  ;;  %v3260_v34 = vpack.c.bf16 %v1336_v0, %v1335_v63  ;;  %v1353_v1 = vld [vmem:[#allocation9 + $0xc0] sm:$0xff] }
 0x11f   : > { %3253 = vmatpush3.bf16.msra.mxu0 %v3252_v55 }
 0x120   : > { %3289 = vmatpush3.bf16.msra.mxu1 %v3288_v2  ;;  %3255 = vmatprep.subr.bf16.mxu0 %v3254_v23  ;;  %v1354_v2 = vld [vmem:[#allocation9 + $0xc8] sm:$0xff] }
 0x121   : > { %3291 = vmatprep.subr.bf16.mxu1 %v3290_v6  ;;  %v3262_v3 = vpack.c.bf16 %v1354_v2, %v1353_v1  ;;  %v1338_v6 = vld [vmem:[#allocation9 + $0x48] sm:$0xff] }
 0x122   : > { %v3264_v7 = vpack.c.bf16 %v1338_v6, %v1337_v5 }
 0x123   : > { %3257 = vmatpush3.bf16.msra.mxu0 %v3256_v60 }
 0x124   : > { %3293 = vmatpush3.bf16.msra.mxu1 %v3292_v11  ;;  %3259 = vmatprep.subr.bf16.mxu0 %v3258_v44  ;;  %v1356_v11 = vld [vmem:[#allocation9 + $0xd8] sm:$0xff] }
 0x125   : > { %3295 = vmatprep.subr.bf16.mxu1 %v3294_v14  ;;  %v3266_v12 = vpack.c.bf16 %v1356_v11, %v1355_v10  ;;  %v1340_v14 = vld [vmem:[#allocation9 + $0x58] sm:$0xff] }
 0x126   : > { %v3268_v15 = vpack.c.bf16 %v1340_v14, %v1339_v13 }
 0x127   : > { %3261 = vmatpush3.bf16.msra.mxu0 %v3260_v34 }
 0x128   : > { %3297 = vmatpush3.bf16.msra.mxu1 %v3296_v17  ;;  %3263 = vmatprep.subr.bf16.mxu0 %v3262_v3  ;;  %v1358_v17 = vld [vmem:[#allocation9 + $0xe8] sm:$0xff] }
 0x129   : > { %3299 = vmatprep.subr.bf16.mxu1 %v3298_v21  ;;  %v3270_v20 = vpack.c.bf16 %v1358_v17, %v1357_v16  ;;  %v1342_v21 = vld [vmem:[#allocation9 + $0x68] sm:$0xff] }
 0x12b   : > { %3265 = vmatpush3.bf16.msra.mxu0 %v3264_v7 }
 0x12c   : > { %3301 = vmatpush3.bf16.msra.mxu1 %v3300_v26  ;;  %3267 = vmatprep.subr.bf16.mxu0 %v3266_v12  ;;  %v3272_v26 = vpack.c.bf16 %v1342_v21, %v1341_v18 }
 0x12d   : > { %3303 = vmatprep.subr.bf16.mxu1 %v3302_v33  ;;  %v4349_v33 = vld [vmem:[%s4606_s6] ss:$0 sm:$0xff] }
 0x12f   : > { %3269 = vmatpush3.bf16.msra.mxu0 %v3268_v15 }
 0x130   : > { %3305 = vmatpush3.bf16.msra.mxu1 %v3304_v37  ;;  %3271 = vmatprep.subr.bf16.mxu0 %v3270_v20 }
 0x131   : > { %3307 = vmatprep.subr.bf16.mxu1 %v3306_v45 }
 0x133   : > { %3273 = vmatpush3.bf16.msra.mxu0 %v3272_v26 }
 0x134   : > { %3309 = vmatpush3.bf16.msra.mxu1 %v3308_v48  ;;  %3275 = vmatprep.subr.bf16.mxu0 %v3274_v28 }
 0x137   : > { %3277 = vmatpush3.bf16.msra.mxu0 %v3276_v31 }
 0x1b2   : > { %v2708_v32 = vpop.f32.mrb[0].mxu0 }
 0x1b3   : > { %v2709_v35 = vpop.f32.mrb[1].mxu0 }
 0x1b4   : > { %v2788_v36 = vpop.f32.mrb[0].mxu1  ;;  %v2710_v37 = vadd.f32 %v2709_v35, %v2708_v32 }
 0x1b5   : > { %v2789_v38 = vpop.f32.mrb[1].mxu1 }
 0x1b6   : > { %v2790_v40 = vadd.f32 %v2789_v38, %v2788_v36  ;;  %v907_v41 = vadd.f32 %v2710_v37, %v4349_v33  ;;  %v2711_v42 = vpop.f32.mrb[2].mxu0 }
 0x1b7   : > { %v2712_v43 = vpop.f32.mrb[3].mxu0 }
 0x1b8   : > { %v2791_v45 = vpop.f32.mrb[2].mxu1  ;;  %v1052_v46 = vadd.f32 %v2790_v40, %v907_v41  ;;  %v2713_v47 = vadd.f32 %v2712_v43, %v2711_v42 }
 0x1b9   : > { %v2792_v48 = vpop.f32.mrb[3].mxu1 }
 0x1ba   : > { %v2793_v49 = vadd.f32 %v2792_v48, %v2791_v45  ;;  %vm1130_vm4 = vcmp.ge.f32.partialorder %v1052_v46, 0.0  ;;  %v1146_v50 = vmul.f32 0.2, %v1052_v46  ;;  %v912_v51 = vadd.f32 %v2713_v47, %v4349_v33  ;;  %v2714_v53 = vpop.f32.mrb[4].mxu0 }
 0x1bb   : > { %v2715_v54 = vpop.f32.mrb[5].mxu0 }
 0x1bc   : > { %v2794_v55 = vpop.f32.mrb[4].mxu1  ;;  %v1162_v19 = vsel %vm1130_vm4, %v1052_v46, %v1146_v50  ;;  %v1057_v57 = vadd.f32 %v2793_v49, %v912_v51  ;;  %v2716_v23 = vadd.f32 %v2715_v54, %v2714_v53  ;;  %v1225_v46 = vand.u32 7, %v4193_v9 }
 0x1bd   : > { %v2795_v58 = vpop.f32.mrb[5].mxu1  ;;  %1178 = vst [vmem:[#allocation2] sm:$0xff] %v1162_v19 }
 0x1be   : > { %v2796_v59 = vadd.f32 %v2795_v58, %v2794_v55  ;;  %vm1131_vm5 = vcmp.ge.f32.partialorder %v1057_v57, 0.0  ;;  %v1147_v60 = vmul.f32 0.2, %v1057_v57  ;;  %v917_v61 = vadd.f32 %v2716_v23, %v4349_v33  ;;  %v2717_v62 = vpop.f32.mrb[6].mxu0 }
 0x1bf   : > { %v2718_v44 = vpop.f32.mrb[7].mxu0  ;;  %vm1281_vm10 = vcmp.ne.s32.totalorder %v1225_v46, 7 }
 0x1c0   : > { %v2797_v63 = vpop.f32.mrb[6].mxu1  ;;  %v1163_v0 = vsel %vm1131_vm5, %v1057_v57, %v1147_v60  ;;  %v1062_v34 = vadd.f32 %v2796_v59, %v917_v61  ;;  %v2719_v1 = vadd.f32 %v2718_v44, %v2717_v62 }
 0x1c1   : > { %v2798_v2 = vpop.f32.mrb[7].mxu1  ;;  %1179 = vst [vmem:[#allocation2 + $0x8] sm:$0xff] %v1163_v0 }
 0x1c2   : > { %v2799_v3 = vadd.f32 %v2798_v2, %v2797_v63  ;;  %vm1132_vm6 = vcmp.ge.f32.partialorder %v1062_v34, 0.0  ;;  %v1148_v5 = vmul.f32 0.2, %v1062_v34  ;;  %v922_v6 = vadd.f32 %v2719_v1, %v4349_v33  ;;  %v2720_v7 = vpop.f32.mrb[8].mxu0 }
 0x1c3   : > { %v2721_v10 = vpop.f32.mrb[9].mxu0 }
 0x1c4   : > { %v2800_v11 = vpop.f32.mrb[8].mxu1  ;;  %v1164_v12 = vsel %vm1132_vm6, %v1062_v34, %v1148_v5  ;;  %v1067_v13 = vadd.f32 %v2799_v3, %v922_v6  ;;  %v2722_v14 = vadd.f32 %v2721_v10, %v2720_v7  ;;  %v1226_v7 = vand.u32 7, %v4211_v39 }
 0x1c5   : > { %v2801_v15 = vpop.f32.mrb[9].mxu1  ;;  %1180 = vst [vmem:[#allocation2 + $0x10] sm:$0xff] %v1164_v12 }
 0x1c6   : > { %v2802_v16 = vadd.f32 %v2801_v15, %v2800_v11  ;;  %vm1133_vm7 = vcmp.ge.f32.partialorder %v1067_v13, 0.0  ;;  %v1149_v17 = vmul.f32 0.2, %v1067_v13  ;;  %v927_v18 = vadd.f32 %v2722_v14, %v4349_v33  ;;  %v2723_v20 = vpop.f32.mrb[10].mxu0 }
 0x1c7   : > { %v2724_v21 = vpop.f32.mrb[11].mxu0  ;;  %vm1282_vm13 = vcmp.ne.s32.totalorder %v1226_v7, 7 }
 0x1c8   : > { %v2803_v24 = vpop.f32.mrb[10].mxu1  ;;  %v1165_v25 = vsel %vm1133_vm7, %v1067_v13, %v1149_v17  ;;  %v1072_v26 = vadd.f32 %v2802_v16, %v927_v18  ;;  %v2725_v28 = vadd.f32 %v2724_v21, %v2723_v20  ;;  %v4356_v30 = vld [vmem:[#allocation2] ss:$2 sm:$0xff]  ;;  %v4373_v5 = vld [vmem:[#allocation2 + $0x1] ss:$2 sm:$0xff] }
 0x1c9   : > { %v2804_v29 = vpop.f32.mrb[11].mxu1  ;;  %1181 = vst [vmem:[#allocation2 + $0x18] sm:$0xff] %v1165_v25  ;;  %1464 = vmatprep.mubr.f32.mxu0 %v4356_v30  ;;  %v1289_v23 = vrot.slane %v4356_v30, 1 }
 0x1ca   : > { %v2805_v31 = vadd.f32 %v2804_v29, %v2803_v24  ;;  %vm1134_vm8 = vcmp.ge.f32.partialorder %v1072_v26, 0.0  ;;  %v1150_v32 = vmul.f32 0.2, %v1072_v26  ;;  %v932_v35 = vadd.f32 %v2725_v28, %v4349_v33  ;;  %v2726_v36 = vpop.f32.mrb[12].mxu0 }
 0x1cb   : > { %v2727_v37 = vpop.f32.mrb[13].mxu0 }
 0x1cc   : > { %v2806_v38 = vpop.f32.mrb[12].mxu1  ;;  %v1166_v40 = vsel %vm1134_vm8, %v1072_v26, %v1150_v32  ;;  %v1077_v41 = vadd.f32 %v2805_v31, %v932_v35  ;;  %v2728_v42 = vadd.f32 %v2727_v37, %v2726_v36 }
 0x1cd   : > { %v2807_v43 = vpop.f32.mrb[13].mxu1  ;;  %1182 = vst [vmem:[#allocation2 + $0x20] sm:$0xff] %v1166_v40 }
 0x1ce   : > { %v2808_v45 = vadd.f32 %v2807_v43, %v2806_v38  ;;  %vm1135_vm9 = vcmp.ge.f32.partialorder %v1077_v41, 0.0  ;;  %v1151_v47 = vmul.f32 0.2, %v1077_v41  ;;  %v937_v48 = vadd.f32 %v2728_v42, %v4349_v33  ;;  %v2729_v49 = vpop.f32.mrb[14].mxu0 }
 0x1cf   : > { %v2730_v50 = vpop.f32.mrb[15].mxu0  ;;  %v1227_v42 = vand.u32 7, %v4225_v52 }
 0x1d0   : > { %v2809_v51 = vpop.f32.mrb[14].mxu1  ;;  %v1167_v53 = vsel %vm1135_vm9, %v1077_v41, %v1151_v47  ;;  %v1082_v54 = vadd.f32 %v2808_v45, %v937_v48  ;;  %v2731_v55 = vadd.f32 %v2730_v50, %v2729_v49  ;;  %v4362_v57 = vld [vmem:[#allocation2 + $0x10] ss:$2 sm:$0xff]  ;;  %v4386_v40 = vld [vmem:[#allocation2 + $0x11] ss:$2 sm:$0xff] }
 0x1d1   : > { %v2810_v19 = vpop.f32.mrb[15].mxu1  ;;  %1183 = vst [vmem:[#allocation2 + $0x28] sm:$0xff] %v1167_v53  ;;  %v1290_v59 = vrot.slane %v4362_v57, 1  ;;  %vm1283_vm2 = vcmp.ne.s32.totalorder %v1227_v42, 7 }
 0x1d2   : > { %v2811_v58 = vadd.f32 %v2810_v19, %v2809_v51  ;;  %vm1136_vm11 = vcmp.ge.f32.partialorder %v1082_v54, 0.0  ;;  %v1152_v60 = vmul.f32 0.2, %v1082_v54  ;;  %v942_v61 = vadd.f32 %v2731_v55, %v4349_v33  ;;  %v2732_v62 = vpop.f32.mrb[16].mxu0 }
 0x1d3   : > { %v2733_v44 = vpop.f32.mrb[17].mxu0  ;;  %v1303_v0 = vsel %vm704_vm0, %v1289_v23, %v1290_v59 }
 0x1d4   : > { %v2812_v63 = vpop.f32.mrb[16].mxu1  ;;  %v1168_v34 = vsel %vm1136_vm11, %v1082_v54, %v1152_v60  ;;  %v1087_v1 = vadd.f32 %v2811_v58, %v942_v61  ;;  %v2734_v2 = vadd.f32 %v2733_v44, %v2732_v62  ;;  %2648 = vmatprep.mubr.msk.f32.mxu1 %vm1281_vm10, %v1303_v0 }
 0x1d5   : > { %v2813_v3 = vpop.f32.mrb[17].mxu1  ;;  %1184 = vst [vmem:[#allocation2 + $0x30] sm:$0xff] %v1168_v34  ;;  %1570 = vmatmul.mubr.f32.vlgmr.msra.gmra.mrb[32].mxu1 %v4373_v5 }
 0x1d6   : > { %v2814_v6 = vadd.f32 %v2813_v3, %v2812_v63  ;;  %vm1137_vm12 = vcmp.ge.f32.partialorder %v1087_v1, 0.0  ;;  %v1153_v10 = vmul.f32 0.2, %v1087_v1  ;;  %v947_v11 = vadd.f32 %v2734_v2, %v4349_v33  ;;  %v2735_v12 = vpop.f32.mrb[18].mxu0 }
 0x1d7   : > { %v2736_v13 = vpop.f32.mrb[19].mxu0 }
 0x1d8   : > { %v2815_v14 = vpop.f32.mrb[18].mxu1  ;;  %v1169_v15 = vsel %vm1137_vm12, %v1087_v1, %v1153_v10  ;;  %v1092_v16 = vadd.f32 %v2814_v6, %v947_v11  ;;  %v2737_v17 = vadd.f32 %v2736_v13, %v2735_v12  ;;  %v4378_v20 = vld [vmem:[#allocation2 + $0x20] ss:$2 sm:$0xff]  ;;  %v4399_v3 = vld [vmem:[#allocation2 + $0x21] ss:$2 sm:$0xff]  ;;  %v1228_v10 = vand.u32 7, %v4231_v56 }
 0x1d9   : > { %v2816_v18 = vpop.f32.mrb[19].mxu1  ;;  %1185 = vst [vmem:[#allocation2 + $0x38] sm:$0xff] %v1169_v15  ;;  %v1291_v24 = vrot.slane %v4378_v20, 1  ;;  %vm1233_vm12 = vcmp.ne.s32.totalorder %v1225_v46, 0 }
 0x1da   : > { %v2817_v21 = vadd.f32 %v2816_v18, %v2815_v14  ;;  %vm1138_vm14 = vcmp.ge.f32.partialorder %v1092_v16, 0.0  ;;  %v1154_v25 = vmul.f32 0.2, %v1092_v16  ;;  %v952_v26 = vadd.f32 %v2737_v17, %v4349_v33  ;;  %v2738_v28 = vpop.f32.mrb[20].mxu0 }
 0x1db   : > { %v2739_v29 = vpop.f32.mrb[21].mxu0  ;;  %v1302_v32 = vsel %vm704_vm0, %v1290_v59, %v1291_v24  ;;  %vm1284_vm5 = vcmp.ne.s32.totalorder %v1228_v10, 7 }
 0x1dc   : > { %v2818_v31 = vpop.f32.mrb[20].mxu1  ;;  %v1170_v35 = vsel %vm1138_vm14, %v1092_v16, %v1154_v25  ;;  %v1097_v36 = vadd.f32 %v2817_v21, %v952_v26  ;;  %v2740_v37 = vadd.f32 %v2739_v29, %v2738_v28  ;;  %2649 = vmatprep.mubr.msk.f32.mxu1 %vm1282_vm13, %v1302_v32 }
 0x1dd   : > { %v2819_v38 = vpop.f32.mrb[21].mxu1  ;;  %1186 = vst [vmem:[#allocation2 + $0x40] sm:$0xff] %v1170_v35  ;;  %1575 = vmatmul.mubr.f32.gmra.mrb[34].mxu1 %v4386_v40 }
 0x1de   : > { %v2820_v41 = vadd.f32 %v2819_v38, %v2818_v31  ;;  %vm1139_vm15 = vcmp.ge.f32.partialorder %v1097_v36, 0.0  ;;  %v1155_v43 = vmul.f32 0.2, %v1097_v36  ;;  %v957_v45 = vadd.f32 %v2740_v37, %v4349_v33  ;;  %v2741_v47 = vpop.f32.mrb[22].mxu0 }
 0x1df   : > { %v2742_v48 = vpop.f32.mrb[23].mxu0 }
 0x1e0   : > { %v2821_v49 = vpop.f32.mrb[22].mxu1  ;;  %v1171_v50 = vsel %vm1139_vm15, %v1097_v36, %v1155_v43  ;;  %v1102_v51 = vadd.f32 %v2820_v41, %v957_v45  ;;  %v2743_v53 = vadd.f32 %v2742_v48, %v2741_v47  ;;  %v4391_v55 = vld [vmem:[#allocation2 + $0x30] ss:$2 sm:$0xff]  ;;  %v4412_v45 = vld [vmem:[#allocation2 + $0x31] ss:$2 sm:$0xff]  ;;  %v1229_v48 = vand.u32 7, %v4245_v4 }
 0x1e1   : > { %v2822_v54 = vpop.f32.mrb[23].mxu1  ;;  %1187 = vst [vmem:[#allocation2 + $0x48] sm:$0xff] %v1171_v50  ;;  %v1292_v58 = vrot.slane %v4391_v55, 1  ;;  %vm1234_vm15 = vcmp.ne.s32.totalorder %v1226_v7, 0  ;;  %v1244_v30 = vrot.slane %v4412_v45, 7 }
 0x1e2   : > { %v2823_v19 = vadd.f32 %v2822_v54, %v2821_v49  ;;  %vm1140_vm3 = vcmp.ge.f32.partialorder %v1102_v51, 0.0  ;;  %v1156_v59 = vmul.f32 0.2, %v1102_v51  ;;  %v962_v60 = vadd.f32 %v2743_v53, %v4349_v33  ;;  %v2744_v61 = vpop.f32.mrb[24].mxu0 }
 0x1e3   : > { %v2745_v62 = vpop.f32.mrb[25].mxu0  ;;  %v1301_v63 = vsel %vm704_vm0, %v1291_v24, %v1292_v58  ;;  %vm1285_vm8 = vcmp.ne.s32.totalorder %v1229_v48, 7 }
 0x1e4   : > { %v2824_v44 = vpop.f32.mrb[24].mxu1  ;;  %v1172_v0 = vsel %vm1140_vm3, %v1102_v51, %v1156_v59  ;;  %v1107_v34 = vadd.f32 %v2823_v19, %v962_v60  ;;  %v2746_v1 = vadd.f32 %v2745_v62, %v2744_v61  ;;  %2650 = vmatprep.mubr.msk.f32.mxu1 %vm1283_vm2, %v1301_v63  ;;  %vm1235_vm2 = vcmp.ne.s32.totalorder %v1227_v42, 0 }
 0x1e5   : > { %v2825_v2 = vpop.f32.mrb[25].mxu1  ;;  %1188 = vst [vmem:[#allocation2 + $0x50] sm:$0xff] %v1172_v0  ;;  %1580 = vmatmul.mubr.f32.gmra.mrb[36].mxu1 %v4399_v3  ;;  %vm1236_vm3 = vcmp.ne.s32.totalorder %v1228_v10, 0 }
 0x1e6   : > { %v2826_v6 = vadd.f32 %v2825_v2, %v2824_v44  ;;  %vm1141_vm4 = vcmp.ge.f32.partialorder %v1107_v34, 0.0  ;;  %v1157_v11 = vmul.f32 0.2, %v1107_v34  ;;  %v967_v12 = vadd.f32 %v2746_v1, %v4349_v33  ;;  %v2747_v13 = vpop.f32.mrb[26].mxu0 }
 0x1e7   : > { %v2748_v14 = vpop.f32.mrb[27].mxu0 }
 0x1e8   : > { %v2827_v15 = vpop.f32.mrb[26].mxu1  ;;  %v1173_v16 = vsel %vm1141_vm4, %v1107_v34, %v1157_v11  ;;  %v1112_v17 = vadd.f32 %v2826_v6, %v967_v12  ;;  %v2749_v18 = vadd.f32 %v2748_v14, %v2747_v13  ;;  %v4404_v24 = vld [vmem:[#allocation2 + $0x40] ss:$2 sm:$0xff]  ;;  %v1218_v6 = vld [vmem:[#allocation2 + $0x41] ss:$2 sm:$0xff]  ;;  %v1230_v11 = vand.u32 7, %v4251_v8 }
 0x1e9   : > { %v2828_v21 = vpop.f32.mrb[27].mxu1  ;;  %1189 = vst [vmem:[#allocation2 + $0x58] sm:$0xff] %v1173_v16  ;;  %v1293_v26 = vrot.slane %v4404_v24, 1  ;;  %vm1237_vm4 = vcmp.ne.s32.totalorder %v1229_v48, 0  ;;  %v1744_v48 = vld [vmem:[#allocation10 + $0x118] sm:$0xff] }
 0x1ea   : > { %v2829_v25 = vadd.f32 %v2828_v21, %v2827_v15  ;;  %vm1142_vm6 = vcmp.ge.f32.partialorder %v1112_v17, 0.0  ;;  %v1158_v28 = vmul.f32 0.2, %v1112_v17  ;;  %v972_v29 = vadd.f32 %v2749_v18, %v4349_v33  ;;  %v2750_v31 = vpop.f32.mrb[28].mxu0 }
 0x1eb   : > { %v2751_v32 = vpop.f32.mrb[29].mxu0  ;;  %v1300_v36 = vsel %vm704_vm0, %v1292_v58, %v1293_v26  ;;  %vm1286_vm11 = vcmp.ne.s32.totalorder %v1230_v11, 7  ;;  %v1232_v18 = vand.u32 7, %v4271_v27 }
 0x1ec   : > { %v2830_v35 = vpop.f32.mrb[28].mxu1  ;;  %v1174_v37 = vsel %vm1142_vm6, %v1112_v17, %v1158_v28  ;;  %v1117_v38 = vadd.f32 %v2829_v25, %v972_v29  ;;  %v2752_v41 = vadd.f32 %v2751_v32, %v2750_v31  ;;  %2651 = vmatprep.mubr.msk.f32.mxu1 %vm1284_vm5, %v1300_v36  ;;  %v1231_v17 = vand.u32 7, %v4265_v22  ;;  %v1758_v32 = vld [vmem:[#allocation10 + $0x188] sm:$0xff]  ;;  %v1741_v36 = vld [vmem:[#allocation10 + $0x100] sm:$0xff] }
 0x1ed   : > { %v2831_v43 = vpop.f32.mrb[29].mxu1  ;;  %1190 = vst [vmem:[#allocation2 + $0x60] sm:$0xff] %v1174_v37  ;;  %1585 = vmatmul.mubr.f32.gmra.mrb[38].mxu1 %v4412_v45  ;;  %v1241_v25 = vrot.slane %v4373_v5, 7  ;;  %v1242_v29 = vrot.slane %v4386_v40, 7  ;;  %vm1288_vm14 = vcmp.ne.s32.totalorder %v1232_v18, 7  ;;  %v1243_v5 = vrot.slane %v4399_v3, 7 }
 0x1ee   : > { %v2832_v47 = vadd.f32 %v2831_v43, %v2830_v35  ;;  %vm1143_vm7 = vcmp.ge.f32.partialorder %v1117_v38, 0.0  ;;  %v1159_v49 = vmul.f32 0.2, %v1117_v38  ;;  %v977_v50 = vadd.f32 %v2752_v41, %v4349_v33  ;;  %v2753_v51 = vpop.f32.mrb[30].mxu0  ;;  %v1742_v37 = vld [vmem:[#allocation10 + $0x108] sm:$0xff]  ;;  %v1759_v41 = vld [vmem:[#allocation10 + $0x190] sm:$0xff] }
 0x1ef   : > { %v2754_v53 = vpop.f32.mrb[31].mxu0  ;;  %vm1287_vm13 = vcmp.ne.s32.totalorder %v1231_v17, 7  ;;  %v1255_v40 = vsel %vm607_vm1, %v1241_v25, %v1242_v29  ;;  %v1253_v7 = vsel %vm607_vm1, %v1243_v5, %v1244_v30  ;;  %vm1238_vm5 = vcmp.ne.s32.totalorder %v1230_v11, 0  ;;  %v1760_v43 = vld [vmem:[#allocation10 + $0x198] sm:$0xff]  ;;  %v1765_v11 = vld [vmem:[#allocation10 + $0x1c0] sm:$0xff] }
 0x1f0   : > { %v2833_v54 = vpop.f32.mrb[30].mxu1  ;;  %v1175_v19 = vsel %vm1143_vm7, %v1117_v38, %v1159_v49  ;;  %v1122_v58 = vadd.f32 %v2832_v47, %v977_v50  ;;  %v2755_v59 = vadd.f32 %v2754_v53, %v2753_v51  ;;  %v4417_v61 = vld [vmem:[#allocation2 + $0x50] ss:$2 sm:$0xff]  ;;  %v1220_v16 = vld [vmem:[#allocation2 + $0x51] ss:$2 sm:$0xff]  ;;  %vm1239_vm6 = vcmp.ne.s32.totalorder %v1231_v17, 0 }
 0x1f1   : > { %v2834_v60 = vpop.f32.mrb[31].mxu1  ;;  %1191 = vst [vmem:[#allocation2 + $0x68] sm:$0xff] %v1175_v19  ;;  %v1294_v44 = vrot.slane %v4417_v61, 1  ;;  %vm1240_vm7 = vcmp.ne.s32.totalorder %v1232_v18, 0  ;;  %v3344_v38 = vpack.c.bf16 %v1742_v37, %v1741_v36  ;;  %v3346_v45 = vpack.c.bf16 %v1760_v43, %v1759_v41  ;;  %v1743_v47 = vld [vmem:[#allocation10 + $0x110] sm:$0xff]  ;;  %v1761_v50 = vld [vmem:[#allocation10 + $0x1a0] sm:$0xff] }
 0x1f2   : > { %v2835_v62 = vadd.f32 %v2834_v60, %v2833_v54  ;;  %vm1144_vm9 = vcmp.ge.f32.partialorder %v1122_v58, 0.0  ;;  %v1160_v63 = vmul.f32 0.2, %v1122_v58  ;;  %v982_v0 = vadd.f32 %v2755_v59, %v4349_v33  ;;  %v1762_v51 = vld [vmem:[#allocation10 + $0x1a8] sm:$0xff]  ;;  %v1745_v54 = vld [vmem:[#allocation10 + $0x120] sm:$0xff]  ;;  %v1763_v59 = vld [vmem:[#allocation10 + $0x1b0] sm:$0xff] }
 0x1f3   : > { %v1299_v34 = vsel %vm704_vm0, %v1293_v26, %v1294_v44  ;;  %v3348_v49 = vpack.c.bf16 %v1744_v48, %v1743_v47  ;;  %v3350_v53 = vpack.c.bf16 %v1762_v51, %v1761_v50  ;;  %v1746_v19 = vld [vmem:[#allocation10 + $0x128] sm:$0xff]  ;;  %v1764_v60 = vld [vmem:[#allocation10 + $0x1b8] sm:$0xff]  ;;  %v1727_v17 = vld [vmem:[#allocation10 + $0x90] sm:$0xff] }
 0x1f4   : > { %v1176_v1 = vsel %vm1144_vm9, %v1122_v58, %v1160_v63  ;;  %v1127_v2 = vadd.f32 %v2835_v62, %v982_v0  ;;  %2652 = vmatprep.mubr.msk.f32.mxu1 %vm1285_vm8, %v1299_v34  ;;  %v3352_v58 = vpack.c.bf16 %v1746_v19, %v1745_v54  ;;  %v1747_v62 = vld [vmem:[#allocation10 + $0x130] sm:$0xff]  ;;  %v1725_v0 = vld [vmem:[#allocation10 + $0x80] sm:$0xff]  ;;  %v1726_v34 = vld [vmem:[#allocation10 + $0x88] sm:$0xff] }
 0x1f5   : > { %1192 = vst [vmem:[#allocation2 + $0x70] sm:$0xff] %v1176_v1  ;;  %1590 = vmatmul.mubr.f32.gmra.mrb[40].mxu1 %v1218_v6  ;;  %v3310_v1 = vpack.c.bf16 %v1726_v34, %v1725_v0  ;;  %v1728_v18 = vld [vmem:[#allocation10 + $0x98] sm:$0xff]  ;;  %v1715_v36 = vld [vmem:[#allocation10 + $0x30] sm:$0xff]  ;;  %v1733_v50 = vld [vmem:[#allocation10 + $0xc0] sm:$0xff] }
 0x1f6   : > { %vm1145_vm10 = vcmp.ge.f32.partialorder %v1127_v2, 0.0  ;;  %v1161_v12 = vmul.f32 0.2, %v1127_v2  ;;  %v1716_v37 = vld [vmem:[#allocation10 + $0x38] sm:$0xff]  ;;  %v1734_v51 = vld [vmem:[#allocation10 + $0xc8] sm:$0xff]  ;;  %v1717_v54 = vld [vmem:[#allocation10 + $0x40] sm:$0xff] }
 0x1f7   : > { %3311 = vmatprep.subr.bf16.mxu0 %v3310_v1  ;;  %v3324_v41 = vpack.c.bf16 %v1716_v37, %v1715_v36  ;;  %v1772_v43 = vld [vmem:[#allocation10 + $0x1f8] sm:$0xff]  ;;  %v1718_v19 = vld [vmem:[#allocation10 + $0x48] sm:$0xff]  ;;  %v1737_v0 = vld [vmem:[#allocation10 + $0xe0] sm:$0xff] }
 0x1f8   : > { %v1177_v13 = vsel %vm1145_vm10, %v1127_v2, %v1161_v12  ;;  %v1206_v14 = vld [vmem:[#allocation2 + $0x60] ss:$2 sm:$0xff]  ;;  %v1222_v27 = vld [vmem:[#allocation2 + $0x61] ss:$2 sm:$0xff]  ;;  %v1756_v47 = vld [vmem:[#allocation10 + $0x178] sm:$0xff] }
 0x1f9   : > { %1193 = vst [vmem:[#allocation2 + $0x78] sm:$0xff] %v1177_v13  ;;  %v1295_v15 = vrot.slane %v1206_v14, 1  ;;  %v1709_v2 = vld [vmem:[#allocation10] sm:$0xff]  ;;  %v1766_v13 = vld [vmem:[#allocation10 + $0x1c8] sm:$0xff] }
 0x1fa   : > { %v1738_v34 = vld [vmem:[#allocation10 + $0xe8] sm:$0xff]  ;;  %v1721_v1 = vld [vmem:[#allocation10 + $0x60] sm:$0xff] }
 0x1fb   : > { %v1298_v33 = vsel %vm704_vm0, %v1294_v44, %v1295_v15  ;;  %v1748_v44 = vld [vmem:[#allocation10 + $0x138] sm:$0xff] }
 0x1fc   : > { %2653 = vmatprep.mubr.msk.f32.mxu1 %vm1286_vm11, %v1298_v33  ;;  %v3356_v63 = vpack.c.bf16 %v1748_v44, %v1747_v62  ;;  %v3358_v33 = vpack.c.bf16 %v1766_v13, %v1765_v11  ;;  %v1719_v62 = vld [vmem:[#allocation10 + $0x50] sm:$0xff]  ;;  %v1720_v44 = vld [vmem:[#allocation10 + $0x58] sm:$0xff] }
 0x1fd   : > { %1595 = vmatmul.mubr.f32.gmra.mrb[42].mxu1 %v1220_v16  ;;  %v1740_v13 = vld [vmem:[#allocation10 + $0xf8] sm:$0xff] }
 0x200   : > { %v1224_v8 = vld [vmem:[#allocation2 + $0x71] ss:$2 sm:$0xff]  ;;  %v1208_v21 = vld [vmem:[#allocation2 + $0x70] ss:$2 sm:$0xff] }
 0x201   : > { %v1248_v26 = vrot.slane %v1224_v8, 7  ;;  %v1296_v28 = vrot.slane %v1208_v21, 1 }
 0x203   : > { %v1256_v31 = vsel %vm607_vm1, %v1248_v26, %v1241_v25  ;;  %v1297_v22 = vsel %vm704_vm0, %v1295_v15, %v1296_v28  ;;  %v1304_v46 = vsel %vm704_vm0, %v1296_v28, %v1289_v23  ;;  %v1245_v23 = vrot.slane %v1218_v6, 7  ;;  %v1710_v6 = vld [vmem:[#allocation10 + $0x8] sm:$0xff]  ;;  %v1712_v25 = vld [vmem:[#allocation10 + $0x18] sm:$0xff] }
 0x204   : > { %2640 = vmatmul.mubr.msk.f32.vlgmr.msra.gmra.mrb[32].mxu0 %vm1233_vm12, %v1256_v31  ;;  %2654 = vmatprep.mubr.msk.f32.mxu1 %vm1287_vm13, %v1297_v22  ;;  %v3312_v12 = vpack.c.bf16 %v1710_v6, %v1709_v2  ;;  %v1750_v15 = vld [vmem:[#allocation10 + $0x148] sm:$0xff]  ;;  %v1751_v31 = vld [vmem:[#allocation10 + $0x150] sm:$0xff]  ;;  %v1752_v22 = vld [vmem:[#allocation10 + $0x158] sm:$0xff]  ;;  %v3334_v2 = vpack.c.bf16 %v1738_v34, %v1737_v0 }
 0x205   : > { %1469 = vmatprep.mubr.f32.mxu0 %v4362_v57  ;;  %1600 = vmatmul.mubr.f32.gmra.mrb[44].mxu1 %v1222_v27  ;;  %v1254_v57 = vsel %vm607_vm1, %v1242_v29, %v1243_v5  ;;  %v1252_v42 = vsel %vm607_vm1, %v1244_v30, %v1245_v23  ;;  %v1768_v29 = vld [vmem:[#allocation10 + $0x1d8] sm:$0xff]  ;;  %v1729_v5 = vld [vmem:[#allocation10 + $0xa0] sm:$0xff]  ;;  %v1722_v6 = vld [vmem:[#allocation10 + $0x68] sm:$0xff] }
 0x206   : > { %2655 = vmatprep.mubr.msk.f32.mxu1 %vm1288_vm14, %v1304_v46  ;;  %3313 = vmatpush3.bf16.msra.mxu0 %v3312_v12  ;;  %v3364_v46 = vpack.c.bf16 %v1752_v22, %v1751_v31  ;;  %v3336_v11 = vpack.c.bf16 %v1722_v6, %v1721_v1  ;;  %v1739_v12 = vld [vmem:[#allocation10 + $0xf0] sm:$0xff] }
 0x208   : > { %2641 = vmatmul.mubr.msk.f32.gmra.mrb[34].mxu0 %vm1234_vm15, %v1255_v40  ;;  %v1730_v40 = vld [vmem:[#allocation10 + $0xa8] sm:$0xff] }
 0x209   : > { %1474 = vmatprep.mubr.f32.mxu0 %v4378_v20  ;;  %1605 = vmatmul.mubr.f32.gmra.mrb[46].mxu1 %v1224_v8  ;;  %v1246_v20 = vrot.slane %v1220_v16, 7  ;;  %v3314_v8 = vpack.c.bf16 %v1728_v18, %v1727_v17  ;;  %v3318_v30 = vpack.c.bf16 %v1730_v40, %v1729_v5 }
 0x20b   : > { %v1251_v3 = vsel %vm607_vm1, %v1245_v23, %v1246_v20  ;;  %3315 = vmatprep.subr.bf16.mxu0 %v3314_v8  ;;  %v1714_v23 = vld [vmem:[#allocation10 + $0x28] sm:$0xff] }
 0x20c   : > { %2642 = vmatmul.mubr.msk.f32.gmra.mrb[36].mxu0 %vm1235_vm2, %v1254_v57  ;;  %v1713_v57 = vld [vmem:[#allocation10 + $0x20] sm:$0xff] }
 0x20d   : > { %1479 = vmatprep.mubr.f32.mxu0 %v4391_v55  ;;  %v1247_v55 = vrot.slane %v1222_v27, 7 }
 0x20f   : > { %v1250_v10 = vsel %vm607_vm1, %v1246_v20, %v1247_v55  ;;  %v1249_v4 = vsel %vm607_vm1, %v1247_v55, %v1248_v26  ;;  %v1767_v26 = vld [vmem:[#allocation10 + $0x1d0] sm:$0xff]  ;;  %v3320_v20 = vpack.c.bf16 %v1714_v23, %v1713_v57  ;;  %v1753_v55 = vld [vmem:[#allocation10 + $0x160] sm:$0xff] }
 0x210   : > { %2643 = vmatmul.mubr.msk.f32.gmra.mrb[38].mxu0 %vm1236_vm3, %v1253_v7  ;;  %v3362_v27 = vpack.c.bf16 %v1768_v29, %v1767_v26  ;;  %v1769_v7 = vld [vmem:[#allocation10 + $0x1e0] sm:$0xff] }
 0x211   : > { %1484 = vmatprep.mubr.f32.mxu0 %v4404_v24  ;;  %v1757_v24 = vld [vmem:[#allocation10 + $0x180] sm:$0xff] }
 0x212   : > { %v3342_v35 = vpack.c.bf16 %v1758_v32, %v1757_v24  ;;  %v1731_v24 = vld [vmem:[#allocation10 + $0xb0] sm:$0xff]  ;;  %v1732_v32 = vld [vmem:[#allocation10 + $0xb8] sm:$0xff] }
 0x214   : > { %2644 = vmatmul.mubr.msk.f32.gmra.mrb[40].mxu0 %vm1237_vm4, %v1252_v42  ;;  %3343 = vmatprep.subr.bf16.mxu1 %v3342_v35  ;;  %v1770_v42 = vld [vmem:[#allocation10 + $0x1e8] sm:$0xff]  ;;  %v3322_v35 = vpack.c.bf16 %v1732_v32, %v1731_v24 }
 0x215   : > { %1489 = vmatprep.mubr.f32.mxu0 %v4417_v61  ;;  %3345 = vmatpush3.bf16.msra.mxu1 %v3344_v38  ;;  %v3354_v61 = vpack.c.bf16 %v1764_v60, %v1763_v59  ;;  %v1771_v38 = vld [vmem:[#allocation10 + $0x1f0] sm:$0xff]  ;;  %v1736_v60 = vld [vmem:[#allocation10 + $0xd8] sm:$0xff] }
 0x216   : > { %3347 = vmatprep.subr.bf16.mxu1 %v3346_v45  ;;  %v1755_v45 = vld [vmem:[#allocation10 + $0x170] sm:$0xff]  ;;  %v3370_v48 = vpack.c.bf16 %v1772_v43, %v1771_v38 }
 0x217   : > { %v1735_v59 = vld [vmem:[#allocation10 + $0xd0] sm:$0xff] }
 0x218   : > { %2645 = vmatmul.mubr.msk.f32.gmra.mrb[42].mxu0 %vm1238_vm5, %v1251_v3  ;;  %v1754_v3 = vld [vmem:[#allocation10 + $0x168] sm:$0xff] }
 0x219   : > { %1494 = vmatprep.mubr.f32.mxu0 %v1206_v14  ;;  %3349 = vmatpush3.bf16.msra.mxu1 %v3348_v49  ;;  %v1749_v14 = vld [vmem:[#allocation10 + $0x140] sm:$0xff]  ;;  %v3372_v49 = vpack.c.bf16 %v1756_v47, %v1755_v45 }
 0x21a   : > { %3351 = vmatprep.subr.bf16.mxu1 %v3350_v53  ;;  %v3360_v16 = vpack.c.bf16 %v1750_v15, %v1749_v14  ;;  %v3326_v53 = vpack.c.bf16 %v1734_v51, %v1733_v50  ;;  %v1723_v14 = vld [vmem:[#allocation10 + $0x70] sm:$0xff]  ;;  %v3338_v15 = vpack.c.bf16 %v1740_v13, %v1739_v12 }
 0x21c   : > { %2646 = vmatmul.mubr.msk.f32.gmra.mrb[44].mxu0 %vm1239_vm6, %v1250_v10  ;;  %v3366_v10 = vpack.c.bf16 %v1770_v42, %v1769_v7  ;;  %v4474_v42 = vld [vmem:[%s4607_s7] ss:$0 sm:$0xff] }
 0x21d   : > { %1499 = vmatprep.mubr.f32.mxu0 %v1208_v21  ;;  %3353 = vmatpush3.bf16.msra.mxu1 %v3352_v58  ;;  %v1711_v21 = vld [vmem:[#allocation10 + $0x10] sm:$0xff]  ;;  %v3328_v58 = vpack.c.bf16 %v1718_v19, %v1717_v54 }
 0x21e   : > { %3355 = vmatprep.subr.bf16.mxu1 %v3354_v61  ;;  %v3316_v28 = vpack.c.bf16 %v1712_v25, %v1711_v21  ;;  %v3330_v61 = vpack.c.bf16 %v1736_v60, %v1735_v59 }
 0x220   : > { %2647 = vmatmul.mubr.msk.f32.gmra.mrb[46].mxu0 %vm1240_vm7, %v1249_v4  ;;  %v3368_v4 = vpack.c.bf16 %v1754_v3, %v1753_v55 }
 0x221   : > { %3357 = vmatpush3.bf16.msra.mxu1 %v3356_v63  ;;  %3317 = vmatpush3.bf16.msra.mxu0 %v3316_v28  ;;  %v3332_v63 = vpack.c.bf16 %v1720_v44, %v1719_v62 }
 0x222   : > { %3359 = vmatprep.subr.bf16.mxu1 %v3358_v33  ;;  %3319 = vmatprep.subr.bf16.mxu0 %v3318_v30  ;;  %v1724_v33 = vld [vmem:[#allocation10 + $0x78] sm:$0xff] }
 0x225   : > { %3361 = vmatpush3.bf16.msra.mxu1 %v3360_v16  ;;  %3321 = vmatpush3.bf16.msra.mxu0 %v3320_v20  ;;  %v3340_v16 = vpack.c.bf16 %v1724_v33, %v1723_v14 }
 0x226   : > { %3363 = vmatprep.subr.bf16.mxu1 %v3362_v27  ;;  %3323 = vmatprep.subr.bf16.mxu0 %v3322_v35 }
 0x229   : > { %3365 = vmatpush3.bf16.msra.mxu1 %v3364_v46  ;;  %3325 = vmatpush3.bf16.msra.mxu0 %v3324_v41 }
 0x22a   : > { %3367 = vmatprep.subr.bf16.mxu1 %v3366_v10  ;;  %3327 = vmatprep.subr.bf16.mxu0 %v3326_v53 }
 0x22d   : > { %3369 = vmatpush3.bf16.msra.mxu1 %v3368_v4  ;;  %3329 = vmatpush3.bf16.msra.mxu0 %v3328_v58 }
 0x22e   : > { %3371 = vmatprep.subr.bf16.mxu1 %v3370_v48  ;;  %3331 = vmatprep.subr.bf16.mxu0 %v3330_v61 }
 0x231   : > { %3373 = vmatpush3.bf16.msra.mxu1 %v3372_v49  ;;  %3333 = vmatpush3.bf16.msra.mxu0 %v3332_v63 }
 0x232   : > { %3335 = vmatprep.subr.bf16.mxu0 %v3334_v2 }
 0x235   : > { %3337 = vmatpush3.bf16.msra.mxu0 %v3336_v11 }
 0x236   : > { %3339 = vmatprep.subr.bf16.mxu0 %v3338_v15 }
 0x239   : > { %3341 = vmatpush3.bf16.msra.mxu0 %v3340_v16 }
 0x2a8   : > { %v2924_v17 = vpop.f32.mrb[32].mxu1 }
 0x2a9   : > { %v2925_v18 = vpop.f32.mrb[33].mxu1 }
 0x2aa   : > { %v2926_v8 = vadd.f32 %v2925_v18, %v2924_v17 }
 0x2b0   : > { %v2927_v21 = vpop.f32.mrb[34].mxu1 }
 0x2b1   : > { %v2928_v25 = vpop.f32.mrb[35].mxu1 }
 0x2b2   : > { %v2929_v26 = vadd.f32 %v2928_v25, %v2927_v21 }
 0x2b8   : > { %v2930_v28 = vpop.f32.mrb[36].mxu1 }
 0x2b9   : > { %v2931_v29 = vpop.f32.mrb[37].mxu1 }
 0x2ba   : > { %v2932_v31 = vadd.f32 %v2931_v29, %v2930_v28 }
 0x2c0   : > { %v2933_v22 = vpop.f32.mrb[38].mxu1 }
 0x2c1   : > { %v2934_v27 = vpop.f32.mrb[39].mxu1 }
 0x2c2   : > { %v2935_v46 = vadd.f32 %v2934_v27, %v2933_v22  ;;  %v1657_v22 = vand.u32 3, %v4193_v9 }
 0x2c4   : > { %vm1685_vm14 = vcmp.ne.s32.totalorder %v1657_v22, 3  ;;  %vm1661_vm4 = vcmp.ne.s32.totalorder %v1657_v22, 0 }
 0x2c8   : > { %v2936_v5 = vpop.f32.mrb[40].mxu1 }
 0x2c9   : > { %v2937_v40 = vpop.f32.mrb[41].mxu1 }
 0x2ca   : > { %v2938_v30 = vadd.f32 %v2937_v40, %v2936_v5 }
 0x2d0   : > { %v2939_v57 = vpop.f32.mrb[42].mxu1 }
 0x2d1   : > { %v2940_v23 = vpop.f32.mrb[43].mxu1 }
 0x2d2   : > { %v2941_v7 = vadd.f32 %v2940_v23, %v2939_v57 }
 0x2d7   : > { %v2868_v20 = vpop.f32.mrb[32].mxu0 }
 0x2d8   : > { %v2869_v55 = vpop.f32.mrb[33].mxu0  ;;  %v2942_v3 = vpop.f32.mrb[44].mxu1 }
 0x2d9   : > { %v2870_v10 = vadd.f32 %v2869_v55, %v2868_v20  ;;  %v2943_v4 = vpop.f32.mrb[45].mxu1 }
 0x2da   : > { %v4476_v24 = vadd.f32 %v2943_v4, %v2942_v3 }
 0x2db   : > { %v1467_v32 = vadd.f32 %v2870_v10, %v4474_v42  ;;  %v2871_v35 = vpop.f32.mrb[34].mxu0 }
 0x2dc   : > { %v2872_v36 = vpop.f32.mrb[35].mxu0  ;;  %v2945_v37 = vpop.f32.mrb[46].mxu1 }
 0x2dd   : > { %v1572_v38 = vadd.f32 %v2926_v8, %v1467_v32  ;;  %v2873_v41 = vadd.f32 %v2872_v36, %v2871_v35  ;;  %v2946_v43 = vpop.f32.mrb[47].mxu1 }
 0x2de   : > { %v4479_v45 = vadd.f32 %v2946_v43, %v2945_v37 }
 0x2df   : > { %vm1610_vm8 = vcmp.ge.f32.partialorder %v1572_v38, 0.0  ;;  %v1618_v47 = vmul.f32 0.2, %v1572_v38  ;;  %v1472_v48 = vadd.f32 %v2873_v41, %v4474_v42  ;;  %v2874_v49 = vpop.f32.mrb[36].mxu0 }
 0x2e0   : > { %v2875_v50 = vpop.f32.mrb[37].mxu0 }
 0x2e1   : > { %v1626_v51 = vsel %vm1610_vm8, %v1572_v38, %v1618_v47  ;;  %v1577_v53 = vadd.f32 %v2929_v26, %v1472_v48  ;;  %v2876_v54 = vadd.f32 %v2875_v50, %v2874_v49  ;;  %v1660_v48 = vand.u32 3, %v4231_v56 }
 0x2e2   : > { %1634 = vst [vmem:[#allocation3] sm:$0xff] %v1626_v51 }
 0x2e3   : > { %vm1611_vm9 = vcmp.ge.f32.partialorder %v1577_v53, 0.0  ;;  %v1619_v19 = vmul.f32 0.2, %v1577_v53  ;;  %v1477_v58 = vadd.f32 %v2876_v54, %v4474_v42  ;;  %v2877_v59 = vpop.f32.mrb[38].mxu0  ;;  %vm1688_vm6 = vcmp.ne.s32.totalorder %v1660_v48, 3 }
 0x2e4   : > { %v2878_v60 = vpop.f32.mrb[39].mxu0 }
 0x2e5   : > { %v1627_v61 = vsel %vm1611_vm9, %v1577_v53, %v1619_v19  ;;  %v1582_v62 = vadd.f32 %v2932_v31, %v1477_v58  ;;  %v2879_v44 = vadd.f32 %v2878_v60, %v2877_v59  ;;  %vm1664_vm9 = vcmp.ne.s32.totalorder %v1660_v48, 0 }
 0x2e6   : > { %1635 = vst [vmem:[#allocation3 + $0x8] sm:$0xff] %v1627_v61 }
 0x2e7   : > { %vm1612_vm10 = vcmp.ge.f32.partialorder %v1582_v62, 0.0  ;;  %v1620_v63 = vmul.f32 0.2, %v1582_v62  ;;  %v1482_v0 = vadd.f32 %v2879_v44, %v4474_v42  ;;  %v2880_v34 = vpop.f32.mrb[40].mxu0 }
 0x2e8   : > { %v2881_v1 = vpop.f32.mrb[41].mxu0 }
 0x2e9   : > { %v1628_v2 = vsel %vm1612_vm10, %v1582_v62, %v1620_v63  ;;  %v1587_v6 = vadd.f32 %v2935_v46, %v1482_v0  ;;  %v2882_v11 = vadd.f32 %v2881_v1, %v2880_v34  ;;  %v2013_v63 = vld [vmem:[#allocation12 + $0x80] sm:$0xff]  ;;  %v2014_v0 = vld [vmem:[#allocation12 + $0x88] sm:$0xff] }
 0x2ea   : > { %1636 = vst [vmem:[#allocation3 + $0x10] sm:$0xff] %v1628_v2  ;;  %v3374_v34 = vpack.c.bf16 %v2014_v0, %v2013_v63  ;;  %v1997_v1 = vld [vmem:[#allocation12] sm:$0xff]  ;;  %v1998_v2 = vld [vmem:[#allocation12 + $0x8] sm:$0xff]  ;;  %v2007_v0 = vld [vmem:[#allocation12 + $0x50] sm:$0xff] }
 0x2eb   : > { %vm1613_vm11 = vcmp.ge.f32.partialorder %v1587_v6, 0.0  ;;  %v1621_v12 = vmul.f32 0.2, %v1587_v6  ;;  %v1487_v13 = vadd.f32 %v2882_v11, %v4474_v42  ;;  %v2883_v14 = vpop.f32.mrb[42].mxu0  ;;  %v2045_v11 = vld [vmem:[#allocation12 + $0x180] sm:$0xff] }
 0x2ec   : > { %v2884_v15 = vpop.f32.mrb[43].mxu0  ;;  %3375 = vmatprep.subr.bf16.mxu0 %v3374_v34  ;;  %v2008_v34 = vld [vmem:[#allocation12 + $0x58] sm:$0xff] }
 0x2ed   : > { %v1629_v33 = vsel %vm1613_vm11, %v1587_v6, %v1621_v12  ;;  %v1592_v16 = vadd.f32 %v2938_v30, %v1487_v13  ;;  %v2885_v17 = vadd.f32 %v2884_v15, %v2883_v14  ;;  %v4485_v18 = vld [vmem:[#allocation3] ss:$2 sm:$0xff]  ;;  %v1650_v36 = vld [vmem:[#allocation3 + $0x1] ss:$2 sm:$0xff]  ;;  %v3376_v6 = vpack.c.bf16 %v1998_v2, %v1997_v1  ;;  %v2055_v1 = vld [vmem:[#allocation12 + $0x1d0] sm:$0xff] }
 0x2ee   : > { %1637 = vst [vmem:[#allocation3 + $0x18] sm:$0xff] %v1629_v33  ;;  %1844 = vmatprep.mubr.f32.mxu0 %v4485_v18  ;;  %v1689_v55 = vrot.slane %v4485_v18, 1  ;;  %v1665_v51 = vrot.slane %v1650_v36, 7  ;;  %v2046_v12 = vld [vmem:[#allocation12 + $0x188] sm:$0xff]  ;;  %v2029_v13 = vld [vmem:[#allocation12 + $0x100] sm:$0xff]  ;;  %v3396_v2 = vpack.c.bf16 %v2008_v34, %v2007_v0 }
 0x2ef   : > { %vm1614_vm12 = vcmp.ge.f32.partialorder %v1592_v16, 0.0  ;;  %v1622_v8 = vmul.f32 0.2, %v1592_v16  ;;  %v1492_v21 = vadd.f32 %v2885_v17, %v4474_v42  ;;  %v2886_v25 = vpop.f32.mrb[44].mxu0  ;;  %v3406_v14 = vpack.c.bf16 %v2046_v12, %v2045_v11  ;;  %v2030_v15 = vld [vmem:[#allocation12 + $0x108] sm:$0xff]  ;;  %v2016_v17 = vld [vmem:[#allocation12 + $0x98] sm:$0xff] }
 0x2f0   : > { %v2887_v26 = vpop.f32.mrb[45].mxu0  ;;  %v3408_v33 = vpack.c.bf16 %v2030_v15, %v2029_v13  ;;  %v2039_v11 = vld [vmem:[#allocation12 + $0x150] sm:$0xff]  ;;  %v2040_v12 = vld [vmem:[#allocation12 + $0x158] sm:$0xff]  ;;  %v2025_v15 = vld [vmem:[#allocation12 + $0xe0] sm:$0xff] }
 0x2f1   : > { %v1630_v28 = vsel %vm1614_vm12, %v1592_v16, %v1622_v8  ;;  %v1597_v29 = vadd.f32 %v2941_v7, %v1492_v21  ;;  %v2888_v31 = vadd.f32 %v2887_v26, %v2886_v25  ;;  %v2015_v16 = vld [vmem:[#allocation12 + $0x90] sm:$0xff]  ;;  %3407 = vmatprep.subr.bf16.mxu1 %v3406_v14  ;;  %v2000_v21 = vld [vmem:[#allocation12 + $0x18] sm:$0xff]  ;;  %v3428_v14 = vpack.c.bf16 %v2040_v12, %v2039_v11 }
 0x2f2   : > { %1638 = vst [vmem:[#allocation3 + $0x20] sm:$0xff] %v1630_v28  ;;  %v3378_v18 = vpack.c.bf16 %v2016_v17, %v2015_v16  ;;  %v1999_v8 = vld [vmem:[#allocation12 + $0x10] sm:$0xff]  ;;  %v2048_v28 = vld [vmem:[#allocation12 + $0x198] sm:$0xff]  ;;  %v2009_v16 = vld [vmem:[#allocation12 + $0x60] sm:$0xff] }
 0x2f3   : > { %vm1615_vm13 = vcmp.ge.f32.partialorder %v1597_v29, 0.0  ;;  %v1623_v27 = vmul.f32 0.2, %v1597_v29  ;;  %v1497_v46 = vadd.f32 %v2888_v31, %v4474_v42  ;;  %v2889_v5 = vpop.f32.mrb[46].mxu0  ;;  %v2047_v25 = vld [vmem:[#allocation12 + $0x190] sm:$0xff]  ;;  %v3380_v26 = vpack.c.bf16 %v2000_v21, %v1999_v8  ;;  %v2032_v31 = vld [vmem:[#allocation12 + $0x118] sm:$0xff] }
 0x2f4   : > { %v2890_v40 = vpop.f32.mrb[47].mxu0  ;;  %v3410_v22 = vpack.c.bf16 %v2048_v28, %v2047_v25  ;;  %v2057_v8 = vld [vmem:[#allocation12 + $0x1e0] sm:$0xff]  ;;  %v2058_v21 = vld [vmem:[#allocation12 + $0x1e8] sm:$0xff] }
 0x2f5   : > { %v1631_v30 = vsel %vm1615_vm13, %v1597_v29, %v1623_v27  ;;  %v1602_v57 = vadd.f32 %v4476_v24, %v1497_v46  ;;  %v2891_v23 = vadd.f32 %v2890_v40, %v2889_v5  ;;  %v1644_v20 = vld [vmem:[#allocation3 + $0x10] ss:$2 sm:$0xff]  ;;  %v1658_v24 = vand.u32 3, %v4211_v39  ;;  %v1652_v47 = vld [vmem:[#allocation3 + $0x11] ss:$2 sm:$0xff]  ;;  %v2017_v46 = vld [vmem:[#allocation12 + $0xa0] sm:$0xff] }
 0x2f6   : > { %1639 = vst [vmem:[#allocation3 + $0x28] sm:$0xff] %v1631_v30  ;;  %v1690_v7 = vrot.slane %v1644_v20, 1  ;;  %v1666_v19 = vrot.slane %v1652_v47, 7  ;;  %v2031_v29 = vld [vmem:[#allocation12 + $0x110] sm:$0xff]  ;;  %v2018_v5 = vld [vmem:[#allocation12 + $0xa8] sm:$0xff]  ;;  %v2001_v30 = vld [vmem:[#allocation12 + $0x20] sm:$0xff] }
 0x2f7   : > { %vm1616_vm15 = vcmp.ge.f32.partialorder %v1602_v57, 0.0  ;;  %v1624_v3 = vmul.f32 0.2, %v1602_v57  ;;  %v1502_v10 = vadd.f32 %v2891_v23, %v4474_v42  ;;  %vm1686_vm3 = vcmp.ne.s32.totalorder %v1658_v24, 3  ;;  %v2049_v23 = vld [vmem:[#allocation12 + $0x1a0] sm:$0xff] }
 0x2f8   : > { %v1695_v4 = vsel %vm704_vm0, %v1689_v55, %v1690_v7  ;;  %vm1662_vm7 = vcmp.ne.s32.totalorder %v1658_v24, 0  ;;  %v1671_v61 = vsel %vm607_vm1, %v1665_v51, %v1666_v19  ;;  %v3412_v27 = vpack.c.bf16 %v2032_v31, %v2031_v29  ;;  %v2003_v24 = vld [vmem:[#allocation12 + $0x30] sm:$0xff]  ;;  %v2041_v28 = vld [vmem:[#allocation12 + $0x160] sm:$0xff]  ;;  %v2042_v29 = vld [vmem:[#allocation12 + $0x168] sm:$0xff] }
 0x2f9   : > { %v1632_v32 = vsel %vm1616_vm15, %v1602_v57, %v1624_v3  ;;  %v1607_v35 = vadd.f32 %v4479_v45, %v1502_v10  ;;  %2661 = vmatprep.mubr.msk.f32.mxu1 %vm1685_vm14, %v1695_v4  ;;  %v1659_v45 = vand.u32 3, %v4225_v52  ;;  %v3382_v40 = vpack.c.bf16 %v2018_v5, %v2017_v46  ;;  %v2002_v57 = vld [vmem:[#allocation12 + $0x28] sm:$0xff]  ;;  %v2027_v31 = vld [vmem:[#allocation12 + $0xf0] sm:$0xff]  ;;  %v2012_v5 = vld [vmem:[#allocation12 + $0x78] sm:$0xff] }
 0x2fa   : > { %1640 = vst [vmem:[#allocation3 + $0x30] sm:$0xff] %v1632_v32  ;;  %1930 = vmatmul.mubr.f32.vlgmr.msra.gmra.mrb[48].mxu1 %v1650_v36  ;;  %v2034_v3 = vld [vmem:[#allocation12 + $0x128] sm:$0xff]  ;;  %v2019_v32 = vld [vmem:[#allocation12 + $0xb0] sm:$0xff] }
 0x2fb   : > { %vm1617_vm2 = vcmp.ge.f32.partialorder %v1607_v35, 0.0  ;;  %v1625_v37 = vmul.f32 0.2, %v1607_v35  ;;  %vm1687_vm5 = vcmp.ne.s32.totalorder %v1659_v45, 3  ;;  %vm1663_vm8 = vcmp.ne.s32.totalorder %v1659_v45, 0  ;;  %3409 = vmatpush3.bf16.msra.mxu1 %v3408_v33  ;;  %v2026_v33 = vld [vmem:[#allocation12 + $0xe8] sm:$0xff] }
 0x2fc   : > { %3411 = vmatprep.subr.bf16.mxu1 %v3410_v22  ;;  %v3398_v17 = vpack.c.bf16 %v2026_v33, %v2025_v15  ;;  %v3432_v22 = vpack.c.bf16 %v2042_v29, %v2041_v28  ;;  %v2011_v46 = vld [vmem:[#allocation12 + $0x70] sm:$0xff]  ;;  %v1971_v29 = vand.u32 1, %v4193_v9 }
 0x2fd   : > { %v1633_v38 = vsel %vm1617_vm2, %v1607_v35, %v1625_v37  ;;  %v1646_v41 = vld [vmem:[#allocation3 + $0x20] ss:$2 sm:$0xff]  ;;  %v1654_v52 = vld [vmem:[#allocation3 + $0x21] ss:$2 sm:$0xff]  ;;  %v2020_v35 = vld [vmem:[#allocation12 + $0xb8] sm:$0xff] }
 0x2fe   : > { %1641 = vst [vmem:[#allocation3 + $0x38] sm:$0xff] %v1633_v38  ;;  %v1691_v43 = vrot.slane %v1646_v41, 1  ;;  %v1667_v60 = vrot.slane %v1654_v52, 7  ;;  %v3386_v36 = vpack.c.bf16 %v2020_v35, %v2019_v32  ;;  %v2004_v37 = vld [vmem:[#allocation12 + $0x38] sm:$0xff]  ;;  %v2051_v38 = vld [vmem:[#allocation12 + $0x1b0] sm:$0xff]  ;;  %v2244_v32 = vld [vmem:[#allocation13 + $0x80] sm:$0xff] }
 0x2ff   : > { %3413 = vmatpush3.bf16.msra.mxu1 %v3412_v27  ;;  %v2028_v27 = vld [vmem:[#allocation12 + $0xf8] sm:$0xff]  ;;  %vm4519_vm14 = vcmp.ne.s32.totalorder %v1971_v29, 0  ;;  %vm4523_vm15 = vcmp.ne.s32.totalorder %v1971_v29, 1 }
 0x300   : > { %v1694_v42 = vsel %vm704_vm0, %v1690_v7, %v1691_v43  ;;  %v1670_v62 = vsel %vm607_vm1, %v1666_v19, %v1667_v60  ;;  %v2033_v7 = vld [vmem:[#allocation12 + $0x120] sm:$0xff] }
 0x301   : > { %2662 = vmatprep.mubr.msk.f32.mxu1 %vm1686_vm3, %v1694_v42  ;;  %v3416_v4 = vpack.c.bf16 %v2034_v3, %v2033_v7  ;;  %v2035_v42 = vld [vmem:[#allocation12 + $0x130] sm:$0xff]  ;;  %v2053_v19 = vld [vmem:[#allocation12 + $0x1c0] sm:$0xff]  ;;  %v2044_v7 = vld [vmem:[#allocation12 + $0x178] sm:$0xff] }
 0x302   : > { %1935 = vmatmul.mubr.f32.gmra.mrb[50].mxu1 %v1652_v47  ;;  %v2036_v47 = vld [vmem:[#allocation12 + $0x138] sm:$0xff] }
 0x303   : > { %v3420_v48 = vpack.c.bf16 %v2036_v47, %v2035_v42 }
 0x305   : > { %v1656_v49 = vld [vmem:[#allocation3 + $0x31] ss:$2 sm:$0xff]  ;;  %v1648_v50 = vld [vmem:[#allocation3 + $0x30] ss:$2 sm:$0xff] }
 0x306   : > { %v1668_v53 = vrot.slane %v1656_v49, 7  ;;  %v1692_v54 = vrot.slane %v1648_v50, 1 }
 0x308   : > { %v1672_v58 = vsel %vm607_vm1, %v1668_v53, %v1665_v51  ;;  %v1693_v59 = vsel %vm704_vm0, %v1691_v43, %v1692_v54  ;;  %v1696_v56 = vsel %vm704_vm0, %v1692_v54, %v1689_v55  ;;  %v1669_v44 = vsel %vm607_vm1, %v1667_v60, %v1668_v53  ;;  %v2050_v55 = vld [vmem:[#allocation12 + $0x1a8] sm:$0xff]  ;;  %v2052_v43 = vld [vmem:[#allocation12 + $0x1b8] sm:$0xff]  ;;  %v2005_v53 = vld [vmem:[#allocation12 + $0x40] sm:$0xff] }
 0x309   : > { %2657 = vmatmul.mubr.msk.f32.vlgmr.msra.gmra.mrb[48].mxu0 %vm1661_vm4, %v1672_v58  ;;  %2663 = vmatprep.mubr.msk.f32.mxu1 %vm1687_vm5, %v1693_v59  ;;  %v3414_v10 = vpack.c.bf16 %v2050_v55, %v2049_v23  ;;  %v3418_v45 = vpack.c.bf16 %v2052_v43, %v2051_v38  ;;  %v2006_v54 = vld [vmem:[#allocation12 + $0x48] sm:$0xff]  ;;  %v2060_v23 = vld [vmem:[#allocation12 + $0x1f8] sm:$0xff] }
 0x30a   : > { %1849 = vmatprep.mubr.f32.mxu0 %v1644_v20  ;;  %1940 = vmatmul.mubr.f32.gmra.mrb[52].mxu1 %v1654_v52  ;;  %v3384_v20 = vpack.c.bf16 %v2002_v57, %v2001_v30  ;;  %v3392_v58 = vpack.c.bf16 %v2006_v54, %v2005_v53  ;;  %v2054_v59 = vld [vmem:[#allocation12 + $0x1c8] sm:$0xff]  ;;  %v2037_v52 = vld [vmem:[#allocation12 + $0x140] sm:$0xff]  ;;  %v3404_v30 = vpack.c.bf16 %v2012_v5, %v2011_v46  ;;  %v2059_v57 = vld [vmem:[#allocation12 + $0x1f0] sm:$0xff] }
 0x30b   : > { %2664 = vmatprep.mubr.msk.f32.mxu1 %vm1688_vm6, %v1696_v56  ;;  %3377 = vmatpush3.bf16.msra.mxu0 %v3376_v6  ;;  %v2038_v56 = vld [vmem:[#allocation12 + $0x148] sm:$0xff]  ;;  %v3422_v60 = vpack.c.bf16 %v2054_v59, %v2053_v19  ;;  %v2056_v6 = vld [vmem:[#allocation12 + $0x1d8] sm:$0xff]  ;;  %v3434_v55 = vpack.c.bf16 %v2060_v23, %v2059_v57  ;;  %v2278_v57 = vld [vmem:[#allocation13 + $0x190] sm:$0xff] }
 0x30c   : > { %3379 = vmatprep.subr.bf16.mxu0 %v3378_v18  ;;  %3415 = vmatprep.subr.bf16.mxu1 %v3414_v10  ;;  %v3426_v13 = vpack.c.bf16 %v2056_v6, %v2055_v1  ;;  %v2010_v18 = vld [vmem:[#allocation12 + $0x68] sm:$0xff]  ;;  %v2276_v10 = vld [vmem:[#allocation13 + $0x180] sm:$0xff] }
 0x30d   : > { %2658 = vmatmul.mubr.msk.f32.gmra.mrb[50].mxu0 %vm1662_vm7, %v1671_v61  ;;  %3417 = vmatpush3.bf16.msra.mxu1 %v3416_v4  ;;  %v3424_v61 = vpack.c.bf16 %v2038_v56, %v2037_v52  ;;  %v3400_v25 = vpack.c.bf16 %v2010_v18, %v2009_v16  ;;  %v2277_v4 = vld [vmem:[#allocation13 + $0x188] sm:$0xff] }
 0x30e   : > { %1854 = vmatprep.mubr.f32.mxu0 %v1646_v41  ;;  %1945 = vmatmul.mubr.f32.gmra.mrb[54].mxu1 %v1656_v49  ;;  %v3388_v41 = vpack.c.bf16 %v2004_v37, %v2003_v24  ;;  %v2021_v49 = vld [vmem:[#allocation12 + $0xc0] sm:$0xff]  ;;  %v3470_v35 = vpack.c.bf16 %v2277_v4, %v2276_v10  ;;  %v2261_v46 = vld [vmem:[#allocation13 + $0x108] sm:$0xff] }
 0x30f   : > { %3381 = vmatpush3.bf16.msra.mxu0 %v3380_v26  ;;  %3419 = vmatprep.subr.bf16.mxu1 %v3418_v45  ;;  %v3430_v26 = vpack.c.bf16 %v2058_v21, %v2057_v8 }
 0x310   : > { %3383 = vmatprep.subr.bf16.mxu0 %v3382_v40  ;;  %v3402_v40 = vpack.c.bf16 %v2028_v27, %v2027_v31  ;;  %v2260_v27 = vld [vmem:[#allocation13 + $0x100] sm:$0xff] }
 0x311   : > { %2659 = vmatmul.mubr.msk.f32.gmra.mrb[52].mxu0 %vm1663_vm8, %v1670_v62  ;;  %3421 = vmatpush3.bf16.msra.mxu1 %v3420_v48  ;;  %v2023_v62 = vld [vmem:[#allocation12 + $0xd0] sm:$0xff]  ;;  %v2656_v48 = vld [vmem:[%s4608_s8] ss:$0 sm:$0xff] }
 0x312   : > { %1859 = vmatprep.mubr.f32.mxu0 %v1648_v50  ;;  %v2022_v50 = vld [vmem:[#allocation12 + $0xc8] sm:$0xff]  ;;  %3423 = vmatprep.subr.bf16.mxu1 %v3422_v60 }
 0x313   : > { %3385 = vmatpush3.bf16.msra.mxu0 %v3384_v20  ;;  %v3390_v51 = vpack.c.bf16 %v2022_v50, %v2021_v49  ;;  %v2043_v20 = vld [vmem:[#allocation12 + $0x170] sm:$0xff] }
 0x314   : > { %3387 = vmatprep.subr.bf16.mxu0 %v3386_v36  ;;  %v3436_v3 = vpack.c.bf16 %v2044_v7, %v2043_v20  ;;  %v2245_v36 = vld [vmem:[#allocation13 + $0x88] sm:$0xff]  ;;  %v2279_v7 = vld [vmem:[#allocation13 + $0x198] sm:$0xff] }
 0x315   : > { %2660 = vmatmul.mubr.msk.f32.gmra.mrb[54].mxu0 %vm1664_vm9, %v1669_v44  ;;  %v2024_v44 = vld [vmem:[#allocation12 + $0xd8] sm:$0xff]  ;;  %3425 = vmatpush3.bf16.msra.mxu1 %v3424_v61  ;;  %v3438_v24 = vpack.c.bf16 %v2245_v36, %v2244_v32  ;;  %v2246_v32 = vld [vmem:[#allocation13 + $0x90] sm:$0xff]  ;;  %v2289_v36 = vld [vmem:[#allocation13 + $0x1e8] sm:$0xff] }
 0x316   : > { %v3394_v63 = vpack.c.bf16 %v2024_v44, %v2023_v62  ;;  %3427 = vmatprep.subr.bf16.mxu1 %v3426_v13 }
 0x317   : > { %3389 = vmatpush3.bf16.msra.mxu0 %v3388_v41 }
 0x318   : > { %3391 = vmatprep.subr.bf16.mxu0 %v3390_v51 }
 0x319   : > { %3429 = vmatpush3.bf16.msra.mxu1 %v3428_v14 }
 0x31a   : > { %3431 = vmatprep.subr.bf16.mxu1 %v3430_v26 }
 0x31b   : > { %3393 = vmatpush3.bf16.msra.mxu0 %v3392_v58 }
 0x31c   : > { %3395 = vmatprep.subr.bf16.mxu0 %v3394_v63 }
 0x31d   : > { %3433 = vmatpush3.bf16.msra.mxu1 %v3432_v22  ;;  %v1972_v22 = vand.u32 1, %v4211_v39 }
 0x31e   : > { %3435 = vmatprep.subr.bf16.mxu1 %v3434_v55  ;;  %v2270_v55 = vld [vmem:[#allocation13 + $0x150] sm:$0xff] }
 0x31f   : > { %3397 = vmatpush3.bf16.msra.mxu0 %v3396_v2  ;;  %vm4527_vm2 = vcmp.ne.s32.totalorder %v1972_v22, 1  ;;  %vm1974_vm3 = vcmp.ne.s32.totalorder %v1972_v22, 0  ;;  %v2236_v22 = vld [vmem:[#allocation13 + $0x40] sm:$0xff] }
 0x320   : > { %3399 = vmatprep.subr.bf16.mxu0 %v3398_v17 }
 0x321   : > { %3437 = vmatpush3.bf16.msra.mxu1 %v3436_v3 }
 0x322   : > { %3471 = vmatprep.subr.bf16.mxu1 %v3470_v35  ;;  %v2247_v35 = vld [vmem:[#allocation13 + $0x98] sm:$0xff] }
 0x323   : > { %3401 = vmatpush3.bf16.msra.mxu0 %v3400_v25 }
 0x324   : > { %3403 = vmatprep.subr.bf16.mxu0 %v3402_v40  ;;  %v2228_v40 = vld [vmem:[#allocation13] sm:$0xff] }
 0x327   : > { %3405 = vmatpush3.bf16.msra.mxu0 %v3404_v30  ;;  %v2229_v30 = vld [vmem:[#allocation13 + $0x8] sm:$0xff] }
 0x328   : > { %3439 = vmatprep.subr.bf16.mxu0 %v3438_v24  ;;  %v3472_v24 = vpack.c.bf16 %v2261_v46, %v2260_v27  ;;  %v2237_v27 = vld [vmem:[#allocation13 + $0x48] sm:$0xff] }
 0x329   : > { %v3456_v5 = vpack.c.bf16 %v2237_v27, %v2236_v22 }
 0x3cd   : > { %v3024_v37 = vpop.f32.mrb[48].mxu1 }
 0x3ce   : > { %v3025_v38 = vpop.f32.mrb[49].mxu1 }
 0x3cf   : > { %v3026_v41 = vadd.f32 %v3025_v38, %v3024_v37 }
 0x3d5   : > { %v3027_v43 = vpop.f32.mrb[50].mxu1 }
 0x3d6   : > { %v3028_v42 = vpop.f32.mrb[51].mxu1 }
 0x3d7   : > { %v3029_v47 = vadd.f32 %v3028_v42, %v3027_v43  ;;  %v3474_v43 = vpack.c.bf16 %v2279_v7, %v2278_v57  ;;  %v2262_v42 = vld [vmem:[#allocation13 + $0x110] sm:$0xff] }
 0x3dc   : > { %v2980_v45 = vpop.f32.mrb[48].mxu0 }
 0x3dd   : > { %v2981_v49 = vpop.f32.mrb[49].mxu0  ;;  %v3030_v50 = vpop.f32.mrb[52].mxu1 }
 0x3de   : > { %v2982_v51 = vadd.f32 %v2981_v49, %v2980_v45  ;;  %v3031_v53 = vpop.f32.mrb[53].mxu1  ;;  %v2230_v45 = vld [vmem:[#allocation13 + $0x10] sm:$0xff]  ;;  %v2231_v49 = vld [vmem:[#allocation13 + $0x18] sm:$0xff] }
 0x3df   : > { %v3032_v54 = vadd.f32 %v3031_v53, %v3030_v50  ;;  %v2280_v50 = vld [vmem:[#allocation13 + $0x1a0] sm:$0xff] }
 0x3e0   : > { %v1847_v19 = vadd.f32 %v2982_v51, %v2656_v48  ;;  %v2983_v58 = vpop.f32.mrb[50].mxu0  ;;  %v2281_v51 = vld [vmem:[#allocation13 + $0x1a8] sm:$0xff] }
 0x3e1   : > { %v2984_v59 = vpop.f32.mrb[51].mxu0  ;;  %v3033_v52 = vpop.f32.mrb[54].mxu1 }
 0x3e2   : > { %v1932_v56 = vadd.f32 %v3026_v41, %v1847_v19  ;;  %v2985_v60 = vadd.f32 %v2984_v59, %v2983_v58  ;;  %v3034_v61 = vpop.f32.mrb[55].mxu1  ;;  %v3440_v41 = vpack.c.bf16 %v2229_v30, %v2228_v40  ;;  %v3444_v58 = vpack.c.bf16 %v2231_v49, %v2230_v45  ;;  %v2286_v40 = vld [vmem:[#allocation13 + $0x1d0] sm:$0xff]  ;;  %v2287_v30 = vld [vmem:[#allocation13 + $0x1d8] sm:$0xff]  ;;  %v2241_v45 = vld [vmem:[#allocation13 + $0x68] sm:$0xff] }
 0x3e3   : > { %v3035_v62 = vadd.f32 %v3034_v61, %v3033_v52  ;;  %v3478_v59 = vpack.c.bf16 %v2281_v51, %v2280_v50  ;;  %v2248_v52 = vld [vmem:[#allocation13 + $0xa0] sm:$0xff]  ;;  %v3490_v57 = vpack.c.bf16 %v2287_v30, %v2286_v40  ;;  %v2290_v50 = vld [vmem:[#allocation13 + $0x1f0] sm:$0xff]  ;;  %v2291_v51 = vld [vmem:[#allocation13 + $0x1f8] sm:$0xff] }
 0x3e4   : > { %vm1950_vm10 = vcmp.ge.f32.partialorder %v1932_v56, 0.0  ;;  %v1954_v44 = vmul.f32 0.2, %v1932_v56  ;;  %v1852_v63 = vadd.f32 %v2985_v60, %v2656_v48  ;;  %v2986_v0 = vpop.f32.mrb[52].mxu0  ;;  %v2264_v60 = vld [vmem:[#allocation13 + $0x120] sm:$0xff] }
 0x3e5   : > { %v2987_v34 = vpop.f32.mrb[53].mxu0  ;;  %v2670_v40 = vld [vmem:[%s4645_s25] ss:$0 sm:$0xff] }
 0x3e6   : > { %v1958_v1 = vsel %vm1950_vm10, %v1932_v56, %v1954_v44  ;;  %v1937_v2 = vadd.f32 %v3029_v47, %v1852_v63  ;;  %v2988_v6 = vadd.f32 %v2987_v34, %v2986_v0  ;;  %v2263_v47 = vld [vmem:[#allocation13 + $0x118] sm:$0xff]  ;;  %v2249_v56 = vld [vmem:[#allocation13 + $0xa8] sm:$0xff]  ;;  %v2232_v44 = vld [vmem:[#allocation13 + $0x20] sm:$0xff] }
 0x3e7   : > { %1962 = vst [vmem:[#allocation2] sm:$0xff] %v1958_v1  ;;  %v3446_v61 = vpack.c.bf16 %v2249_v56, %v2248_v52  ;;  %v2233_v63 = vld [vmem:[#allocation13 + $0x28] sm:$0xff]  ;;  %v2282_v34 = vld [vmem:[#allocation13 + $0x1b0] sm:$0xff]  ;;  %v2283_v1 = vld [vmem:[#allocation13 + $0x1b8] sm:$0xff]  ;;  %v3860_v52 = vmov 0.0  }
 0x3e8   : > { %vm1951_vm11 = vcmp.ge.f32.partialorder %v1937_v2, 0.0  ;;  %v1955_v11 = vmul.f32 0.2, %v1937_v2  ;;  %v1857_v12 = vadd.f32 %v2988_v6, %v2656_v48  ;;  %v2989_v13 = vpop.f32.mrb[54].mxu0  ;;  %v3448_v9 = vpack.c.bf16 %v2233_v63, %v2232_v44  ;;  %v2250_v6 = vld [vmem:[#allocation13 + $0xb0] sm:$0xff] }
 0x3e9   : > { %v2990_v14 = vpop.f32.mrb[55].mxu0 }
 0x3ea   : > { %v1959_v15 = vsel %vm1951_vm11, %v1937_v2, %v1955_v11  ;;  %v1942_v33 = vadd.f32 %v3032_v54, %v1857_v12  ;;  %v2991_v16 = vadd.f32 %v2990_v14, %v2989_v13  ;;  %v3476_v54 = vpack.c.bf16 %v2263_v47, %v2262_v42  ;;  %v2251_v11 = vld [vmem:[#allocation13 + $0xb8] sm:$0xff]  ;;  %v2266_v12 = vld [vmem:[#allocation13 + $0x130] sm:$0xff]  ;;  %v2273_v42 = vld [vmem:[#allocation13 + $0x168] sm:$0xff] }
 0x3eb   : > { %1963 = vst [vmem:[#allocation2 + $0x8] sm:$0xff] %v1959_v15  ;;  %v3482_v2 = vpack.c.bf16 %v2283_v1, %v2282_v34  ;;  %v3450_v13 = vpack.c.bf16 %v2251_v11, %v2250_v6  ;;  %v2267_v14 = vld [vmem:[#allocation13 + $0x138] sm:$0xff]  ;;  %v2234_v15 = vld [vmem:[#allocation13 + $0x30] sm:$0xff]  ;;  %v2240_v47 = vld [vmem:[#allocation13 + $0x60] sm:$0xff] }
 0x3ec   : > { %vm1952_vm12 = vcmp.ge.f32.partialorder %v1942_v33, 0.0  ;;  %v1956_v17 = vmul.f32 0.2, %v1942_v33  ;;  %v1862_v18 = vadd.f32 %v2991_v16, %v2656_v48  ;;  %v3442_v48 = vpack.c.bf16 %v2247_v35, %v2246_v32  ;;  %v2288_v35 = vld [vmem:[#allocation13 + $0x1e0] sm:$0xff] }
 0x3ed   : > { %v3484_v16 = vpack.c.bf16 %v2267_v14, %v2266_v12  ;;  %v3464_v49 = vpack.c.bf16 %v2241_v45, %v2240_v47 }
 0x3ee   : > { %v1960_v8 = vsel %vm1952_vm12, %v1942_v33, %v1956_v17  ;;  %v1947_v21 = vadd.f32 %v3035_v62, %v1862_v18  ;;  %v2265_v62 = vld [vmem:[#allocation13 + $0x128] sm:$0xff]  ;;  %v2235_v33 = vld [vmem:[#allocation13 + $0x38] sm:$0xff]  ;;  %v2284_v18 = vld [vmem:[#allocation13 + $0x1c0] sm:$0xff] }
 0x3ef   : > { %1964 = vst [vmem:[#allocation2 + $0x10] sm:$0xff] %v1960_v8  ;;  %v3480_v0 = vpack.c.bf16 %v2265_v62, %v2264_v60  ;;  %v3452_v17 = vpack.c.bf16 %v2235_v33, %v2234_v15  ;;  %v2285_v8 = vld [vmem:[#allocation13 + $0x1c8] sm:$0xff]  ;;  %v2243_v62 = vld [vmem:[#allocation13 + $0x78] sm:$0xff] }
 0x3f0   : > { %vm1953_vm13 = vcmp.ge.f32.partialorder %v1947_v21, 0.0  ;;  %v1957_v25 = vmul.f32 0.2, %v1947_v21 }
 0x3f2   : > { %v1961_v26 = vsel %vm1953_vm13, %v1947_v21, %v1957_v25  ;;  %v1966_v28 = vld [vmem:[#allocation2] ss:$2 sm:$0xff]  ;;  %v1969_v31 = vld [vmem:[#allocation2 + $0x1] ss:$2 sm:$0xff]  ;;  %v3486_v21 = vpack.c.bf16 %v2285_v8, %v2284_v18 }
 0x3f3   : > { %1965 = vst [vmem:[#allocation2 + $0x18] sm:$0xff] %v1961_v26  ;;  %2132 = vmatprep.mubr.f32.mxu0 %v1966_v28  ;;  %v1987_v3 = vrot.slane %v1966_v28, 1  ;;  %v1975_v10 = vrot.slane %v1969_v31, 7  ;;  %v2252_v25 = vld [vmem:[#allocation13 + $0xc0] sm:$0xff]  ;;  %v2253_v26 = vld [vmem:[#allocation13 + $0xc8] sm:$0xff] }
 0x3f4   : > { %v2268_v28 = vld [vmem:[#allocation13 + $0x140] sm:$0xff]  ;;  %v3454_v29 = vpack.c.bf16 %v2253_v26, %v2252_v25 }
 0x3fa   : > { %v1970_v23 = vld [vmem:[#allocation2 + $0x11] ss:$2 sm:$0xff]  ;;  %v1968_v20 = vld [vmem:[#allocation2 + $0x10] ss:$2 sm:$0xff] }
 0x3fb   : > { %v1976_v4 = vrot.slane %v1970_v23, 7  ;;  %v1988_v39 = vrot.slane %v1968_v20, 1 }
 0x3fd   : > { %v1978_v37 = vsel %vm607_vm1, %v1976_v4, %v1975_v10  ;;  %v1989_v38 = vsel %vm704_vm0, %v1987_v3, %v1988_v39  ;;  %v1990_v53 = vsel %vm704_vm0, %v1988_v39, %v1987_v3  ;;  %v1977_v19 = vsel %vm607_vm1, %v1975_v10, %v1976_v4  ;;  %v2271_v3 = vld [vmem:[#allocation13 + $0x158] sm:$0xff]  ;;  %v2238_v10 = vld [vmem:[#allocation13 + $0x50] sm:$0xff] }
 0x3fe   : > { %2666 = vmatmul.mubr.msk.f32.vlgmr.msra.gmra.mrb[56].mxu0 %vm4519_vm14, %v1978_v37  ;;  %2668 = vmatprep.mubr.msk.f32.mxu1 %vm4523_vm15, %v1989_v38  ;;  %v2239_v4 = vld [vmem:[#allocation13 + $0x58] sm:$0xff]  ;;  %v3492_v39 = vpack.c.bf16 %v2271_v3, %v2270_v55  ;;  %v2256_v37 = vld [vmem:[#allocation13 + $0xe0] sm:$0xff]  ;;  %v2257_v38 = vld [vmem:[#allocation13 + $0xe8] sm:$0xff] }
 0x3ff   : > { %2137 = vmatprep.mubr.f32.mxu0 %v1968_v20  ;;  %2208 = vmatmul.mubr.f32.vlgmr.msra.gmra.mrb[56].mxu1 %v1969_v31  ;;  %v2269_v31 = vld [vmem:[#allocation13 + $0x148] sm:$0xff]  ;;  %v2255_v20 = vld [vmem:[#allocation13 + $0xd8] sm:$0xff]  ;;  %v3460_v32 = vpack.c.bf16 %v2239_v4, %v2238_v10 }
 0x400   : > { %2669 = vmatprep.mubr.msk.f32.mxu1 %vm4527_vm2, %v1990_v53  ;;  %3473 = vmatpush3.bf16.msra.mxu1 %v3472_v24  ;;  %v3488_v46 = vpack.c.bf16 %v2269_v31, %v2268_v28  ;;  %v3494_v24 = vpack.c.bf16 %v2289_v36, %v2288_v35  ;;  %v2258_v53 = vld [vmem:[#allocation13 + $0xf0] sm:$0xff] }
 0x401   : > { %3441 = vmatpush3.bf16.msra.mxu0 %v3440_v41  ;;  %3475 = vmatprep.subr.bf16.mxu1 %v3474_v43  ;;  %v2272_v41 = vld [vmem:[#allocation13 + $0x160] sm:$0xff]  ;;  %v3462_v43 = vpack.c.bf16 %v2257_v38, %v2256_v37 }
 0x402   : > { %2667 = vmatmul.mubr.msk.f32.gmra.mrb[58].mxu0 %vm1974_vm3, %v1977_v19  ;;  %3443 = vmatprep.subr.bf16.mxu0 %v3442_v48  ;;  %v3496_v48 = vpack.c.bf16 %v2273_v42, %v2272_v41  ;;  %v2259_v19 = vld [vmem:[#allocation13 + $0xf8] sm:$0xff] }
 0x403   : > { %2213 = vmatmul.mubr.f32.gmra.mrb[58].mxu1 %v1970_v23  ;;  %v2254_v23 = vld [vmem:[#allocation13 + $0xd0] sm:$0xff]  ;;  %v3466_v56 = vpack.c.bf16 %v2259_v19, %v2258_v53 }
 0x404   : > { %3477 = vmatpush3.bf16.msra.mxu1 %v3476_v54  ;;  %v3458_v7 = vpack.c.bf16 %v2255_v20, %v2254_v23  ;;  %v3498_v54 = vpack.c.bf16 %v2291_v51, %v2290_v50  ;;  %2433 = vmatprep.mubr.f32.mxu1 %v3860_v52 }
 0x405   : > { %3445 = vmatpush3.bf16.msra.mxu0 %v3444_v58  ;;  %3479 = vmatprep.subr.bf16.mxu1 %v3478_v59  ;;  %v2274_v58 = vld [vmem:[#allocation13 + $0x170] sm:$0xff]  ;;  %v2275_v59 = vld [vmem:[#allocation13 + $0x178] sm:$0xff] }
 0x406   : > { %3447 = vmatprep.subr.bf16.mxu0 %v3446_v61  ;;  %v3500_v60 = vpack.c.bf16 %v2275_v59, %v2274_v58  ;;  %v2242_v61 = vld [vmem:[#allocation13 + $0x70] sm:$0xff] }
 0x407   : > { %v3468_v44 = vpack.c.bf16 %v2243_v62, %v2242_v61 }
 0x408   : > { %3481 = vmatpush3.bf16.msra.mxu1 %v3480_v0  ;;  %v2665_v0 = vld [vmem:[%s4644_s22] ss:$0 sm:$0xff]  ;;  %s3772_s22 = scalar_lea.vmem %s4558_s13, 128 }
 0x409   : > { %3449 = vmatpush3.bf16.msra.mxu0 %v3448_v9  ;;  %3483 = vmatprep.subr.bf16.mxu1 %v3482_v2  ;;  %p3773_p7 = scmp.ne.s32.totalorder %s4558_s13, %s3772_s22  ;;  %p3780_p0 = scmp.lt.s32.totalorder %s3778_s29, %s3772_s22 }
 0x40a   : > { %3451 = vmatprep.subr.bf16.mxu0 %v3450_v13 }
 0x40b   : > { %p3774_p12 = pnand %p3773_p7, %p4647_p4  ;;  %p3781_p2 = por %p3780_p0, %p3779_p13 }
 0x40c   : > { %3485 = vmatpush3.bf16.msra.mxu1 %v3484_v16 }
 0x40d   : > { %3453 = vmatpush3.bf16.msra.mxu0 %v3452_v17  ;;  %3487 = vmatprep.subr.bf16.mxu1 %v3486_v21  ;;  %p3775_p1 = pneg %p3774_p12 }
 0x40e   : > { %3455 = vmatprep.subr.bf16.mxu0 %v3454_v29 }
 0x40f   : > { %p3782_p8 = pnand %p3781_p2, %p3775_p1 }
 0x410   : > { %3489 = vmatpush3.bf16.msra.mxu1 %v3488_v46 }
 0x411   : > { %3457 = vmatpush3.bf16.msra.mxu0 %v3456_v5  ;;  %3491 = vmatprep.subr.bf16.mxu1 %v3490_v57 }
 0x412   : > { %3459 = vmatprep.subr.bf16.mxu0 %v3458_v7 }
 0x414   : > { %3493 = vmatpush3.bf16.msra.mxu1 %v3492_v39 }
 0x415   : > { %3461 = vmatpush3.bf16.msra.mxu0 %v3460_v32  ;;  %3495 = vmatprep.subr.bf16.mxu1 %v3494_v24 }
 0x416   : > { %3463 = vmatprep.subr.bf16.mxu0 %v3462_v43 }
 0x418   : > { %3497 = vmatpush3.bf16.msra.mxu1 %v3496_v48 }
 0x419   : > { %3465 = vmatpush3.bf16.msra.mxu0 %v3464_v49  ;;  %3499 = vmatprep.subr.bf16.mxu1 %v3498_v54 }
 0x41a   : > { %3467 = vmatprep.subr.bf16.mxu0 %v3466_v56 }
 0x41c   : > { %3501 = vmatpush3.bf16.msra.mxu1 %v3500_v60 }
 0x41d   : > { %3469 = vmatpush3.bf16.msra.mxu0 %v3468_v44 }
 0x4d1   : > { %v3068_v63 = vpop.f32.mrb[56].mxu0 }
 0x4d2   : > { %v3069_v9 = vpop.f32.mrb[57].mxu0  ;;  %v3106_v34 = vpop.f32.mrb[56].mxu1 }
 0x4d3   : > { %v3070_v1 = vadd.f32 %v3069_v9, %v3068_v63  ;;  %v3107_v2 = vpop.f32.mrb[57].mxu1 }
 0x4d4   : > { %v3108_v6 = vadd.f32 %v3107_v2, %v3106_v34 }
 0x4d5   : > { %v2135_v11 = vadd.f32 %v3070_v1, %v2665_v0  ;;  %v3071_v12 = vpop.f32.mrb[58].mxu0 }
 0x4d6   : > { %v3072_v13 = vpop.f32.mrb[59].mxu0  ;;  %v3109_v14 = vpop.f32.mrb[58].mxu1 }
 0x4d7   : > { %v2210_v15 = vadd.f32 %v3108_v6, %v2135_v11  ;;  %v3073_v33 = vadd.f32 %v3072_v13, %v3071_v12  ;;  %v3110_v16 = vpop.f32.mrb[59].mxu1 }
 0x4d8   : > { %v3111_v17 = vadd.f32 %v3110_v16, %v3109_v14 }
 0x4d9   : > { %vm2218_vm0 = vcmp.ge.f32.partialorder %v2210_v15, 0.0  ;;  %v2220_v18 = vmul.f32 0.2, %v2210_v15  ;;  %v2140_v8 = vadd.f32 %v3073_v33, %v2665_v0 }
 0x4db   : > { %v2222_v21 = vsel %vm2218_vm0, %v2210_v15, %v2220_v18  ;;  %v2215_v25 = vadd.f32 %v3111_v17, %v2140_v8 }
 0x4dc   : > { %2224 = vst [vmem:[#allocation3] sm:$0xff] %v2222_v21 }
 0x4dd   : > { %vm2219_vm1 = vcmp.ge.f32.partialorder %v2215_v25, 0.0  ;;  %v2221_v26 = vmul.f32 0.2, %v2215_v25 }
 0x4df   : > { %v2223_v28 = vsel %vm2219_vm1, %v2215_v25, %v2221_v26 }
 0x4e0   : > { %2225 = vst [vmem:[#allocation3 + $0x8] sm:$0xff] %v2223_v28 }
 0x4e7   : > { %v2226_v29 = vld [vmem:[#allocation3] ss:$2 sm:$0xff]  ;;  %v2227_v31 = vld [vmem:[#allocation3 + $0x1] ss:$2 sm:$0xff] }
 0x4e8   : > { %2363 = vmatprep.mubr.f32.mxu0 %v2226_v29  ;;  %2434 = vmatmul.mubr.f32.vlgmr.msra.gmra.mrb[60].mxu1 %v2227_v31 }
 0x4e9   : > { %2364 = vmatmul.mubr.f32.vlgmr.msra.gmra.mrb[60].mxu0 %v3860_v52 }
 0x5bb   : > { %v3179_v22 = vpop.f32.mrb[60].mxu1 }
 0x5bc   : > { %v3144_v27 = vpop.f32.mrb[60].mxu0  ;;  %v3180_v46 = vpop.f32.mrb[61].mxu1 }
 0x5bd   : > { %v3181_v5 = vadd.f32 %v3180_v46, %v3179_v22  ;;  %v3145_v30 = vpop.f32.mrb[61].mxu0 }
 0x5be   : > { %v3146_v57 = vadd.f32 %v3145_v30, %v3144_v27 }
 0x5c0   : > { %v2366_v23 = vadd.f32 %v3146_v57, %v2670_v40 }
 0x5c2   : > { %v2436_v20 = vadd.f32 %v3181_v5, %v2366_v23 }
 0x5c4   : > { %2439 = vst [vmem:[%s477_s12] sm:$0xff] %v2436_v20 }
 0x5c5   : > { %3785 = shalt.err (!%p3782_p8)
}
 0x5c6   : > { %s3786_s26 = scalar_lea.hbm %s4556_s9, 128  ;;  %s3790_s24 = scalar_lea.hbm %s4646_s27, 256 }
 0x5c7   : > { %p3787_p6 = scmp.ne.s32.totalorder %s4556_s9, %s3786_s26  ;;  %p3791_p3 = scmp.lt.u32.totalorder %s4556_s9, %s4646_s27 }
 0x5c8   : > { %p3792_p5 = scmp.lt.u32.totalorder %s3790_s24, %s3786_s26  ;;  %p3794_p7 = scmp.lt.u32.totalorder %s3786_s26, %s4556_s9 }
 0x5c9   : > { %p3788_p10 = pnand %p3787_p6, %p4647_p4 }
 0x5ca   : > { %p3793_p9 = por %p3792_p5, %p3791_p3 }
 0x5cb   : > { %p3789_p11 = pneg %p3788_p10 }
 0x5cc   : > { %p3795_p12 = por %p3794_p7, %p3793_p9 }
 0x5ce   : > { %p3796_p1 = pnand %p3795_p12, %p3789_p11 }
 0x5d0   : > { %3799 = shalt.err (!%p3796_p1)
}
 0x5d1   : > { %3524 = dma.vmem_to_hbm [thread:$0]  (%p4647_p4), %s4558_s13, 128, %s4556_s9, %s2441_s28  }
 0x5d2 PF: > { %s2466_s1 = sand.u32 1, %s3838_s17   ;;  %p4648_p13 = scmp.ne.s32.totalorder %s4628_s21, 0 }
 0x5d3   : > { %p4649_p0 = scmp.ge.s32.totalorder %s3850_s20, 2  ;;  %s2467_s22 = scalar_lea.sflag [#allocation6], %s2466_s1 }
 0x5d5   : > { %p3547_p2 = pnand %p4649_p0, %p4648_p13 }
 0x5d7   : > { %3833 = dma.done.wait (!%p3547_p2), %s2467_s22, 128  }
 0x5d8   : > { %3835 = vsyncadd (!%p3547_p2), %s2467_s22, 4294967168  ;;  %p27_p8 = scmp.ge.s32.totalorder %s4095_s16, 4   ;;  %s4650_s17 = smov %s3842_s18 }
 0x5d9   : > { %s4651_s18 = smov %s3846_s19  ;;  %s4652_s19 = smov %s4107_s10 }
 0x5da   : > { %s4653_s20 = smov %s4095_s16  ;;  %29 = sbr.rel (!%p27_p8) target bundleno = 13 (0xd), region = 183 }
 0x5e1   :  { %2472 = vsyncpa [#allocation5], 1 }
 0x5e2   :  { %2474 = vsyncpa [#allocation5 + $0x1], 1 }
 0x5e3   :  { %2475 = vsyncpa [#allocation8], 1 }
 0x5e4   :  { %2476 = vsyncpa [#allocation11], 1 }
 0x5e5   :  { %2477 = vsyncpa [#allocation14], 1 }
 0x5e6   :  { %2478 = vsyncpa [#allocation6], 1 }
 0x5e7   :  { %2480 = vsyncpa [#allocation6 + $0x1], 1 }

</bundles_post_ra>
